<compile_context>
chip_gen: v6e
topology: v6e:2x2x1
jax: 0.10.0
libtpu: 0.0.40
codegen_flags: <defaults>
</compile_context>

<pallas_src>
import math

import jax
import jax.numpy as jnp
from jax import lax
from jax.experimental import pallas as pl
from jax.experimental.pallas import tpu as pltpu

NHEAD = 4
LN_EPS = 1e-5
PARAMS_PER_LAYER = 12


def _layer_norm(y, gamma, beta):
    mu = jnp.mean(y, axis=-1, keepdims=True)
    yc = y - mu
    var = jnp.mean(yc * yc, axis=-1, keepdims=True)   # biased variance, as in PyTorch LN
    return yc * lax.rsqrt(var + LN_EPS) * gamma + beta


# ------------------------------ fused kernel --------------------------------

def make_fused_scorer_kernel(B, S, E, nhead, num_layers):
    Dh = E // nhead
    scale = 1.0 / math.sqrt(Dh)

    def kernel(*refs):
        it = iter(refs)
        x_ref = next(it)
        emb_w = next(it)
        emb_b = next(it)
        layers = [tuple(next(it) for _ in range(PARAMS_PER_LAYER))
                  for _ in range(num_layers)]
        fc_w = next(it)
        fc_b = next(it)
        o_ref = next(it)
        attn_sc = next(it)          # VMEM scratch (B*S, E) for assembling attention output

        # ---- embedding: (M, Din) @ (Din, E) + b --------------------------------
        x = jnp.dot(x_ref[...], emb_w[...],
                    preferred_element_type=jnp.float32) + emb_b[...]

        # ---- post-norm TransformerEncoderLayer x num_layers --------------------
        for (ipw, ipb, opw, opb, n1w, n1b, l1w, l1b, l2w, l2b, n2w, n2b) in layers:
            qkv = jnp.dot(x, ipw[...], preferred_element_type=jnp.float32) + ipb[...]
            q = qkv[:, :E]
            k = qkv[:, E:2 * E]
            v = qkv[:, 2 * E:]
            opw_v = opw[...]

            # Self-attention per (batch, head); heads are contiguous Dh-wide column chunks.
            # out_proj folded in: concat_h(o_h) @ W_op == sum_h o_h @ W_op[h*Dh:(h+1)*Dh, :]
            for b in range(B):
                r0, r1 = b * S, (b + 1) * S
                acc = jnp.zeros((S, E), jnp.float32)
                for h in range(nhead):
                    c0, c1 = h * Dh, (h + 1) * Dh
                    qh = q[r0:r1, c0:c1]
                    kh = k[r0:r1, c0:c1]
                    vh = v[r0:r1, c0:c1]
                    # q @ k^T without explicit transpose: contract last dims of both
                    s = lax.dot_general(qh, kh, (((1,), (1,)), ((), ())),
                                        preferred_element_type=jnp.float32) * scale
                    s = s - jnp.max(s, axis=-1, keepdims=True)
                    p = jnp.exp(s)
                    p = p * pl.reciprocal(jnp.sum(p, axis=-1, keepdims=True),
                                          approx=True)
                    oh = jnp.dot(p, vh, preferred_element_type=jnp.float32)   # (S, Dh)
                    acc = acc + jnp.dot(oh, opw_v[c0:c1, :],
                                        preferred_element_type=jnp.float32)  # (S, E)
                attn_sc[r0:r1, :] = acc

            attn = attn_sc[...] + opb[...]
            x = _layer_norm(x + attn, n1w[...], n1b[...])          # norm1(x + SA(x))

            # feed-forward block: (M, 2048) intermediate never leaves VMEM
            ff = jnp.dot(x, l1w[...], preferred_element_type=jnp.float32) + l1b[...]
            ff = jnp.maximum(ff, 0.0)
            ff = jnp.dot(ff, l2w[...], preferred_element_type=jnp.float32) + l2b[...]
            x = _layer_norm(x + ff, n2w[...], n2b[...])            # norm2(x + FF(x))

        # ---- fc + sigmoid epilogue, lane-contiguous output ---------------------
        # fc_w stored as a (1, E) row; contract against last dim of x -> (1, B*S)
        logits = lax.dot_general(fc_w[...], x, (((1,), (1,)), ((), ())),
                                 preferred_element_type=jnp.float32) + fc_b[...]
        scores = jax.nn.sigmoid(logits)                            # (1, B*S)
        for b in range(B):
            o_ref[b:b + 1, :] = scores[:, b * S:(b + 1) * S]

    return kernel


# ------------------------------ model wrapper --------------------------------

def transformer_scorer_forward(features, params, nhead=NHEAD):
    """features: (B, S, input_size) -> scores: (B, S) in (0, 1). One pallas_call."""
    B, S, Din = features.shape
    E = params["emb_w"].shape[1]
    M = B * S

    flat = [features.reshape(M, Din), params["emb_w"], params["emb_b"]]
    for p in params["layers"]:
        flat += [p["in_proj_w"], p["in_proj_b"], p["out_proj_w"], p["out_proj_b"],
                 p["norm1_w"], p["norm1_b"], p["lin1_w"], p["lin1_b"],
                 p["lin2_w"], p["lin2_b"], p["norm2_w"], p["norm2_b"]]
    flat += [params["fc_w"], params["fc_b"]]

    # All operands are 2-D and fit VMEM; full-array blocks, single grid step.
    in_specs = [pl.BlockSpec(a.shape, lambda i: (0, 0)) for a in flat]

    kernel = make_fused_scorer_kernel(B, S, E, nhead, len(params["layers"]))
    return pl.pallas_call(
        kernel,
        out_shape=jax.ShapeDtypeStruct((B, S), jnp.float32),
        grid=(1,),
        in_specs=in_specs,
        out_specs=pl.BlockSpec((B, S), lambda i: (0, 0)),
        scratch_shapes=[pltpu.VMEM((M, E), jnp.float32)],
        compiler_params=pltpu.CompilerParams(
            dimension_semantics=("arbitrary",),
            vmem_limit_bytes=32 * 1024 * 1024,
        ),
    )(*flat)


# --------------------------- pure-JAX reference ------------------------------

def reference_forward(features, params, nhead=NHEAD):
    B, S, Din = features.shape
    E = params["emb_w"].shape[1]
    Dh = E // nhead

    def ln(y, g, b):
        mu = jnp.mean(y, -1, keepdims=True)
        yc = y - mu
        var = jnp.mean(yc * yc, -1, keepdims=True)
        return yc / jnp.sqrt(var + LN_EPS) * g + b

    x = features.reshape(B * S, Din) @ params["emb_w"] + params["emb_b"]
    for p in params["layers"]:
        qkv = x @ p["in_proj_w"] + p["in_proj_b"]
        q, k, v = qkv[:, :E], qkv[:, E:2 * E], qkv[:, 2 * E:]

        def heads(t):
            return t.reshape(B, S, nhead, Dh).transpose(0, 2, 1, 3)

        s = jnp.einsum("bhqd,bhkd->bhqk", heads(q), heads(k)) / jnp.sqrt(float(Dh))
        pm = jax.nn.softmax(s, axis=-1)
        o = jnp.einsum("bhqk,bhkd->bhqd", pm, heads(v))
        o = o.transpose(0, 2, 1, 3).reshape(B * S, E)
        attn = o @ p["out_proj_w"] + p["out_proj_b"]
        x = ln(x + attn, p["norm1_w"], p["norm1_b"])
        ff = jnp.maximum(x @ p["lin1_w"] + p["lin1_b"], 0.0)
        ff = ff @ p["lin2_w"] + p["lin2_b"]
        x = ln(x + ff, p["norm2_w"], p["norm2_b"])
    logits = x @ params["fc_w"].T + params["fc_b"]
    return jax.nn.sigmoid(logits[:, 0]).reshape(B, S)


# ------------------------- deterministic param init --------------------------

def init_params(key, input_size, hidden_size, num_layers=2, dff=2048):
    E = hidden_size * 2

    def nrm(k, shape, std=0.02):
        return std * jax.random.normal(k, shape, jnp.float32)

    keys = jax.random.split(key, 2 + num_layers)
    params = {
        "emb_w": nrm(keys[0], (input_size, E)),     # stored as (in, out) = W.T
        "emb_b": jnp.zeros((1, E), jnp.float32),
        "fc_w": nrm(keys[1], (1, E)),               # stored as a row for the fused epilogue
        "fc_b": jnp.zeros((1, 1), jnp.float32),
        "layers": [],
    }
    for li in range(num_layers):
        lk = jax.random.split(keys[2 + li], 4)
        params["layers"].append(dict(
            in_proj_w=nrm(lk[0], (E, 3 * E)),
            in_proj_b=jnp.zeros((1, 3 * E), jnp.float32),
            out_proj_w=nrm(lk[1], (E, E)),
            out_proj_b=jnp.zeros((1, E), jnp.float32),
            norm1_w=jnp.ones((1, E), jnp.float32),
            norm1_b=jnp.zeros((1, E), jnp.float32),
            lin1_w=nrm(lk[2], (E, dff)),
            lin1_b=jnp.zeros((1, dff), jnp.float32),
            lin2_w=nrm(lk[3], (dff, E)),
            lin2_b=jnp.zeros((1, E), jnp.float32),
            norm2_w=jnp.ones((1, E), jnp.float32),
            norm2_b=jnp.zeros((1, E), jnp.float32),
        ))
    return params


# ----------------------------------- main ------------------------------------

if __name__ == "__main__":
    key = jax.random.PRNGKey(0)
    k_params, k_feat = jax.random.split(key)

    B, S = 2, 8
    input_size, hidden_size = 32, 32        # d_model = hidden_size * 2 = 64, nhead = 4

    params = init_params(k_params, input_size, hidden_size, num_layers=2)
    features = jax.random.normal(k_feat, (B, S, input_size), jnp.float32)

    fwd = jax.jit(transformer_scorer_forward)
    scores = jax.block_until_ready(fwd(features, params))

    ref = reference_forward(features, params)

    assert scores.shape == (B, S)
    assert bool(jnp.all(jnp.isfinite(scores)))
    assert bool(jnp.all((scores > 0.0) & (scores < 1.0)))
    assert bool(jnp.allclose(scores, ref, atol=2e-2, rtol=2e-2))
    print("KERNEL_OK")
</pallas_src>

<mosaic_0001>
module attributes {stable_mosaic.version = 11 : i64} {
  func.func @kernel(%arg0: i32, %arg1: memref<16x32xf32, #tpu.memory_space<vmem>>, %arg2: memref<32x64xf32, #tpu.memory_space<vmem>>, %arg3: memref<1x64xf32, #tpu.memory_space<vmem>>, %arg4: memref<64x192xf32, #tpu.memory_space<vmem>>, %arg5: memref<1x192xf32, #tpu.memory_space<vmem>>, %arg6: memref<64x64xf32, #tpu.memory_space<vmem>>, %arg7: memref<1x64xf32, #tpu.memory_space<vmem>>, %arg8: memref<1x64xf32, #tpu.memory_space<vmem>>, %arg9: memref<1x64xf32, #tpu.memory_space<vmem>>, %arg10: memref<64x2048xf32, #tpu.memory_space<vmem>>, %arg11: memref<1x2048xf32, #tpu.memory_space<vmem>>, %arg12: memref<2048x64xf32, #tpu.memory_space<vmem>>, %arg13: memref<1x64xf32, #tpu.memory_space<vmem>>, %arg14: memref<1x64xf32, #tpu.memory_space<vmem>>, %arg15: memref<1x64xf32, #tpu.memory_space<vmem>>, %arg16: memref<64x192xf32, #tpu.memory_space<vmem>>, %arg17: memref<1x192xf32, #tpu.memory_space<vmem>>, %arg18: memref<64x64xf32, #tpu.memory_space<vmem>>, %arg19: memref<1x64xf32, #tpu.memory_space<vmem>>, %arg20: memref<1x64xf32, #tpu.memory_space<vmem>>, %arg21: memref<1x64xf32, #tpu.memory_space<vmem>>, %arg22: memref<64x2048xf32, #tpu.memory_space<vmem>>, %arg23: memref<1x2048xf32, #tpu.memory_space<vmem>>, %arg24: memref<2048x64xf32, #tpu.memory_space<vmem>>, %arg25: memref<1x64xf32, #tpu.memory_space<vmem>>, %arg26: memref<1x64xf32, #tpu.memory_space<vmem>>, %arg27: memref<1x64xf32, #tpu.memory_space<vmem>>, %arg28: memref<1x64xf32, #tpu.memory_space<vmem>>, %arg29: memref<1x1xf32, #tpu.memory_space<vmem>>, %arg30: memref<2x8xf32, #tpu.memory_space<vmem>>, %arg31: memref<16x64xf32, #tpu.memory_space<vmem>>) attributes {dimension_semantics = [#tpu.dimension_semantics<arbitrary>], iteration_bounds = array<i64: 1>, scalar_prefetch = 0 : i64, scratch_operands = 1 : i64, tpu.core_type = #tpu.core_type<tc>, window_params = [{pipeline_mode = #tpu.pipeline_mode<synchronous>, transform_indices = @transform_0, window_bounds = array<i64: 16, 32>}, {pipeline_mode = #tpu.pipeline_mode<synchronous>, transform_indices = @transform_1, window_bounds = array<i64: 32, 64>}, {pipeline_mode = #tpu.pipeline_mode<synchronous>, transform_indices = @transform_2, window_bounds = array<i64: 1, 64>}, {pipeline_mode = #tpu.pipeline_mode<synchronous>, transform_indices = @transform_3, window_bounds = array<i64: 64, 192>}, {pipeline_mode = #tpu.pipeline_mode<synchronous>, transform_indices = @transform_4, window_bounds = array<i64: 1, 192>}, {pipeline_mode = #tpu.pipeline_mode<synchronous>, transform_indices = @transform_5, window_bounds = array<i64: 64, 64>}, {pipeline_mode = #tpu.pipeline_mode<synchronous>, transform_indices = @transform_6, window_bounds = array<i64: 1, 64>}, {pipeline_mode = #tpu.pipeline_mode<synchronous>, transform_indices = @transform_7, window_bounds = array<i64: 1, 64>}, {pipeline_mode = #tpu.pipeline_mode<synchronous>, transform_indices = @transform_8, window_bounds = array<i64: 1, 64>}, {pipeline_mode = #tpu.pipeline_mode<synchronous>, transform_indices = @transform_9, window_bounds = array<i64: 64, 2048>}, {pipeline_mode = #tpu.pipeline_mode<synchronous>, transform_indices = @transform_10, window_bounds = array<i64: 1, 2048>}, {pipeline_mode = #tpu.pipeline_mode<synchronous>, transform_indices = @transform_11, window_bounds = array<i64: 2048, 64>}, {pipeline_mode = #tpu.pipeline_mode<synchronous>, transform_indices = @transform_12, window_bounds = array<i64: 1, 64>}, {pipeline_mode = #tpu.pipeline_mode<synchronous>, transform_indices = @transform_13, window_bounds = array<i64: 1, 64>}, {pipeline_mode = #tpu.pipeline_mode<synchronous>, transform_indices = @transform_14, window_bounds = array<i64: 1, 64>}, {pipeline_mode = #tpu.pipeline_mode<synchronous>, transform_indices = @transform_15, window_bounds = array<i64: 64, 192>}, {pipeline_mode = #tpu.pipeline_mode<synchronous>, transform_indices = @transform_16, window_bounds = array<i64: 1, 192>}, {pipeline_mode = #tpu.pipeline_mode<synchronous>, transform_indices = @transform_17, window_bounds = array<i64: 64, 64>}, {pipeline_mode = #tpu.pipeline_mode<synchronous>, transform_indices = @transform_18, window_bounds = array<i64: 1, 64>}, {pipeline_mode = #tpu.pipeline_mode<synchronous>, transform_indices = @transform_19, window_bounds = array<i64: 1, 64>}, {pipeline_mode = #tpu.pipeline_mode<synchronous>, transform_indices = @transform_20, window_bounds = array<i64: 1, 64>}, {pipeline_mode = #tpu.pipeline_mode<synchronous>, transform_indices = @transform_21, window_bounds = array<i64: 64, 2048>}, {pipeline_mode = #tpu.pipeline_mode<synchronous>, transform_indices = @transform_22, window_bounds = array<i64: 1, 2048>}, {pipeline_mode = #tpu.pipeline_mode<synchronous>, transform_indices = @transform_23, window_bounds = array<i64: 2048, 64>}, {pipeline_mode = #tpu.pipeline_mode<synchronous>, transform_indices = @transform_24, window_bounds = array<i64: 1, 64>}, {pipeline_mode = #tpu.pipeline_mode<synchronous>, transform_indices = @transform_25, window_bounds = array<i64: 1, 64>}, {pipeline_mode = #tpu.pipeline_mode<synchronous>, transform_indices = @transform_26, window_bounds = array<i64: 1, 64>}, {pipeline_mode = #tpu.pipeline_mode<synchronous>, transform_indices = @transform_27, window_bounds = array<i64: 1, 64>}, {pipeline_mode = #tpu.pipeline_mode<synchronous>, transform_indices = @transform_28, window_bounds = array<i64: 1, 1>}, {pipeline_mode = #tpu.pipeline_mode<synchronous>, transform_indices = @transform_29, window_bounds = array<i64: 2, 8>}]} {
    %c0 = arith.constant 0 : index
    %c0_0 = arith.constant 0 : index
    %0 = vector.load %arg1[%c0, %c0_0] : memref<16x32xf32, #tpu.memory_space<vmem>>, vector<16x32xf32>
    %c0_1 = arith.constant 0 : index
    %c0_2 = arith.constant 0 : index
    %1 = vector.load %arg2[%c0_1, %c0_2] : memref<32x64xf32, #tpu.memory_space<vmem>>, vector<32x64xf32>
    %cst = arith.constant dense<0.000000e+00> : vector<16x64xf32>
    %2 = tpu.matmul %0, %1, %cst {dimension_numbers = #tpu.dot_dimension_numbers<[1], [0], [0], [1], [0, 0, 1, 1], [], []>} : vector<16x32xf32>, vector<32x64xf32>, vector<16x64xf32> -> vector<16x64xf32>
    %c0_3 = arith.constant 0 : index
    %c0_4 = arith.constant 0 : index
    %3 = vector.load %arg3[%c0_3, %c0_4] : memref<1x64xf32, #tpu.memory_space<vmem>>, vector<1x64xf32>
    %4 = vector.broadcast %3 : vector<1x64xf32> to vector<16x64xf32>
    %5 = arith.addf %2, %4 : vector<16x64xf32>
    %c0_5 = arith.constant 0 : index
    %c0_6 = arith.constant 0 : index
    %6 = vector.load %arg4[%c0_5, %c0_6] : memref<64x192xf32, #tpu.memory_space<vmem>>, vector<64x192xf32>
    %cst_7 = arith.constant dense<0.000000e+00> : vector<16x192xf32>
    %7 = tpu.matmul %5, %6, %cst_7 {dimension_numbers = #tpu.dot_dimension_numbers<[1], [0], [0], [1], [0, 0, 1, 1], [], []>} : vector<16x64xf32>, vector<64x192xf32>, vector<16x192xf32> -> vector<16x192xf32>
    %c0_8 = arith.constant 0 : index
    %c0_9 = arith.constant 0 : index
    %8 = vector.load %arg5[%c0_8, %c0_9] : memref<1x192xf32, #tpu.memory_space<vmem>>, vector<1x192xf32>
    %9 = vector.broadcast %8 : vector<1x192xf32> to vector<16x192xf32>
    %10 = arith.addf %7, %9 : vector<16x192xf32>
    %11 = vector.extract_strided_slice %10 {offsets = [0, 0], sizes = [16, 64], strides = [1, 1]} : vector<16x192xf32> to vector<16x64xf32>
    %12 = vector.extract_strided_slice %10 {offsets = [0, 64], sizes = [16, 64], strides = [1, 1]} : vector<16x192xf32> to vector<16x64xf32>
    %13 = vector.extract_strided_slice %10 {offsets = [0, 128], sizes = [16, 64], strides = [1, 1]} : vector<16x192xf32> to vector<16x64xf32>
    %c0_10 = arith.constant 0 : index
    %c0_11 = arith.constant 0 : index
    %14 = vector.load %arg6[%c0_10, %c0_11] : memref<64x64xf32, #tpu.memory_space<vmem>>, vector<64x64xf32>
    %cst_12 = arith.constant 0.000000e+00 : f32
    %15 = vector.broadcast %cst_12 : f32 to vector<8x64xf32>
    %16 = vector.extract_strided_slice %11 {offsets = [0, 0], sizes = [8, 16], strides = [1, 1]} : vector<16x64xf32> to vector<8x16xf32>
    %17 = vector.extract_strided_slice %12 {offsets = [0, 0], sizes = [8, 16], strides = [1, 1]} : vector<16x64xf32> to vector<8x16xf32>
    %18 = vector.extract_strided_slice %13 {offsets = [0, 0], sizes = [8, 16], strides = [1, 1]} : vector<16x64xf32> to vector<8x16xf32>
    %cst_13 = arith.constant dense<0.000000e+00> : vector<8x8xf32>
    %19 = tpu.matmul %16, %17, %cst_13 {dimension_numbers = #tpu.dot_dimension_numbers<[1], [1], [0], [0], [0, 0, 1, 0], [], []>} : vector<8x16xf32>, vector<8x16xf32>, vector<8x8xf32> -> vector<8x8xf32>
    %cst_14 = arith.constant 2.500000e-01 : f32
    %20 = vector.broadcast %cst_14 : f32 to vector<8x8xf32>
    %21 = arith.mulf %19, %20 : vector<8x8xf32>
    %cst_15 = arith.constant dense<0xFF800000> : vector<8xf32>
    %22 = vector.multi_reduction <maximumf>, %21, %cst_15 [1] : vector<8x8xf32> to vector<8xf32>
    %23 = vector.shape_cast %22 : vector<8xf32> to vector<8x1xf32>
    %24 = vector.broadcast %23 : vector<8x1xf32> to vector<8x8xf32>
    %25 = arith.subf %21, %24 : vector<8x8xf32>
    %26 = math.exp %25 : vector<8x8xf32>
    %cst_16 = arith.constant dense<0.000000e+00> : vector<8xf32>
    %27 = vector.multi_reduction <add>, %26, %cst_16 [1] : vector<8x8xf32> to vector<8xf32>
    %28 = vector.shape_cast %27 : vector<8xf32> to vector<8x1xf32>
    %29 = tpu.reciprocal %28 {approx = true} : vector<8x1xf32> -> vector<8x1xf32>
    %30 = vector.broadcast %29 : vector<8x1xf32> to vector<8x8xf32>
    %31 = arith.mulf %26, %30 : vector<8x8xf32>
    %cst_17 = arith.constant dense<0.000000e+00> : vector<8x16xf32>
    %32 = tpu.matmul %31, %18, %cst_17 {dimension_numbers = #tpu.dot_dimension_numbers<[1], [0], [0], [1], [0, 0, 1, 1], [], []>} : vector<8x8xf32>, vector<8x16xf32>, vector<8x16xf32> -> vector<8x16xf32>
    %33 = vector.extract_strided_slice %14 {offsets = [0, 0], sizes = [16, 64], strides = [1, 1]} : vector<64x64xf32> to vector<16x64xf32>
    %cst_18 = arith.constant dense<0.000000e+00> : vector<8x64xf32>
    %34 = tpu.matmul %32, %33, %cst_18 {dimension_numbers = #tpu.dot_dimension_numbers<[1], [0], [0], [1], [0, 0, 1, 1], [], []>} : vector<8x16xf32>, vector<16x64xf32>, vector<8x64xf32> -> vector<8x64xf32>
    %35 = arith.addf %15, %34 : vector<8x64xf32>
    %36 = vector.extract_strided_slice %11 {offsets = [0, 16], sizes = [8, 16], strides = [1, 1]} : vector<16x64xf32> to vector<8x16xf32>
    %37 = vector.extract_strided_slice %12 {offsets = [0, 16], sizes = [8, 16], strides = [1, 1]} : vector<16x64xf32> to vector<8x16xf32>
    %38 = vector.extract_strided_slice %13 {offsets = [0, 16], sizes = [8, 16], strides = [1, 1]} : vector<16x64xf32> to vector<8x16xf32>
    %cst_19 = arith.constant dense<0.000000e+00> : vector<8x8xf32>
    %39 = tpu.matmul %36, %37, %cst_19 {dimension_numbers = #tpu.dot_dimension_numbers<[1], [1], [0], [0], [0, 0, 1, 0], [], []>} : vector<8x16xf32>, vector<8x16xf32>, vector<8x8xf32> -> vector<8x8xf32>
    %cst_20 = arith.constant 2.500000e-01 : f32
    %40 = vector.broadcast %cst_20 : f32 to vector<8x8xf32>
    %41 = arith.mulf %39, %40 : vector<8x8xf32>
    %cst_21 = arith.constant dense<0xFF800000> : vector<8xf32>
    %42 = vector.multi_reduction <maximumf>, %41, %cst_21 [1] : vector<8x8xf32> to vector<8xf32>
    %43 = vector.shape_cast %42 : vector<8xf32> to vector<8x1xf32>
    %44 = vector.broadcast %43 : vector<8x1xf32> to vector<8x8xf32>
    %45 = arith.subf %41, %44 : vector<8x8xf32>
    %46 = math.exp %45 : vector<8x8xf32>
    %cst_22 = arith.constant dense<0.000000e+00> : vector<8xf32>
    %47 = vector.multi_reduction <add>, %46, %cst_22 [1] : vector<8x8xf32> to vector<8xf32>
    %48 = vector.shape_cast %47 : vector<8xf32> to vector<8x1xf32>
    %49 = tpu.reciprocal %48 {approx = true} : vector<8x1xf32> -> vector<8x1xf32>
    %50 = vector.broadcast %49 : vector<8x1xf32> to vector<8x8xf32>
    %51 = arith.mulf %46, %50 : vector<8x8xf32>
    %cst_23 = arith.constant dense<0.000000e+00> : vector<8x16xf32>
    %52 = tpu.matmul %51, %38, %cst_23 {dimension_numbers = #tpu.dot_dimension_numbers<[1], [0], [0], [1], [0, 0, 1, 1], [], []>} : vector<8x8xf32>, vector<8x16xf32>, vector<8x16xf32> -> vector<8x16xf32>
    %53 = vector.extract_strided_slice %14 {offsets = [16, 0], sizes = [16, 64], strides = [1, 1]} : vector<64x64xf32> to vector<16x64xf32>
    %cst_24 = arith.constant dense<0.000000e+00> : vector<8x64xf32>
    %54 = tpu.matmul %52, %53, %cst_24 {dimension_numbers = #tpu.dot_dimension_numbers<[1], [0], [0], [1], [0, 0, 1, 1], [], []>} : vector<8x16xf32>, vector<16x64xf32>, vector<8x64xf32> -> vector<8x64xf32>
    %55 = arith.addf %35, %54 : vector<8x64xf32>
    %56 = vector.extract_strided_slice %11 {offsets = [0, 32], sizes = [8, 16], strides = [1, 1]} : vector<16x64xf32> to vector<8x16xf32>
    %57 = vector.extract_strided_slice %12 {offsets = [0, 32], sizes = [8, 16], strides = [1, 1]} : vector<16x64xf32> to vector<8x16xf32>
    %58 = vector.extract_strided_slice %13 {offsets = [0, 32], sizes = [8, 16], strides = [1, 1]} : vector<16x64xf32> to vector<8x16xf32>
    %cst_25 = arith.constant dense<0.000000e+00> : vector<8x8xf32>
    %59 = tpu.matmul %56, %57, %cst_25 {dimension_numbers = #tpu.dot_dimension_numbers<[1], [1], [0], [0], [0, 0, 1, 0], [], []>} : vector<8x16xf32>, vector<8x16xf32>, vector<8x8xf32> -> vector<8x8xf32>
    %cst_26 = arith.constant 2.500000e-01 : f32
    %60 = vector.broadcast %cst_26 : f32 to vector<8x8xf32>
    %61 = arith.mulf %59, %60 : vector<8x8xf32>
    %cst_27 = arith.constant dense<0xFF800000> : vector<8xf32>
    %62 = vector.multi_reduction <maximumf>, %61, %cst_27 [1] : vector<8x8xf32> to vector<8xf32>
    %63 = vector.shape_cast %62 : vector<8xf32> to vector<8x1xf32>
    %64 = vector.broadcast %63 : vector<8x1xf32> to vector<8x8xf32>
    %65 = arith.subf %61, %64 : vector<8x8xf32>
    %66 = math.exp %65 : vector<8x8xf32>
    %cst_28 = arith.constant dense<0.000000e+00> : vector<8xf32>
    %67 = vector.multi_reduction <add>, %66, %cst_28 [1] : vector<8x8xf32> to vector<8xf32>
    %68 = vector.shape_cast %67 : vector<8xf32> to vector<8x1xf32>
    %69 = tpu.reciprocal %68 {approx = true} : vector<8x1xf32> -> vector<8x1xf32>
    %70 = vector.broadcast %69 : vector<8x1xf32> to vector<8x8xf32>
    %71 = arith.mulf %66, %70 : vector<8x8xf32>
    %cst_29 = arith.constant dense<0.000000e+00> : vector<8x16xf32>
    %72 = tpu.matmul %71, %58, %cst_29 {dimension_numbers = #tpu.dot_dimension_numbers<[1], [0], [0], [1], [0, 0, 1, 1], [], []>} : vector<8x8xf32>, vector<8x16xf32>, vector<8x16xf32> -> vector<8x16xf32>
    %73 = vector.extract_strided_slice %14 {offsets = [32, 0], sizes = [16, 64], strides = [1, 1]} : vector<64x64xf32> to vector<16x64xf32>
    %cst_30 = arith.constant dense<0.000000e+00> : vector<8x64xf32>
    %74 = tpu.matmul %72, %73, %cst_30 {dimension_numbers = #tpu.dot_dimension_numbers<[1], [0], [0], [1], [0, 0, 1, 1], [], []>} : vector<8x16xf32>, vector<16x64xf32>, vector<8x64xf32> -> vector<8x64xf32>
    %75 = arith.addf %55, %74 : vector<8x64xf32>
    %76 = vector.extract_strided_slice %11 {offsets = [0, 48], sizes = [8, 16], strides = [1, 1]} : vector<16x64xf32> to vector<8x16xf32>
    %77 = vector.extract_strided_slice %12 {offsets = [0, 48], sizes = [8, 16], strides = [1, 1]} : vector<16x64xf32> to vector<8x16xf32>
    %78 = vector.extract_strided_slice %13 {offsets = [0, 48], sizes = [8, 16], strides = [1, 1]} : vector<16x64xf32> to vector<8x16xf32>
    %cst_31 = arith.constant dense<0.000000e+00> : vector<8x8xf32>
    %79 = tpu.matmul %76, %77, %cst_31 {dimension_numbers = #tpu.dot_dimension_numbers<[1], [1], [0], [0], [0, 0, 1, 0], [], []>} : vector<8x16xf32>, vector<8x16xf32>, vector<8x8xf32> -> vector<8x8xf32>
    %cst_32 = arith.constant 2.500000e-01 : f32
    %80 = vector.broadcast %cst_32 : f32 to vector<8x8xf32>
    %81 = arith.mulf %79, %80 : vector<8x8xf32>
    %cst_33 = arith.constant dense<0xFF800000> : vector<8xf32>
    %82 = vector.multi_reduction <maximumf>, %81, %cst_33 [1] : vector<8x8xf32> to vector<8xf32>
    %83 = vector.shape_cast %82 : vector<8xf32> to vector<8x1xf32>
    %84 = vector.broadcast %83 : vector<8x1xf32> to vector<8x8xf32>
    %85 = arith.subf %81, %84 : vector<8x8xf32>
    %86 = math.exp %85 : vector<8x8xf32>
    %cst_34 = arith.constant dense<0.000000e+00> : vector<8xf32>
    %87 = vector.multi_reduction <add>, %86, %cst_34 [1] : vector<8x8xf32> to vector<8xf32>
    %88 = vector.shape_cast %87 : vector<8xf32> to vector<8x1xf32>
    %89 = tpu.reciprocal %88 {approx = true} : vector<8x1xf32> -> vector<8x1xf32>
    %90 = vector.broadcast %89 : vector<8x1xf32> to vector<8x8xf32>
    %91 = arith.mulf %86, %90 : vector<8x8xf32>
    %cst_35 = arith.constant dense<0.000000e+00> : vector<8x16xf32>
    %92 = tpu.matmul %91, %78, %cst_35 {dimension_numbers = #tpu.dot_dimension_numbers<[1], [0], [0], [1], [0, 0, 1, 1], [], []>} : vector<8x8xf32>, vector<8x16xf32>, vector<8x16xf32> -> vector<8x16xf32>
    %93 = vector.extract_strided_slice %14 {offsets = [48, 0], sizes = [16, 64], strides = [1, 1]} : vector<64x64xf32> to vector<16x64xf32>
    %cst_36 = arith.constant dense<0.000000e+00> : vector<8x64xf32>
    %94 = tpu.matmul %92, %93, %cst_36 {dimension_numbers = #tpu.dot_dimension_numbers<[1], [0], [0], [1], [0, 0, 1, 1], [], []>} : vector<8x16xf32>, vector<16x64xf32>, vector<8x64xf32> -> vector<8x64xf32>
    %95 = arith.addf %75, %94 : vector<8x64xf32>
    %c0_37 = arith.constant 0 : index
    %c0_38 = arith.constant 0 : index
    %96 = vector.load %arg31[%c0_37, %c0_38] : memref<16x64xf32, #tpu.memory_space<vmem>>, vector<8x64xf32>
    tpu.vector_store %arg31[%c0_37, %c0_38], %95 {strides = array<i32>} : memref<16x64xf32, #tpu.memory_space<vmem>>, vector<8x64xf32>,
    %cst_39 = arith.constant 0.000000e+00 : f32
    %97 = vector.broadcast %cst_39 : f32 to vector<8x64xf32>
    %98 = vector.extract_strided_slice %11 {offsets = [8, 0], sizes = [8, 16], strides = [1, 1]} : vector<16x64xf32> to vector<8x16xf32>
    %99 = vector.extract_strided_slice %12 {offsets = [8, 0], sizes = [8, 16], strides = [1, 1]} : vector<16x64xf32> to vector<8x16xf32>
    %100 = vector.extract_strided_slice %13 {offsets = [8, 0], sizes = [8, 16], strides = [1, 1]} : vector<16x64xf32> to vector<8x16xf32>
    %cst_40 = arith.constant dense<0.000000e+00> : vector<8x8xf32>
    %101 = tpu.matmul %98, %99, %cst_40 {dimension_numbers = #tpu.dot_dimension_numbers<[1], [1], [0], [0], [0, 0, 1, 0], [], []>} : vector<8x16xf32>, vector<8x16xf32>, vector<8x8xf32> -> vector<8x8xf32>
    %cst_41 = arith.constant 2.500000e-01 : f32
    %102 = vector.broadcast %cst_41 : f32 to vector<8x8xf32>
    %103 = arith.mulf %101, %102 : vector<8x8xf32>
    %cst_42 = arith.constant dense<0xFF800000> : vector<8xf32>
    %104 = vector.multi_reduction <maximumf>, %103, %cst_42 [1] : vector<8x8xf32> to vector<8xf32>
    %105 = vector.shape_cast %104 : vector<8xf32> to vector<8x1xf32>
    %106 = vector.broadcast %105 : vector<8x1xf32> to vector<8x8xf32>
    %107 = arith.subf %103, %106 : vector<8x8xf32>
    %108 = math.exp %107 : vector<8x8xf32>
    %cst_43 = arith.constant dense<0.000000e+00> : vector<8xf32>
    %109 = vector.multi_reduction <add>, %108, %cst_43 [1] : vector<8x8xf32> to vector<8xf32>
    %110 = vector.shape_cast %109 : vector<8xf32> to vector<8x1xf32>
    %111 = tpu.reciprocal %110 {approx = true} : vector<8x1xf32> -> vector<8x1xf32>
    %112 = vector.broadcast %111 : vector<8x1xf32> to vector<8x8xf32>
    %113 = arith.mulf %108, %112 : vector<8x8xf32>
    %cst_44 = arith.constant dense<0.000000e+00> : vector<8x16xf32>
    %114 = tpu.matmul %113, %100, %cst_44 {dimension_numbers = #tpu.dot_dimension_numbers<[1], [0], [0], [1], [0, 0, 1, 1], [], []>} : vector<8x8xf32>, vector<8x16xf32>, vector<8x16xf32> -> vector<8x16xf32>
    %115 = vector.extract_strided_slice %14 {offsets = [0, 0], sizes = [16, 64], strides = [1, 1]} : vector<64x64xf32> to vector<16x64xf32>
    %cst_45 = arith.constant dense<0.000000e+00> : vector<8x64xf32>
    %116 = tpu.matmul %114, %115, %cst_45 {dimension_numbers = #tpu.dot_dimension_numbers<[1], [0], [0], [1], [0, 0, 1, 1], [], []>} : vector<8x16xf32>, vector<16x64xf32>, vector<8x64xf32> -> vector<8x64xf32>
    %117 = arith.addf %97, %116 : vector<8x64xf32>
    %118 = vector.extract_strided_slice %11 {offsets = [8, 16], sizes = [8, 16], strides = [1, 1]} : vector<16x64xf32> to vector<8x16xf32>
    %119 = vector.extract_strided_slice %12 {offsets = [8, 16], sizes = [8, 16], strides = [1, 1]} : vector<16x64xf32> to vector<8x16xf32>
    %120 = vector.extract_strided_slice %13 {offsets = [8, 16], sizes = [8, 16], strides = [1, 1]} : vector<16x64xf32> to vector<8x16xf32>
    %cst_46 = arith.constant dense<0.000000e+00> : vector<8x8xf32>
    %121 = tpu.matmul %118, %119, %cst_46 {dimension_numbers = #tpu.dot_dimension_numbers<[1], [1], [0], [0], [0, 0, 1, 0], [], []>} : vector<8x16xf32>, vector<8x16xf32>, vector<8x8xf32> -> vector<8x8xf32>
    %cst_47 = arith.constant 2.500000e-01 : f32
    %122 = vector.broadcast %cst_47 : f32 to vector<8x8xf32>
    %123 = arith.mulf %121, %122 : vector<8x8xf32>
    %cst_48 = arith.constant dense<0xFF800000> : vector<8xf32>
    %124 = vector.multi_reduction <maximumf>, %123, %cst_48 [1] : vector<8x8xf32> to vector<8xf32>
    %125 = vector.shape_cast %124 : vector<8xf32> to vector<8x1xf32>
    %126 = vector.broadcast %125 : vector<8x1xf32> to vector<8x8xf32>
    %127 = arith.subf %123, %126 : vector<8x8xf32>
    %128 = math.exp %127 : vector<8x8xf32>
    %cst_49 = arith.constant dense<0.000000e+00> : vector<8xf32>
    %129 = vector.multi_reduction <add>, %128, %cst_49 [1] : vector<8x8xf32> to vector<8xf32>
    %130 = vector.shape_cast %129 : vector<8xf32> to vector<8x1xf32>
    %131 = tpu.reciprocal %130 {approx = true} : vector<8x1xf32> -> vector<8x1xf32>
    %132 = vector.broadcast %131 : vector<8x1xf32> to vector<8x8xf32>
    %133 = arith.mulf %128, %132 : vector<8x8xf32>
    %cst_50 = arith.constant dense<0.000000e+00> : vector<8x16xf32>
    %134 = tpu.matmul %133, %120, %cst_50 {dimension_numbers = #tpu.dot_dimension_numbers<[1], [0], [0], [1], [0, 0, 1, 1], [], []>} : vector<8x8xf32>, vector<8x16xf32>, vector<8x16xf32> -> vector<8x16xf32>
    %135 = vector.extract_strided_slice %14 {offsets = [16, 0], sizes = [16, 64], strides = [1, 1]} : vector<64x64xf32> to vector<16x64xf32>
    %cst_51 = arith.constant dense<0.000000e+00> : vector<8x64xf32>
    %136 = tpu.matmul %134, %135, %cst_51 {dimension_numbers = #tpu.dot_dimension_numbers<[1], [0], [0], [1], [0, 0, 1, 1], [], []>} : vector<8x16xf32>, vector<16x64xf32>, vector<8x64xf32> -> vector<8x64xf32>
    %137 = arith.addf %117, %136 : vector<8x64xf32>
    %138 = vector.extract_strided_slice %11 {offsets = [8, 32], sizes = [8, 16], strides = [1, 1]} : vector<16x64xf32> to vector<8x16xf32>
    %139 = vector.extract_strided_slice %12 {offsets = [8, 32], sizes = [8, 16], strides = [1, 1]} : vector<16x64xf32> to vector<8x16xf32>
    %140 = vector.extract_strided_slice %13 {offsets = [8, 32], sizes = [8, 16], strides = [1, 1]} : vector<16x64xf32> to vector<8x16xf32>
    %cst_52 = arith.constant dense<0.000000e+00> : vector<8x8xf32>
    %141 = tpu.matmul %138, %139, %cst_52 {dimension_numbers = #tpu.dot_dimension_numbers<[1], [1], [0], [0], [0, 0, 1, 0], [], []>} : vector<8x16xf32>, vector<8x16xf32>, vector<8x8xf32> -> vector<8x8xf32>
    %cst_53 = arith.constant 2.500000e-01 : f32
    %142 = vector.broadcast %cst_53 : f32 to vector<8x8xf32>
    %143 = arith.mulf %141, %142 : vector<8x8xf32>
    %cst_54 = arith.constant dense<0xFF800000> : vector<8xf32>
    %144 = vector.multi_reduction <maximumf>, %143, %cst_54 [1] : vector<8x8xf32> to vector<8xf32>
    %145 = vector.shape_cast %144 : vector<8xf32> to vector<8x1xf32>
    %146 = vector.broadcast %145 : vector<8x1xf32> to vector<8x8xf32>
    %147 = arith.subf %143, %146 : vector<8x8xf32>
    %148 = math.exp %147 : vector<8x8xf32>
    %cst_55 = arith.constant dense<0.000000e+00> : vector<8xf32>
    %149 = vector.multi_reduction <add>, %148, %cst_55 [1] : vector<8x8xf32> to vector<8xf32>
    %150 = vector.shape_cast %149 : vector<8xf32> to vector<8x1xf32>
    %151 = tpu.reciprocal %150 {approx = true} : vector<8x1xf32> -> vector<8x1xf32>
    %152 = vector.broadcast %151 : vector<8x1xf32> to vector<8x8xf32>
    %153 = arith.mulf %148, %152 : vector<8x8xf32>
    %cst_56 = arith.constant dense<0.000000e+00> : vector<8x16xf32>
    %154 = tpu.matmul %153, %140, %cst_56 {dimension_numbers = #tpu.dot_dimension_numbers<[1], [0], [0], [1], [0, 0, 1, 1], [], []>} : vector<8x8xf32>, vector<8x16xf32>, vector<8x16xf32> -> vector<8x16xf32>
    %155 = vector.extract_strided_slice %14 {offsets = [32, 0], sizes = [16, 64], strides = [1, 1]} : vector<64x64xf32> to vector<16x64xf32>
    %cst_57 = arith.constant dense<0.000000e+00> : vector<8x64xf32>
    %156 = tpu.matmul %154, %155, %cst_57 {dimension_numbers = #tpu.dot_dimension_numbers<[1], [0], [0], [1], [0, 0, 1, 1], [], []>} : vector<8x16xf32>, vector<16x64xf32>, vector<8x64xf32> -> vector<8x64xf32>
    %157 = arith.addf %137, %156 : vector<8x64xf32>
    %158 = vector.extract_strided_slice %11 {offsets = [8, 48], sizes = [8, 16], strides = [1, 1]} : vector<16x64xf32> to vector<8x16xf32>
    %159 = vector.extract_strided_slice %12 {offsets = [8, 48], sizes = [8, 16], strides = [1, 1]} : vector<16x64xf32> to vector<8x16xf32>
    %160 = vector.extract_strided_slice %13 {offsets = [8, 48], sizes = [8, 16], strides = [1, 1]} : vector<16x64xf32> to vector<8x16xf32>
    %cst_58 = arith.constant dense<0.000000e+00> : vector<8x8xf32>
    %161 = tpu.matmul %158, %159, %cst_58 {dimension_numbers = #tpu.dot_dimension_numbers<[1], [1], [0], [0], [0, 0, 1, 0], [], []>} : vector<8x16xf32>, vector<8x16xf32>, vector<8x8xf32> -> vector<8x8xf32>
    %cst_59 = arith.constant 2.500000e-01 : f32
    %162 = vector.broadcast %cst_59 : f32 to vector<8x8xf32>
    %163 = arith.mulf %161, %162 : vector<8x8xf32>
    %cst_60 = arith.constant dense<0xFF800000> : vector<8xf32>
    %164 = vector.multi_reduction <maximumf>, %163, %cst_60 [1] : vector<8x8xf32> to vector<8xf32>
    %165 = vector.shape_cast %164 : vector<8xf32> to vector<8x1xf32>
    %166 = vector.broadcast %165 : vector<8x1xf32> to vector<8x8xf32>
    %167 = arith.subf %163, %166 : vector<8x8xf32>
    %168 = math.exp %167 : vector<8x8xf32>
    %cst_61 = arith.constant dense<0.000000e+00> : vector<8xf32>
    %169 = vector.multi_reduction <add>, %168, %cst_61 [1] : vector<8x8xf32> to vector<8xf32>
    %170 = vector.shape_cast %169 : vector<8xf32> to vector<8x1xf32>
    %171 = tpu.reciprocal %170 {approx = true} : vector<8x1xf32> -> vector<8x1xf32>
    %172 = vector.broadcast %171 : vector<8x1xf32> to vector<8x8xf32>
    %173 = arith.mulf %168, %172 : vector<8x8xf32>
    %cst_62 = arith.constant dense<0.000000e+00> : vector<8x16xf32>
    %174 = tpu.matmul %173, %160, %cst_62 {dimension_numbers = #tpu.dot_dimension_numbers<[1], [0], [0], [1], [0, 0, 1, 1], [], []>} : vector<8x8xf32>, vector<8x16xf32>, vector<8x16xf32> -> vector<8x16xf32>
    %175 = vector.extract_strided_slice %14 {offsets = [48, 0], sizes = [16, 64], strides = [1, 1]} : vector<64x64xf32> to vector<16x64xf32>
    %cst_63 = arith.constant dense<0.000000e+00> : vector<8x64xf32>
    %176 = tpu.matmul %174, %175, %cst_63 {dimension_numbers = #tpu.dot_dimension_numbers<[1], [0], [0], [1], [0, 0, 1, 1], [], []>} : vector<8x16xf32>, vector<16x64xf32>, vector<8x64xf32> -> vector<8x64xf32>
    %177 = arith.addf %157, %176 : vector<8x64xf32>
    %c8 = arith.constant 8 : index
    %c0_64 = arith.constant 0 : index
    %178 = vector.load %arg31[%c8, %c0_64] : memref<16x64xf32, #tpu.memory_space<vmem>>, vector<8x64xf32>
    tpu.vector_store %arg31[%c8, %c0_64], %177 {strides = array<i32>} : memref<16x64xf32, #tpu.memory_space<vmem>>, vector<8x64xf32>,
    %c0_65 = arith.constant 0 : index
    %c0_66 = arith.constant 0 : index
    %179 = vector.load %arg31[%c0_65, %c0_66] : memref<16x64xf32, #tpu.memory_space<vmem>>, vector<16x64xf32>
    %c0_67 = arith.constant 0 : index
    %c0_68 = arith.constant 0 : index
    %180 = vector.load %arg7[%c0_67, %c0_68] : memref<1x64xf32, #tpu.memory_space<vmem>>, vector<1x64xf32>
    %181 = vector.broadcast %180 : vector<1x64xf32> to vector<16x64xf32>
    %182 = arith.addf %179, %181 : vector<16x64xf32>
    %183 = arith.addf %5, %182 : vector<16x64xf32>
    %c0_69 = arith.constant 0 : index
    %c0_70 = arith.constant 0 : index
    %184 = vector.load %arg8[%c0_69, %c0_70] : memref<1x64xf32, #tpu.memory_space<vmem>>, vector<1x64xf32>
    %c0_71 = arith.constant 0 : index
    %c0_72 = arith.constant 0 : index
    %185 = vector.load %arg9[%c0_71, %c0_72] : memref<1x64xf32, #tpu.memory_space<vmem>>, vector<1x64xf32>
    %cst_73 = arith.constant dense<0.000000e+00> : vector<16xf32>
    %186 = vector.multi_reduction <add>, %183, %cst_73 [1] : vector<16x64xf32> to vector<16xf32>
    %187 = vector.shape_cast %186 : vector<16xf32> to vector<16x1xf32>
    %cst_74 = arith.constant 6.400000e+01 : f32
    %188 = vector.broadcast %cst_74 : f32 to vector<16x1xf32>
    %189 = arith.divf %187, %188 : vector<16x1xf32>
    %190 = vector.broadcast %189 : vector<16x1xf32> to vector<16x64xf32>
    %191 = arith.subf %183, %190 : vector<16x64xf32>
    %192 = arith.mulf %191, %191 : vector<16x64xf32>
    %cst_75 = arith.constant dense<0.000000e+00> : vector<16xf32>
    %193 = vector.multi_reduction <add>, %192, %cst_75 [1] : vector<16x64xf32> to vector<16xf32>
    %194 = vector.shape_cast %193 : vector<16xf32> to vector<16x1xf32>
    %cst_76 = arith.constant 6.400000e+01 : f32
    %195 = vector.broadcast %cst_76 : f32 to vector<16x1xf32>
    %196 = arith.divf %194, %195 : vector<16x1xf32>
    %cst_77 = arith.constant 9.99999974E-6 : f32
    %197 = vector.broadcast %cst_77 : f32 to vector<16x1xf32>
    %198 = arith.addf %196, %197 : vector<16x1xf32>
    %199 = math.rsqrt %198 : vector<16x1xf32>
    %200 = vector.broadcast %199 : vector<16x1xf32> to vector<16x64xf32>
    %201 = arith.mulf %191, %200 : vector<16x64xf32>
    %202 = vector.broadcast %184 : vector<1x64xf32> to vector<16x64xf32>
    %203 = arith.mulf %201, %202 : vector<16x64xf32>
    %204 = vector.broadcast %185 : vector<1x64xf32> to vector<16x64xf32>
    %205 = arith.addf %203, %204 : vector<16x64xf32>
    %c0_78 = arith.constant 0 : index
    %c0_79 = arith.constant 0 : index
    %206 = vector.load %arg10[%c0_78, %c0_79] : memref<64x2048xf32, #tpu.memory_space<vmem>>, vector<64x2048xf32>
    %cst_80 = arith.constant dense<0.000000e+00> : vector<16x2048xf32>
    %207 = tpu.matmul %205, %206, %cst_80 {dimension_numbers = #tpu.dot_dimension_numbers<[1], [0], [0], [1], [0, 0, 1, 1], [], []>} : vector<16x64xf32>, vector<64x2048xf32>, vector<16x2048xf32> -> vector<16x2048xf32>
    %c0_81 = arith.constant 0 : index
    %c0_82 = arith.constant 0 : index
    %208 = vector.load %arg11[%c0_81, %c0_82] : memref<1x2048xf32, #tpu.memory_space<vmem>>, vector<1x2048xf32>
    %209 = vector.broadcast %208 : vector<1x2048xf32> to vector<16x2048xf32>
    %210 = arith.addf %207, %209 : vector<16x2048xf32>
    %cst_83 = arith.constant 0.000000e+00 : f32
    %211 = vector.broadcast %cst_83 : f32 to vector<16x2048xf32>
    %212 = arith.maximumf %210, %211 : vector<16x2048xf32>
    %c0_84 = arith.constant 0 : index
    %c0_85 = arith.constant 0 : index
    %213 = vector.load %arg12[%c0_84, %c0_85] : memref<2048x64xf32, #tpu.memory_space<vmem>>, vector<2048x64xf32>
    %cst_86 = arith.constant dense<0.000000e+00> : vector<16x64xf32>
    %214 = tpu.matmul %212, %213, %cst_86 {dimension_numbers = #tpu.dot_dimension_numbers<[1], [0], [0], [1], [0, 0, 1, 1], [], []>} : vector<16x2048xf32>, vector<2048x64xf32>, vector<16x64xf32> -> vector<16x64xf32>
    %c0_87 = arith.constant 0 : index
    %c0_88 = arith.constant 0 : index
    %215 = vector.load %arg13[%c0_87, %c0_88] : memref<1x64xf32, #tpu.memory_space<vmem>>, vector<1x64xf32>
    %216 = vector.broadcast %215 : vector<1x64xf32> to vector<16x64xf32>
    %217 = arith.addf %214, %216 : vector<16x64xf32>
    %218 = arith.addf %205, %217 : vector<16x64xf32>
    %c0_89 = arith.constant 0 : index
    %c0_90 = arith.constant 0 : index
    %219 = vector.load %arg14[%c0_89, %c0_90] : memref<1x64xf32, #tpu.memory_space<vmem>>, vector<1x64xf32>
    %c0_91 = arith.constant 0 : index
    %c0_92 = arith.constant 0 : index
    %220 = vector.load %arg15[%c0_91, %c0_92] : memref<1x64xf32, #tpu.memory_space<vmem>>, vector<1x64xf32>
    %cst_93 = arith.constant dense<0.000000e+00> : vector<16xf32>
    %221 = vector.multi_reduction <add>, %218, %cst_93 [1] : vector<16x64xf32> to vector<16xf32>
    %222 = vector.shape_cast %221 : vector<16xf32> to vector<16x1xf32>
    %cst_94 = arith.constant 6.400000e+01 : f32
    %223 = vector.broadcast %cst_94 : f32 to vector<16x1xf32>
    %224 = arith.divf %222, %223 : vector<16x1xf32>
    %225 = vector.broadcast %224 : vector<16x1xf32> to vector<16x64xf32>
    %226 = arith.subf %218, %225 : vector<16x64xf32>
    %227 = arith.mulf %226, %226 : vector<16x64xf32>
    %cst_95 = arith.constant dense<0.000000e+00> : vector<16xf32>
    %228 = vector.multi_reduction <add>, %227, %cst_95 [1] : vector<16x64xf32> to vector<16xf32>
    %229 = vector.shape_cast %228 : vector<16xf32> to vector<16x1xf32>
    %cst_96 = arith.constant 6.400000e+01 : f32
    %230 = vector.broadcast %cst_96 : f32 to vector<16x1xf32>
    %231 = arith.divf %229, %230 : vector<16x1xf32>
    %cst_97 = arith.constant 9.99999974E-6 : f32
    %232 = vector.broadcast %cst_97 : f32 to vector<16x1xf32>
    %233 = arith.addf %231, %232 : vector<16x1xf32>
    %234 = math.rsqrt %233 : vector<16x1xf32>
    %235 = vector.broadcast %234 : vector<16x1xf32> to vector<16x64xf32>
    %236 = arith.mulf %226, %235 : vector<16x64xf32>
    %237 = vector.broadcast %219 : vector<1x64xf32> to vector<16x64xf32>
    %238 = arith.mulf %236, %237 : vector<16x64xf32>
    %239 = vector.broadcast %220 : vector<1x64xf32> to vector<16x64xf32>
    %240 = arith.addf %238, %239 : vector<16x64xf32>
    %c0_98 = arith.constant 0 : index
    %c0_99 = arith.constant 0 : index
    %241 = vector.load %arg16[%c0_98, %c0_99] : memref<64x192xf32, #tpu.memory_space<vmem>>, vector<64x192xf32>
    %cst_100 = arith.constant dense<0.000000e+00> : vector<16x192xf32>
    %242 = tpu.matmul %240, %241, %cst_100 {dimension_numbers = #tpu.dot_dimension_numbers<[1], [0], [0], [1], [0, 0, 1, 1], [], []>} : vector<16x64xf32>, vector<64x192xf32>, vector<16x192xf32> -> vector<16x192xf32>
    %c0_101 = arith.constant 0 : index
    %c0_102 = arith.constant 0 : index
    %243 = vector.load %arg17[%c0_101, %c0_102] : memref<1x192xf32, #tpu.memory_space<vmem>>, vector<1x192xf32>
    %244 = vector.broadcast %243 : vector<1x192xf32> to vector<16x192xf32>
    %245 = arith.addf %242, %244 : vector<16x192xf32>
    %246 = vector.extract_strided_slice %245 {offsets = [0, 0], sizes = [16, 64], strides = [1, 1]} : vector<16x192xf32> to vector<16x64xf32>
    %247 = vector.extract_strided_slice %245 {offsets = [0, 64], sizes = [16, 64], strides = [1, 1]} : vector<16x192xf32> to vector<16x64xf32>
    %248 = vector.extract_strided_slice %245 {offsets = [0, 128], sizes = [16, 64], strides = [1, 1]} : vector<16x192xf32> to vector<16x64xf32>
    %c0_103 = arith.constant 0 : index
    %c0_104 = arith.constant 0 : index
    %249 = vector.load %arg18[%c0_103, %c0_104] : memref<64x64xf32, #tpu.memory_space<vmem>>, vector<64x64xf32>
    %cst_105 = arith.constant 0.000000e+00 : f32
    %250 = vector.broadcast %cst_105 : f32 to vector<8x64xf32>
    %251 = vector.extract_strided_slice %246 {offsets = [0, 0], sizes = [8, 16], strides = [1, 1]} : vector<16x64xf32> to vector<8x16xf32>
    %252 = vector.extract_strided_slice %247 {offsets = [0, 0], sizes = [8, 16], strides = [1, 1]} : vector<16x64xf32> to vector<8x16xf32>
    %253 = vector.extract_strided_slice %248 {offsets = [0, 0], sizes = [8, 16], strides = [1, 1]} : vector<16x64xf32> to vector<8x16xf32>
    %cst_106 = arith.constant dense<0.000000e+00> : vector<8x8xf32>
    %254 = tpu.matmul %251, %252, %cst_106 {dimension_numbers = #tpu.dot_dimension_numbers<[1], [1], [0], [0], [0, 0, 1, 0], [], []>} : vector<8x16xf32>, vector<8x16xf32>, vector<8x8xf32> -> vector<8x8xf32>
    %cst_107 = arith.constant 2.500000e-01 : f32
    %255 = vector.broadcast %cst_107 : f32 to vector<8x8xf32>
    %256 = arith.mulf %254, %255 : vector<8x8xf32>
    %cst_108 = arith.constant dense<0xFF800000> : vector<8xf32>
    %257 = vector.multi_reduction <maximumf>, %256, %cst_108 [1] : vector<8x8xf32> to vector<8xf32>
    %258 = vector.shape_cast %257 : vector<8xf32> to vector<8x1xf32>
    %259 = vector.broadcast %258 : vector<8x1xf32> to vector<8x8xf32>
    %260 = arith.subf %256, %259 : vector<8x8xf32>
    %261 = math.exp %260 : vector<8x8xf32>
    %cst_109 = arith.constant dense<0.000000e+00> : vector<8xf32>
    %262 = vector.multi_reduction <add>, %261, %cst_109 [1] : vector<8x8xf32> to vector<8xf32>
    %263 = vector.shape_cast %262 : vector<8xf32> to vector<8x1xf32>
    %264 = tpu.reciprocal %263 {approx = true} : vector<8x1xf32> -> vector<8x1xf32>
    %265 = vector.broadcast %264 : vector<8x1xf32> to vector<8x8xf32>
    %266 = arith.mulf %261, %265 : vector<8x8xf32>
    %cst_110 = arith.constant dense<0.000000e+00> : vector<8x16xf32>
    %267 = tpu.matmul %266, %253, %cst_110 {dimension_numbers = #tpu.dot_dimension_numbers<[1], [0], [0], [1], [0, 0, 1, 1], [], []>} : vector<8x8xf32>, vector<8x16xf32>, vector<8x16xf32> -> vector<8x16xf32>
    %268 = vector.extract_strided_slice %249 {offsets = [0, 0], sizes = [16, 64], strides = [1, 1]} : vector<64x64xf32> to vector<16x64xf32>
    %cst_111 = arith.constant dense<0.000000e+00> : vector<8x64xf32>
    %269 = tpu.matmul %267, %268, %cst_111 {dimension_numbers = #tpu.dot_dimension_numbers<[1], [0], [0], [1], [0, 0, 1, 1], [], []>} : vector<8x16xf32>, vector<16x64xf32>, vector<8x64xf32> -> vector<8x64xf32>
    %270 = arith.addf %250, %269 : vector<8x64xf32>
    %271 = vector.extract_strided_slice %246 {offsets = [0, 16], sizes = [8, 16], strides = [1, 1]} : vector<16x64xf32> to vector<8x16xf32>
    %272 = vector.extract_strided_slice %247 {offsets = [0, 16], sizes = [8, 16], strides = [1, 1]} : vector<16x64xf32> to vector<8x16xf32>
    %273 = vector.extract_strided_slice %248 {offsets = [0, 16], sizes = [8, 16], strides = [1, 1]} : vector<16x64xf32> to vector<8x16xf32>
    %cst_112 = arith.constant dense<0.000000e+00> : vector<8x8xf32>
    %274 = tpu.matmul %271, %272, %cst_112 {dimension_numbers = #tpu.dot_dimension_numbers<[1], [1], [0], [0], [0, 0, 1, 0], [], []>} : vector<8x16xf32>, vector<8x16xf32>, vector<8x8xf32> -> vector<8x8xf32>
    %cst_113 = arith.constant 2.500000e-01 : f32
    %275 = vector.broadcast %cst_113 : f32 to vector<8x8xf32>
    %276 = arith.mulf %274, %275 : vector<8x8xf32>
    %cst_114 = arith.constant dense<0xFF800000> : vector<8xf32>
    %277 = vector.multi_reduction <maximumf>, %276, %cst_114 [1] : vector<8x8xf32> to vector<8xf32>
    %278 = vector.shape_cast %277 : vector<8xf32> to vector<8x1xf32>
    %279 = vector.broadcast %278 : vector<8x1xf32> to vector<8x8xf32>
    %280 = arith.subf %276, %279 : vector<8x8xf32>
    %281 = math.exp %280 : vector<8x8xf32>
    %cst_115 = arith.constant dense<0.000000e+00> : vector<8xf32>
    %282 = vector.multi_reduction <add>, %281, %cst_115 [1] : vector<8x8xf32> to vector<8xf32>
    %283 = vector.shape_cast %282 : vector<8xf32> to vector<8x1xf32>
    %284 = tpu.reciprocal %283 {approx = true} : vector<8x1xf32> -> vector<8x1xf32>
    %285 = vector.broadcast %284 : vector<8x1xf32> to vector<8x8xf32>
    %286 = arith.mulf %281, %285 : vector<8x8xf32>
    %cst_116 = arith.constant dense<0.000000e+00> : vector<8x16xf32>
    %287 = tpu.matmul %286, %273, %cst_116 {dimension_numbers = #tpu.dot_dimension_numbers<[1], [0], [0], [1], [0, 0, 1, 1], [], []>} : vector<8x8xf32>, vector<8x16xf32>, vector<8x16xf32> -> vector<8x16xf32>
    %288 = vector.extract_strided_slice %249 {offsets = [16, 0], sizes = [16, 64], strides = [1, 1]} : vector<64x64xf32> to vector<16x64xf32>
    %cst_117 = arith.constant dense<0.000000e+00> : vector<8x64xf32>
    %289 = tpu.matmul %287, %288, %cst_117 {dimension_numbers = #tpu.dot_dimension_numbers<[1], [0], [0], [1], [0, 0, 1, 1], [], []>} : vector<8x16xf32>, vector<16x64xf32>, vector<8x64xf32> -> vector<8x64xf32>
    %290 = arith.addf %270, %289 : vector<8x64xf32>
    %291 = vector.extract_strided_slice %246 {offsets = [0, 32], sizes = [8, 16], strides = [1, 1]} : vector<16x64xf32> to vector<8x16xf32>
    %292 = vector.extract_strided_slice %247 {offsets = [0, 32], sizes = [8, 16], strides = [1, 1]} : vector<16x64xf32> to vector<8x16xf32>
    %293 = vector.extract_strided_slice %248 {offsets = [0, 32], sizes = [8, 16], strides = [1, 1]} : vector<16x64xf32> to vector<8x16xf32>
    %cst_118 = arith.constant dense<0.000000e+00> : vector<8x8xf32>
    %294 = tpu.matmul %291, %292, %cst_118 {dimension_numbers = #tpu.dot_dimension_numbers<[1], [1], [0], [0], [0, 0, 1, 0], [], []>} : vector<8x16xf32>, vector<8x16xf32>, vector<8x8xf32> -> vector<8x8xf32>
    %cst_119 = arith.constant 2.500000e-01 : f32
    %295 = vector.broadcast %cst_119 : f32 to vector<8x8xf32>
    %296 = arith.mulf %294, %295 : vector<8x8xf32>
    %cst_120 = arith.constant dense<0xFF800000> : vector<8xf32>
    %297 = vector.multi_reduction <maximumf>, %296, %cst_120 [1] : vector<8x8xf32> to vector<8xf32>
    %298 = vector.shape_cast %297 : vector<8xf32> to vector<8x1xf32>
    %299 = vector.broadcast %298 : vector<8x1xf32> to vector<8x8xf32>
    %300 = arith.subf %296, %299 : vector<8x8xf32>
    %301 = math.exp %300 : vector<8x8xf32>
    %cst_121 = arith.constant dense<0.000000e+00> : vector<8xf32>
    %302 = vector.multi_reduction <add>, %301, %cst_121 [1] : vector<8x8xf32> to vector<8xf32>
    %303 = vector.shape_cast %302 : vector<8xf32> to vector<8x1xf32>
    %304 = tpu.reciprocal %303 {approx = true} : vector<8x1xf32> -> vector<8x1xf32>
    %305 = vector.broadcast %304 : vector<8x1xf32> to vector<8x8xf32>
    %306 = arith.mulf %301, %305 : vector<8x8xf32>
    %cst_122 = arith.constant dense<0.000000e+00> : vector<8x16xf32>
    %307 = tpu.matmul %306, %293, %cst_122 {dimension_numbers = #tpu.dot_dimension_numbers<[1], [0], [0], [1], [0, 0, 1, 1], [], []>} : vector<8x8xf32>, vector<8x16xf32>, vector<8x16xf32> -> vector<8x16xf32>
    %308 = vector.extract_strided_slice %249 {offsets = [32, 0], sizes = [16, 64], strides = [1, 1]} : vector<64x64xf32> to vector<16x64xf32>
    %cst_123 = arith.constant dense<0.000000e+00> : vector<8x64xf32>
    %309 = tpu.matmul %307, %308, %cst_123 {dimension_numbers = #tpu.dot_dimension_numbers<[1], [0], [0], [1], [0, 0, 1, 1], [], []>} : vector<8x16xf32>, vector<16x64xf32>, vector<8x64xf32> -> vector<8x64xf32>
    %310 = arith.addf %290, %309 : vector<8x64xf32>
    %311 = vector.extract_strided_slice %246 {offsets = [0, 48], sizes = [8, 16], strides = [1, 1]} : vector<16x64xf32> to vector<8x16xf32>
    %312 = vector.extract_strided_slice %247 {offsets = [0, 48], sizes = [8, 16], strides = [1, 1]} : vector<16x64xf32> to vector<8x16xf32>
    %313 = vector.extract_strided_slice %248 {offsets = [0, 48], sizes = [8, 16], strides = [1, 1]} : vector<16x64xf32> to vector<8x16xf32>
    %cst_124 = arith.constant dense<0.000000e+00> : vector<8x8xf32>
    %314 = tpu.matmul %311, %312, %cst_124 {dimension_numbers = #tpu.dot_dimension_numbers<[1], [1], [0], [0], [0, 0, 1, 0], [], []>} : vector<8x16xf32>, vector<8x16xf32>, vector<8x8xf32> -> vector<8x8xf32>
    %cst_125 = arith.constant 2.500000e-01 : f32
    %315 = vector.broadcast %cst_125 : f32 to vector<8x8xf32>
    %316 = arith.mulf %314, %315 : vector<8x8xf32>
    %cst_126 = arith.constant dense<0xFF800000> : vector<8xf32>
    %317 = vector.multi_reduction <maximumf>, %316, %cst_126 [1] : vector<8x8xf32> to vector<8xf32>
    %318 = vector.shape_cast %317 : vector<8xf32> to vector<8x1xf32>
    %319 = vector.broadcast %318 : vector<8x1xf32> to vector<8x8xf32>
    %320 = arith.subf %316, %319 : vector<8x8xf32>
    %321 = math.exp %320 : vector<8x8xf32>
    %cst_127 = arith.constant dense<0.000000e+00> : vector<8xf32>
    %322 = vector.multi_reduction <add>, %321, %cst_127 [1] : vector<8x8xf32> to vector<8xf32>
    %323 = vector.shape_cast %322 : vector<8xf32> to vector<8x1xf32>
    %324 = tpu.reciprocal %323 {approx = true} : vector<8x1xf32> -> vector<8x1xf32>
    %325 = vector.broadcast %324 : vector<8x1xf32> to vector<8x8xf32>
    %326 = arith.mulf %321, %325 : vector<8x8xf32>
    %cst_128 = arith.constant dense<0.000000e+00> : vector<8x16xf32>
    %327 = tpu.matmul %326, %313, %cst_128 {dimension_numbers = #tpu.dot_dimension_numbers<[1], [0], [0], [1], [0, 0, 1, 1], [], []>} : vector<8x8xf32>, vector<8x16xf32>, vector<8x16xf32> -> vector<8x16xf32>
    %328 = vector.extract_strided_slice %249 {offsets = [48, 0], sizes = [16, 64], strides = [1, 1]} : vector<64x64xf32> to vector<16x64xf32>
    %cst_129 = arith.constant dense<0.000000e+00> : vector<8x64xf32>
    %329 = tpu.matmul %327, %328, %cst_129 {dimension_numbers = #tpu.dot_dimension_numbers<[1], [0], [0], [1], [0, 0, 1, 1], [], []>} : vector<8x16xf32>, vector<16x64xf32>, vector<8x64xf32> -> vector<8x64xf32>
    %330 = arith.addf %310, %329 : vector<8x64xf32>
    %c0_130 = arith.constant 0 : index
    %c0_131 = arith.constant 0 : index
    %331 = vector.load %arg31[%c0_130, %c0_131] : memref<16x64xf32, #tpu.memory_space<vmem>>, vector<8x64xf32>
    tpu.vector_store %arg31[%c0_130, %c0_131], %330 {strides = array<i32>} : memref<16x64xf32, #tpu.memory_space<vmem>>, vector<8x64xf32>,
    %cst_132 = arith.constant 0.000000e+00 : f32
    %332 = vector.broadcast %cst_132 : f32 to vector<8x64xf32>
    %333 = vector.extract_strided_slice %246 {offsets = [8, 0], sizes = [8, 16], strides = [1, 1]} : vector<16x64xf32> to vector<8x16xf32>
    %334 = vector.extract_strided_slice %247 {offsets = [8, 0], sizes = [8, 16], strides = [1, 1]} : vector<16x64xf32> to vector<8x16xf32>
    %335 = vector.extract_strided_slice %248 {offsets = [8, 0], sizes = [8, 16], strides = [1, 1]} : vector<16x64xf32> to vector<8x16xf32>
    %cst_133 = arith.constant dense<0.000000e+00> : vector<8x8xf32>
    %336 = tpu.matmul %333, %334, %cst_133 {dimension_numbers = #tpu.dot_dimension_numbers<[1], [1], [0], [0], [0, 0, 1, 0], [], []>} : vector<8x16xf32>, vector<8x16xf32>, vector<8x8xf32> -> vector<8x8xf32>
    %cst_134 = arith.constant 2.500000e-01 : f32
    %337 = vector.broadcast %cst_134 : f32 to vector<8x8xf32>
    %338 = arith.mulf %336, %337 : vector<8x8xf32>
    %cst_135 = arith.constant dense<0xFF800000> : vector<8xf32>
    %339 = vector.multi_reduction <maximumf>, %338, %cst_135 [1] : vector<8x8xf32> to vector<8xf32>
    %340 = vector.shape_cast %339 : vector<8xf32> to vector<8x1xf32>
    %341 = vector.broadcast %340 : vector<8x1xf32> to vector<8x8xf32>
    %342 = arith.subf %338, %341 : vector<8x8xf32>
    %343 = math.exp %342 : vector<8x8xf32>
    %cst_136 = arith.constant dense<0.000000e+00> : vector<8xf32>
    %344 = vector.multi_reduction <add>, %343, %cst_136 [1] : vector<8x8xf32> to vector<8xf32>
    %345 = vector.shape_cast %344 : vector<8xf32> to vector<8x1xf32>
    %346 = tpu.reciprocal %345 {approx = true} : vector<8x1xf32> -> vector<8x1xf32>
    %347 = vector.broadcast %346 : vector<8x1xf32> to vector<8x8xf32>
    %348 = arith.mulf %343, %347 : vector<8x8xf32>
    %cst_137 = arith.constant dense<0.000000e+00> : vector<8x16xf32>
    %349 = tpu.matmul %348, %335, %cst_137 {dimension_numbers = #tpu.dot_dimension_numbers<[1], [0], [0], [1], [0, 0, 1, 1], [], []>} : vector<8x8xf32>, vector<8x16xf32>, vector<8x16xf32> -> vector<8x16xf32>
    %350 = vector.extract_strided_slice %249 {offsets = [0, 0], sizes = [16, 64], strides = [1, 1]} : vector<64x64xf32> to vector<16x64xf32>
    %cst_138 = arith.constant dense<0.000000e+00> : vector<8x64xf32>
    %351 = tpu.matmul %349, %350, %cst_138 {dimension_numbers = #tpu.dot_dimension_numbers<[1], [0], [0], [1], [0, 0, 1, 1], [], []>} : vector<8x16xf32>, vector<16x64xf32>, vector<8x64xf32> -> vector<8x64xf32>
    %352 = arith.addf %332, %351 : vector<8x64xf32>
    %353 = vector.extract_strided_slice %246 {offsets = [8, 16], sizes = [8, 16], strides = [1, 1]} : vector<16x64xf32> to vector<8x16xf32>
    %354 = vector.extract_strided_slice %247 {offsets = [8, 16], sizes = [8, 16], strides = [1, 1]} : vector<16x64xf32> to vector<8x16xf32>
    %355 = vector.extract_strided_slice %248 {offsets = [8, 16], sizes = [8, 16], strides = [1, 1]} : vector<16x64xf32> to vector<8x16xf32>
    %cst_139 = arith.constant dense<0.000000e+00> : vector<8x8xf32>
    %356 = tpu.matmul %353, %354, %cst_139 {dimension_numbers = #tpu.dot_dimension_numbers<[1], [1], [0], [0], [0, 0, 1, 0], [], []>} : vector<8x16xf32>, vector<8x16xf32>, vector<8x8xf32> -> vector<8x8xf32>
    %cst_140 = arith.constant 2.500000e-01 : f32
    %357 = vector.broadcast %cst_140 : f32 to vector<8x8xf32>
    %358 = arith.mulf %356, %357 : vector<8x8xf32>
    %cst_141 = arith.constant dense<0xFF800000> : vector<8xf32>
    %359 = vector.multi_reduction <maximumf>, %358, %cst_141 [1] : vector<8x8xf32> to vector<8xf32>
    %360 = vector.shape_cast %359 : vector<8xf32> to vector<8x1xf32>
    %361 = vector.broadcast %360 : vector<8x1xf32> to vector<8x8xf32>
    %362 = arith.subf %358, %361 : vector<8x8xf32>
    %363 = math.exp %362 : vector<8x8xf32>
    %cst_142 = arith.constant dense<0.000000e+00> : vector<8xf32>
    %364 = vector.multi_reduction <add>, %363, %cst_142 [1] : vector<8x8xf32> to vector<8xf32>
    %365 = vector.shape_cast %364 : vector<8xf32> to vector<8x1xf32>
    %366 = tpu.reciprocal %365 {approx = true} : vector<8x1xf32> -> vector<8x1xf32>
    %367 = vector.broadcast %366 : vector<8x1xf32> to vector<8x8xf32>
    %368 = arith.mulf %363, %367 : vector<8x8xf32>
    %cst_143 = arith.constant dense<0.000000e+00> : vector<8x16xf32>
    %369 = tpu.matmul %368, %355, %cst_143 {dimension_numbers = #tpu.dot_dimension_numbers<[1], [0], [0], [1], [0, 0, 1, 1], [], []>} : vector<8x8xf32>, vector<8x16xf32>, vector<8x16xf32> -> vector<8x16xf32>
    %370 = vector.extract_strided_slice %249 {offsets = [16, 0], sizes = [16, 64], strides = [1, 1]} : vector<64x64xf32> to vector<16x64xf32>
    %cst_144 = arith.constant dense<0.000000e+00> : vector<8x64xf32>
    %371 = tpu.matmul %369, %370, %cst_144 {dimension_numbers = #tpu.dot_dimension_numbers<[1], [0], [0], [1], [0, 0, 1, 1], [], []>} : vector<8x16xf32>, vector<16x64xf32>, vector<8x64xf32> -> vector<8x64xf32>
    %372 = arith.addf %352, %371 : vector<8x64xf32>
    %373 = vector.extract_strided_slice %246 {offsets = [8, 32], sizes = [8, 16], strides = [1, 1]} : vector<16x64xf32> to vector<8x16xf32>
    %374 = vector.extract_strided_slice %247 {offsets = [8, 32], sizes = [8, 16], strides = [1, 1]} : vector<16x64xf32> to vector<8x16xf32>
    %375 = vector.extract_strided_slice %248 {offsets = [8, 32], sizes = [8, 16], strides = [1, 1]} : vector<16x64xf32> to vector<8x16xf32>
    %cst_145 = arith.constant dense<0.000000e+00> : vector<8x8xf32>
    %376 = tpu.matmul %373, %374, %cst_145 {dimension_numbers = #tpu.dot_dimension_numbers<[1], [1], [0], [0], [0, 0, 1, 0], [], []>} : vector<8x16xf32>, vector<8x16xf32>, vector<8x8xf32> -> vector<8x8xf32>
    %cst_146 = arith.constant 2.500000e-01 : f32
    %377 = vector.broadcast %cst_146 : f32 to vector<8x8xf32>
    %378 = arith.mulf %376, %377 : vector<8x8xf32>
    %cst_147 = arith.constant dense<0xFF800000> : vector<8xf32>
    %379 = vector.multi_reduction <maximumf>, %378, %cst_147 [1] : vector<8x8xf32> to vector<8xf32>
    %380 = vector.shape_cast %379 : vector<8xf32> to vector<8x1xf32>
    %381 = vector.broadcast %380 : vector<8x1xf32> to vector<8x8xf32>
    %382 = arith.subf %378, %381 : vector<8x8xf32>
    %383 = math.exp %382 : vector<8x8xf32>
    %cst_148 = arith.constant dense<0.000000e+00> : vector<8xf32>
    %384 = vector.multi_reduction <add>, %383, %cst_148 [1] : vector<8x8xf32> to vector<8xf32>
    %385 = vector.shape_cast %384 : vector<8xf32> to vector<8x1xf32>
    %386 = tpu.reciprocal %385 {approx = true} : vector<8x1xf32> -> vector<8x1xf32>
    %387 = vector.broadcast %386 : vector<8x1xf32> to vector<8x8xf32>
    %388 = arith.mulf %383, %387 : vector<8x8xf32>
    %cst_149 = arith.constant dense<0.000000e+00> : vector<8x16xf32>
    %389 = tpu.matmul %388, %375, %cst_149 {dimension_numbers = #tpu.dot_dimension_numbers<[1], [0], [0], [1], [0, 0, 1, 1], [], []>} : vector<8x8xf32>, vector<8x16xf32>, vector<8x16xf32> -> vector<8x16xf32>
    %390 = vector.extract_strided_slice %249 {offsets = [32, 0], sizes = [16, 64], strides = [1, 1]} : vector<64x64xf32> to vector<16x64xf32>
    %cst_150 = arith.constant dense<0.000000e+00> : vector<8x64xf32>
    %391 = tpu.matmul %389, %390, %cst_150 {dimension_numbers = #tpu.dot_dimension_numbers<[1], [0], [0], [1], [0, 0, 1, 1], [], []>} : vector<8x16xf32>, vector<16x64xf32>, vector<8x64xf32> -> vector<8x64xf32>
    %392 = arith.addf %372, %391 : vector<8x64xf32>
    %393 = vector.extract_strided_slice %246 {offsets = [8, 48], sizes = [8, 16], strides = [1, 1]} : vector<16x64xf32> to vector<8x16xf32>
    %394 = vector.extract_strided_slice %247 {offsets = [8, 48], sizes = [8, 16], strides = [1, 1]} : vector<16x64xf32> to vector<8x16xf32>
    %395 = vector.extract_strided_slice %248 {offsets = [8, 48], sizes = [8, 16], strides = [1, 1]} : vector<16x64xf32> to vector<8x16xf32>
    %cst_151 = arith.constant dense<0.000000e+00> : vector<8x8xf32>
    %396 = tpu.matmul %393, %394, %cst_151 {dimension_numbers = #tpu.dot_dimension_numbers<[1], [1], [0], [0], [0, 0, 1, 0], [], []>} : vector<8x16xf32>, vector<8x16xf32>, vector<8x8xf32> -> vector<8x8xf32>
    %cst_152 = arith.constant 2.500000e-01 : f32
    %397 = vector.broadcast %cst_152 : f32 to vector<8x8xf32>
    %398 = arith.mulf %396, %397 : vector<8x8xf32>
    %cst_153 = arith.constant dense<0xFF800000> : vector<8xf32>
    %399 = vector.multi_reduction <maximumf>, %398, %cst_153 [1] : vector<8x8xf32> to vector<8xf32>
    %400 = vector.shape_cast %399 : vector<8xf32> to vector<8x1xf32>
    %401 = vector.broadcast %400 : vector<8x1xf32> to vector<8x8xf32>
    %402 = arith.subf %398, %401 : vector<8x8xf32>
    %403 = math.exp %402 : vector<8x8xf32>
    %cst_154 = arith.constant dense<0.000000e+00> : vector<8xf32>
    %404 = vector.multi_reduction <add>, %403, %cst_154 [1] : vector<8x8xf32> to vector<8xf32>
    %405 = vector.shape_cast %404 : vector<8xf32> to vector<8x1xf32>
    %406 = tpu.reciprocal %405 {approx = true} : vector<8x1xf32> -> vector<8x1xf32>
    %407 = vector.broadcast %406 : vector<8x1xf32> to vector<8x8xf32>
    %408 = arith.mulf %403, %407 : vector<8x8xf32>
    %cst_155 = arith.constant dense<0.000000e+00> : vector<8x16xf32>
    %409 = tpu.matmul %408, %395, %cst_155 {dimension_numbers = #tpu.dot_dimension_numbers<[1], [0], [0], [1], [0, 0, 1, 1], [], []>} : vector<8x8xf32>, vector<8x16xf32>, vector<8x16xf32> -> vector<8x16xf32>
    %410 = vector.extract_strided_slice %249 {offsets = [48, 0], sizes = [16, 64], strides = [1, 1]} : vector<64x64xf32> to vector<16x64xf32>
    %cst_156 = arith.constant dense<0.000000e+00> : vector<8x64xf32>
    %411 = tpu.matmul %409, %410, %cst_156 {dimension_numbers = #tpu.dot_dimension_numbers<[1], [0], [0], [1], [0, 0, 1, 1], [], []>} : vector<8x16xf32>, vector<16x64xf32>, vector<8x64xf32> -> vector<8x64xf32>
    %412 = arith.addf %392, %411 : vector<8x64xf32>
    %c8_157 = arith.constant 8 : index
    %c0_158 = arith.constant 0 : index
    %413 = vector.load %arg31[%c8_157, %c0_158] : memref<16x64xf32, #tpu.memory_space<vmem>>, vector<8x64xf32>
    tpu.vector_store %arg31[%c8_157, %c0_158], %412 {strides = array<i32>} : memref<16x64xf32, #tpu.memory_space<vmem>>, vector<8x64xf32>,
    %c0_159 = arith.constant 0 : index
    %c0_160 = arith.constant 0 : index
    %414 = vector.load %arg31[%c0_159, %c0_160] : memref<16x64xf32, #tpu.memory_space<vmem>>, vector<16x64xf32>
    %c0_161 = arith.constant 0 : index
    %c0_162 = arith.constant 0 : index
    %415 = vector.load %arg19[%c0_161, %c0_162] : memref<1x64xf32, #tpu.memory_space<vmem>>, vector<1x64xf32>
    %416 = vector.broadcast %415 : vector<1x64xf32> to vector<16x64xf32>
    %417 = arith.addf %414, %416 : vector<16x64xf32>
    %418 = arith.addf %240, %417 : vector<16x64xf32>
    %c0_163 = arith.constant 0 : index
    %c0_164 = arith.constant 0 : index
    %419 = vector.load %arg20[%c0_163, %c0_164] : memref<1x64xf32, #tpu.memory_space<vmem>>, vector<1x64xf32>
    %c0_165 = arith.constant 0 : index
    %c0_166 = arith.constant 0 : index
    %420 = vector.load %arg21[%c0_165, %c0_166] : memref<1x64xf32, #tpu.memory_space<vmem>>, vector<1x64xf32>
    %cst_167 = arith.constant dense<0.000000e+00> : vector<16xf32>
    %421 = vector.multi_reduction <add>, %418, %cst_167 [1] : vector<16x64xf32> to vector<16xf32>
    %422 = vector.shape_cast %421 : vector<16xf32> to vector<16x1xf32>
    %cst_168 = arith.constant 6.400000e+01 : f32
    %423 = vector.broadcast %cst_168 : f32 to vector<16x1xf32>
    %424 = arith.divf %422, %423 : vector<16x1xf32>
    %425 = vector.broadcast %424 : vector<16x1xf32> to vector<16x64xf32>
    %426 = arith.subf %418, %425 : vector<16x64xf32>
    %427 = arith.mulf %426, %426 : vector<16x64xf32>
    %cst_169 = arith.constant dense<0.000000e+00> : vector<16xf32>
    %428 = vector.multi_reduction <add>, %427, %cst_169 [1] : vector<16x64xf32> to vector<16xf32>
    %429 = vector.shape_cast %428 : vector<16xf32> to vector<16x1xf32>
    %cst_170 = arith.constant 6.400000e+01 : f32
    %430 = vector.broadcast %cst_170 : f32 to vector<16x1xf32>
    %431 = arith.divf %429, %430 : vector<16x1xf32>
    %cst_171 = arith.constant 9.99999974E-6 : f32
    %432 = vector.broadcast %cst_171 : f32 to vector<16x1xf32>
    %433 = arith.addf %431, %432 : vector<16x1xf32>
    %434 = math.rsqrt %433 : vector<16x1xf32>
    %435 = vector.broadcast %434 : vector<16x1xf32> to vector<16x64xf32>
    %436 = arith.mulf %426, %435 : vector<16x64xf32>
    %437 = vector.broadcast %419 : vector<1x64xf32> to vector<16x64xf32>
    %438 = arith.mulf %436, %437 : vector<16x64xf32>
    %439 = vector.broadcast %420 : vector<1x64xf32> to vector<16x64xf32>
    %440 = arith.addf %438, %439 : vector<16x64xf32>
    %c0_172 = arith.constant 0 : index
    %c0_173 = arith.constant 0 : index
    %441 = vector.load %arg22[%c0_172, %c0_173] : memref<64x2048xf32, #tpu.memory_space<vmem>>, vector<64x2048xf32>
    %cst_174 = arith.constant dense<0.000000e+00> : vector<16x2048xf32>
    %442 = tpu.matmul %440, %441, %cst_174 {dimension_numbers = #tpu.dot_dimension_numbers<[1], [0], [0], [1], [0, 0, 1, 1], [], []>} : vector<16x64xf32>, vector<64x2048xf32>, vector<16x2048xf32> -> vector<16x2048xf32>
    %c0_175 = arith.constant 0 : index
    %c0_176 = arith.constant 0 : index
    %443 = vector.load %arg23[%c0_175, %c0_176] : memref<1x2048xf32, #tpu.memory_space<vmem>>, vector<1x2048xf32>
    %444 = vector.broadcast %443 : vector<1x2048xf32> to vector<16x2048xf32>
    %445 = arith.addf %442, %444 : vector<16x2048xf32>
    %cst_177 = arith.constant 0.000000e+00 : f32
    %446 = vector.broadcast %cst_177 : f32 to vector<16x2048xf32>
    %447 = arith.maximumf %445, %446 : vector<16x2048xf32>
    %c0_178 = arith.constant 0 : index
    %c0_179 = arith.constant 0 : index
    %448 = vector.load %arg24[%c0_178, %c0_179] : memref<2048x64xf32, #tpu.memory_space<vmem>>, vector<2048x64xf32>
    %cst_180 = arith.constant dense<0.000000e+00> : vector<16x64xf32>
    %449 = tpu.matmul %447, %448, %cst_180 {dimension_numbers = #tpu.dot_dimension_numbers<[1], [0], [0], [1], [0, 0, 1, 1], [], []>} : vector<16x2048xf32>, vector<2048x64xf32>, vector<16x64xf32> -> vector<16x64xf32>
    %c0_181 = arith.constant 0 : index
    %c0_182 = arith.constant 0 : index
    %450 = vector.load %arg25[%c0_181, %c0_182] : memref<1x64xf32, #tpu.memory_space<vmem>>, vector<1x64xf32>
    %451 = vector.broadcast %450 : vector<1x64xf32> to vector<16x64xf32>
    %452 = arith.addf %449, %451 : vector<16x64xf32>
    %453 = arith.addf %440, %452 : vector<16x64xf32>
    %c0_183 = arith.constant 0 : index
    %c0_184 = arith.constant 0 : index
    %454 = vector.load %arg26[%c0_183, %c0_184] : memref<1x64xf32, #tpu.memory_space<vmem>>, vector<1x64xf32>
    %c0_185 = arith.constant 0 : index
    %c0_186 = arith.constant 0 : index
    %455 = vector.load %arg27[%c0_185, %c0_186] : memref<1x64xf32, #tpu.memory_space<vmem>>, vector<1x64xf32>
    %cst_187 = arith.constant dense<0.000000e+00> : vector<16xf32>
    %456 = vector.multi_reduction <add>, %453, %cst_187 [1] : vector<16x64xf32> to vector<16xf32>
    %457 = vector.shape_cast %456 : vector<16xf32> to vector<16x1xf32>
    %cst_188 = arith.constant 6.400000e+01 : f32
    %458 = vector.broadcast %cst_188 : f32 to vector<16x1xf32>
    %459 = arith.divf %457, %458 : vector<16x1xf32>
    %460 = vector.broadcast %459 : vector<16x1xf32> to vector<16x64xf32>
    %461 = arith.subf %453, %460 : vector<16x64xf32>
    %462 = arith.mulf %461, %461 : vector<16x64xf32>
    %cst_189 = arith.constant dense<0.000000e+00> : vector<16xf32>
    %463 = vector.multi_reduction <add>, %462, %cst_189 [1] : vector<16x64xf32> to vector<16xf32>
    %464 = vector.shape_cast %463 : vector<16xf32> to vector<16x1xf32>
    %cst_190 = arith.constant 6.400000e+01 : f32
    %465 = vector.broadcast %cst_190 : f32 to vector<16x1xf32>
    %466 = arith.divf %464, %465 : vector<16x1xf32>
    %cst_191 = arith.constant 9.99999974E-6 : f32
    %467 = vector.broadcast %cst_191 : f32 to vector<16x1xf32>
    %468 = arith.addf %466, %467 : vector<16x1xf32>
    %469 = math.rsqrt %468 : vector<16x1xf32>
    %470 = vector.broadcast %469 : vector<16x1xf32> to vector<16x64xf32>
    %471 = arith.mulf %461, %470 : vector<16x64xf32>
    %472 = vector.broadcast %454 : vector<1x64xf32> to vector<16x64xf32>
    %473 = arith.mulf %471, %472 : vector<16x64xf32>
    %474 = vector.broadcast %455 : vector<1x64xf32> to vector<16x64xf32>
    %475 = arith.addf %473, %474 : vector<16x64xf32>
    %c0_192 = arith.constant 0 : index
    %c0_193 = arith.constant 0 : index
    %476 = vector.load %arg28[%c0_192, %c0_193] : memref<1x64xf32, #tpu.memory_space<vmem>>, vector<1x64xf32>
    %cst_194 = arith.constant dense<0.000000e+00> : vector<1x16xf32>
    %477 = tpu.matmul %476, %475, %cst_194 {dimension_numbers = #tpu.dot_dimension_numbers<[1], [1], [0], [0], [0, 0, 1, 0], [], []>} : vector<1x64xf32>, vector<16x64xf32>, vector<1x16xf32> -> vector<1x16xf32>
    %c0_195 = arith.constant 0 : index
    %c0_196 = arith.constant 0 : index
    %478 = vector.load %arg29[%c0_195, %c0_196] : memref<1x1xf32, #tpu.memory_space<vmem>>, vector<1x1xf32>
    %479 = vector.broadcast %478 : vector<1x1xf32> to vector<1x16xf32>
    %480 = arith.addf %477, %479 : vector<1x16xf32>
    %481 = arith.negf %480 : vector<1x16xf32>
    %482 = math.exp %481 : vector<1x16xf32>
    %cst_197 = arith.constant 1.000000e+00 : f32
    %483 = vector.broadcast %cst_197 : f32 to vector<1x16xf32>
    %484 = arith.addf %483, %482 : vector<1x16xf32>
    %485 = arith.divf %483, %484 : vector<1x16xf32>
    %486 = vector.extract_strided_slice %485 {offsets = [0, 0], sizes = [1, 8], strides = [1, 1]} : vector<1x16xf32> to vector<1x8xf32>
    %c0_198 = arith.constant 0 : index
    %c0_199 = arith.constant 0 : index
    %487 = vector.load %arg30[%c0_198, %c0_199] : memref<2x8xf32, #tpu.memory_space<vmem>>, vector<1x8xf32>
    tpu.vector_store %arg30[%c0_198, %c0_199], %486 {strides = array<i32>} : memref<2x8xf32, #tpu.memory_space<vmem>>, vector<1x8xf32>,
    %488 = vector.extract_strided_slice %485 {offsets = [0, 8], sizes = [1, 8], strides = [1, 1]} : vector<1x16xf32> to vector<1x8xf32>
    %c1 = arith.constant 1 : index
    %c0_200 = arith.constant 0 : index
    %489 = vector.load %arg30[%c1, %c0_200] : memref<2x8xf32, #tpu.memory_space<vmem>>, vector<1x8xf32>
    tpu.vector_store %arg30[%c1, %c0_200], %488 {strides = array<i32>} : memref<2x8xf32, #tpu.memory_space<vmem>>, vector<1x8xf32>,
    return
  }
  func.func @transform_0(%arg0: i32) -> (i32, i32) {
    %c0_i32 = arith.constant 0 : i32
    %c0_i32_0 = arith.constant 0 : i32
    %c0_i32_1 = arith.constant 0 : i32
    return %c0_i32, %c0_i32_0 : i32, i32
  }
  func.func @transform_1(%arg0: i32) -> (i32, i32) {
    %c0_i32 = arith.constant 0 : i32
    %c0_i32_0 = arith.constant 0 : i32
    %c0_i32_1 = arith.constant 0 : i32
    return %c0_i32, %c0_i32_0 : i32, i32
  }
  func.func @transform_2(%arg0: i32) -> (i32, i32) {
    %c0_i32 = arith.constant 0 : i32
    %c0_i32_0 = arith.constant 0 : i32
    %c0_i32_1 = arith.constant 0 : i32
    return %c0_i32, %c0_i32_0 : i32, i32
  }
  func.func @transform_3(%arg0: i32) -> (i32, i32) {
    %c0_i32 = arith.constant 0 : i32
    %c0_i32_0 = arith.constant 0 : i32
    %c0_i32_1 = arith.constant 0 : i32
    return %c0_i32, %c0_i32_0 : i32, i32
  }
  func.func @transform_4(%arg0: i32) -> (i32, i32) {
    %c0_i32 = arith.constant 0 : i32
    %c0_i32_0 = arith.constant 0 : i32
    %c0_i32_1 = arith.constant 0 : i32
    return %c0_i32, %c0_i32_0 : i32, i32
  }
  func.func @transform_5(%arg0: i32) -> (i32, i32) {
    %c0_i32 = arith.constant 0 : i32
    %c0_i32_0 = arith.constant 0 : i32
    %c0_i32_1 = arith.constant 0 : i32
    return %c0_i32, %c0_i32_0 : i32, i32
  }
  func.func @transform_6(%arg0: i32) -> (i32, i32) {
    %c0_i32 = arith.constant 0 : i32
    %c0_i32_0 = arith.constant 0 : i32
    %c0_i32_1 = arith.constant 0 : i32
    return %c0_i32, %c0_i32_0 : i32, i32
  }
  func.func @transform_7(%arg0: i32) -> (i32, i32) {
    %c0_i32 = arith.constant 0 : i32
    %c0_i32_0 = arith.constant 0 : i32
    %c0_i32_1 = arith.constant 0 : i32
    return %c0_i32, %c0_i32_0 : i32, i32
  }
  func.func @transform_8(%arg0: i32) -> (i32, i32) {
    %c0_i32 = arith.constant 0 : i32
    %c0_i32_0 = arith.constant 0 : i32
    %c0_i32_1 = arith.constant 0 : i32
    return %c0_i32, %c0_i32_0 : i32, i32
  }
  func.func @transform_9(%arg0: i32) -> (i32, i32) {
    %c0_i32 = arith.constant 0 : i32
    %c0_i32_0 = arith.constant 0 : i32
    %c0_i32_1 = arith.constant 0 : i32
    return %c0_i32, %c0_i32_0 : i32, i32
  }
  func.func @transform_10(%arg0: i32) -> (i32, i32) {
    %c0_i32 = arith.constant 0 : i32
    %c0_i32_0 = arith.constant 0 : i32
    %c0_i32_1 = arith.constant 0 : i32
    return %c0_i32, %c0_i32_0 : i32, i32
  }
  func.func @transform_11(%arg0: i32) -> (i32, i32) {
    %c0_i32 = arith.constant 0 : i32
    %c0_i32_0 = arith.constant 0 : i32
    %c0_i32_1 = arith.constant 0 : i32
    return %c0_i32, %c0_i32_0 : i32, i32
  }
  func.func @transform_12(%arg0: i32) -> (i32, i32) {
    %c0_i32 = arith.constant 0 : i32
    %c0_i32_0 = arith.constant 0 : i32
    %c0_i32_1 = arith.constant 0 : i32
    return %c0_i32, %c0_i32_0 : i32, i32
  }
  func.func @transform_13(%arg0: i32) -> (i32, i32) {
    %c0_i32 = arith.constant 0 : i32
    %c0_i32_0 = arith.constant 0 : i32
    %c0_i32_1 = arith.constant 0 : i32
    return %c0_i32, %c0_i32_0 : i32, i32
  }
  func.func @transform_14(%arg0: i32) -> (i32, i32) {
    %c0_i32 = arith.constant 0 : i32
    %c0_i32_0 = arith.constant 0 : i32
    %c0_i32_1 = arith.constant 0 : i32
    return %c0_i32, %c0_i32_0 : i32, i32
  }
  func.func @transform_15(%arg0: i32) -> (i32, i32) {
    %c0_i32 = arith.constant 0 : i32
    %c0_i32_0 = arith.constant 0 : i32
    %c0_i32_1 = arith.constant 0 : i32
    return %c0_i32, %c0_i32_0 : i32, i32
  }
  func.func @transform_16(%arg0: i32) -> (i32, i32) {
    %c0_i32 = arith.constant 0 : i32
    %c0_i32_0 = arith.constant 0 : i32
    %c0_i32_1 = arith.constant 0 : i32
    return %c0_i32, %c0_i32_0 : i32, i32
  }
  func.func @transform_17(%arg0: i32) -> (i32, i32) {
    %c0_i32 = arith.constant 0 : i32
    %c0_i32_0 = arith.constant 0 : i32
    %c0_i32_1 = arith.constant 0 : i32
    return %c0_i32, %c0_i32_0 : i32, i32
  }
  func.func @transform_18(%arg0: i32) -> (i32, i32) {
    %c0_i32 = arith.constant 0 : i32
    %c0_i32_0 = arith.constant 0 : i32
    %c0_i32_1 = arith.constant 0 : i32
    return %c0_i32, %c0_i32_0 : i32, i32
  }
  func.func @transform_19(%arg0: i32) -> (i32, i32) {
    %c0_i32 = arith.constant 0 : i32
    %c0_i32_0 = arith.constant 0 : i32
    %c0_i32_1 = arith.constant 0 : i32
    return %c0_i32, %c0_i32_0 : i32, i32
  }
  func.func @transform_20(%arg0: i32) -> (i32, i32) {
    %c0_i32 = arith.constant 0 : i32
    %c0_i32_0 = arith.constant 0 : i32
    %c0_i32_1 = arith.constant 0 : i32
    return %c0_i32, %c0_i32_0 : i32, i32
  }
  func.func @transform_21(%arg0: i32) -> (i32, i32) {
    %c0_i32 = arith.constant 0 : i32
    %c0_i32_0 = arith.constant 0 : i32
    %c0_i32_1 = arith.constant 0 : i32
    return %c0_i32, %c0_i32_0 : i32, i32
  }
  func.func @transform_22(%arg0: i32) -> (i32, i32) {
    %c0_i32 = arith.constant 0 : i32
    %c0_i32_0 = arith.constant 0 : i32
    %c0_i32_1 = arith.constant 0 : i32
    return %c0_i32, %c0_i32_0 : i32, i32
  }
  func.func @transform_23(%arg0: i32) -> (i32, i32) {
    %c0_i32 = arith.constant 0 : i32
    %c0_i32_0 = arith.constant 0 : i32
    %c0_i32_1 = arith.constant 0 : i32
    return %c0_i32, %c0_i32_0 : i32, i32
  }
  func.func @transform_24(%arg0: i32) -> (i32, i32) {
    %c0_i32 = arith.constant 0 : i32
    %c0_i32_0 = arith.constant 0 : i32
    %c0_i32_1 = arith.constant 0 : i32
    return %c0_i32, %c0_i32_0 : i32, i32
  }
  func.func @transform_25(%arg0: i32) -> (i32, i32) {
    %c0_i32 = arith.constant 0 : i32
    %c0_i32_0 = arith.constant 0 : i32
    %c0_i32_1 = arith.constant 0 : i32
    return %c0_i32, %c0_i32_0 : i32, i32
  }
  func.func @transform_26(%arg0: i32) -> (i32, i32) {
    %c0_i32 = arith.constant 0 : i32
    %c0_i32_0 = arith.constant 0 : i32
    %c0_i32_1 = arith.constant 0 : i32
    return %c0_i32, %c0_i32_0 : i32, i32
  }
  func.func @transform_27(%arg0: i32) -> (i32, i32) {
    %c0_i32 = arith.constant 0 : i32
    %c0_i32_0 = arith.constant 0 : i32
    %c0_i32_1 = arith.constant 0 : i32
    return %c0_i32, %c0_i32_0 : i32, i32
  }
  func.func @transform_28(%arg0: i32) -> (i32, i32) {
    %c0_i32 = arith.constant 0 : i32
    %c0_i32_0 = arith.constant 0 : i32
    %c0_i32_1 = arith.constant 0 : i32
    return %c0_i32, %c0_i32_0 : i32, i32
  }
  func.func @transform_29(%arg0: i32) -> (i32, i32) {
    %c0_i32 = arith.constant 0 : i32
    %c0_i32_0 = arith.constant 0 : i32
    %c0_i32_1 = arith.constant 0 : i32
    return %c0_i32, %c0_i32_0 : i32, i32
  }
}

</mosaic_0001>

<bundles_post_ra>
// kernel: transformer_scorer_forward.1
= control target key start
LH: loop header
LB: loop body
LE: loop exit
PB: predicated region body
PF: predicated region fallthrough
CT: control target
= control target key end

     0   :  { %s9383_s6 = smov 1   ;;  %s9384_s10 = smov 2   ;;  %s11296_s0 = inlined_call_operand.smem [shape: u32[30], index: -1, kind: input, shape index: {}] }
   0x1   :  { %s9432_s5 = sld [smem:[%s11296_s0]]   ;;  %s9385_s14 = smov 3  }
   0x2   :  { %s9437_s9 = sld [smem:[%s11296_s0 + %s9383_s6]]   ;;  %s9386_s18 = smov 4  }
   0x3   :  { %s9442_s13 = sld [smem:[%s11296_s0 + %s9384_s10]]   ;;  %s9387_s22 = smov 5  }
   0x4   :  { %s9447_s17 = sld [smem:[%s11296_s0 + %s9385_s14]]   ;;  %s9388_s26 = smov 6  }
   0x5   :  { %s9452_s21 = sld [smem:[%s11296_s0 + %s9386_s18]]   ;;  %s9389_s30 = smov 7  }
   0x6   :  { %s9457_s25 = sld [smem:[%s11296_s0 + %s9387_s22]]   ;;  %s9390_s4 = smov 8  }
   0x7   :  { %s9462_s29 = sld [smem:[%s11296_s0 + %s9388_s26]]   ;;  %s9391_s10 = smov 9  }
   0x8   :  { %s9467_s3 = sld [smem:[%s11296_s0 + %s9389_s30]]   ;;  %s9392_s15 = smov 10  }
   0x9   :  { %s9472_s8 = sld [smem:[%s11296_s0 + %s9390_s4]]   ;;  %s9393_s20 = smov 11  }
   0xa   :  { %s9477_s14 = sld [smem:[%s11296_s0 + %s9391_s10]]   ;;  %s9394_s26 = smov 12  }
   0xb   :  { %s9482_s19 = sld [smem:[%s11296_s0 + %s9392_s15]]   ;;  %s9395_s1 = smov 13  }
   0xc   :  { %s9487_s24 = sld [smem:[%s11296_s0 + %s9393_s20]]   ;;  %s9396_s7 = smov 14  }
   0xd   :  { %s9492_s30 = sld [smem:[%s11296_s0 + %s9394_s26]]   ;;  %s9397_s15 = smov 15  }
   0xe   :  { %s9497_s6 = sld [smem:[%s11296_s0 + %s9395_s1]]   ;;  %s9398_s22 = smov 16  }
   0xf   :  { %s9502_s12 = sld [smem:[%s11296_s0 + %s9396_s7]]   ;;  %s9399_s28 = smov 17  }
  0x10   :  { %s9507_s20 = sld [smem:[%s11296_s0 + %s9397_s15]]   ;;  %s9400_s7 = smov 18  }
  0x11   :  { %s9512_s27 = sld [smem:[%s11296_s0 + %s9398_s22]]   ;;  %s9401_s15 = smov 19  }
  0x12   :  { %s9517_s4 = sld [smem:[%s11296_s0 + %s9399_s28]]   ;;  %s9402_s22 = smov 20  }
  0x13   :  { %s9403_s28 = smov 21   ;;  %s9411_s1 = smov 29  }
  0x14   :  { %11301 = sst [smem:[#allocation7_spill]] %s9497_s6 }
  0x15   :  { %11302 = sst [smem:[#allocation8_spill]] %s9502_s12 }
  0x16   :  { %s9522_s12 = sld [smem:[%s11296_s0 + %s9400_s7]]   ;;  %s9404_s7 = smov 22  }
  0x17   :  { %11303 = sst [smem:[#allocation9_spill]] %s9512_s27 }
  0x18   :  { %11304 = sst [smem:[#allocation10_spill]] %s9517_s4 }
  0x19   :  { %s9527_s6 = sld [smem:[%s11296_s0 + %s9401_s15]]   ;;  %s9405_s15 = smov 23  }
  0x1a   :  { %s9532_s27 = sld [smem:[%s11296_s0 + %s9402_s22]]   ;;  %s9406_s22 = smov 24  }
  0x1b   :  { %s9537_s4 = sld [smem:[%s11296_s0 + %s9403_s28]]   ;;  %s9407_s28 = smov 25  }
  0x1c   :  { %11305 = sst [smem:[#allocation11_spill]] %s9522_s12 }
  0x1d   :  { %s9542_s12 = sld [smem:[%s11296_s0 + %s9404_s7]]   ;;  %s9408_s7 = smov 26  }
  0x1f   :  { %11306 = sst [smem:[#allocation12_spill]] %s9527_s6 }
  0x20   :  { %11307 = sst [smem:[#allocation13_spill]] %s9532_s27 }
  0x21   :  { %11308 = sst [smem:[#allocation14_spill]] %s9537_s4 }
  0x22   :  { %s9547_s6 = sld [smem:[%s11296_s0 + %s9405_s15]]   ;;  %s9409_s15 = smov 27  }
  0x23   :  { %11309 = sst [smem:[#allocation15_spill]] %s9542_s12 }
  0x24   :  { %s9552_s27 = sld [smem:[%s11296_s0 + %s9406_s22]]   ;;  %s9410_s22 = smov 28  }
  0x25   :  { %s9557_s4 = sld [smem:[%s11296_s0 + %s9407_s28]]  }
  0x26   :  { %s9562_s12 = sld [smem:[%s11296_s0 + %s9408_s7]]  }
  0x28   :  { %11310 = sst [smem:[#allocation16_spill]] %s9547_s6 }
  0x29   :  { %s9567_s6 = sld [smem:[%s11296_s0 + %s9409_s15]]  }
  0x2a   :  { %11311 = sst [smem:[#allocation17_spill]] %s9552_s27 }
  0x2b   :  { %11312 = sst [smem:[#allocation18_spill]] %s9557_s4 }
  0x2c   :  { %s8094_s27 = sld [smem:[%s11296_s0 + %s9410_s22]]  }
  0x2d   :  { %s9575_s4 = sld [smem:[%s11296_s0 + %s9411_s1]]  }
  0x32   :  { %v64_v0 = vstv %s8094_s27 }
  0x33   :  { %65 = vst [vmem:[#allocation3] sm:$0x1] %v64_v0 }
  0x34   :  { %v130_v1 = vld [vmem:[%s9437_s9 + $0x18] sm:$0xff]  ;;  %v129_v2 = vld [vmem:[%s9437_s9 + $0x10] sm:$0xff]  ;;  %vm138_vm0 = vcmask 261120   ;;  %v128_v3 = vld [vmem:[%s9437_s9 + $0x8] sm:$0xff] }
  0x35   :  { %8944 = vmatprep.subr.mxu0 %v130_v1  ;;  %v125_v4 = vld [vmem:[%s9432_s5] sm:$0xff]  ;;  %v235_v5 = vld [vmem:[%s9447_s17 + $0x78] sm:$0xff]  ;;  %v234_v6 = vld [vmem:[%s9447_s17 + $0x70] sm:$0xff] }
  0x36   :  { %8945 = vmatpush3.msra.mxu0 %v130_v1  ;;  %8952 = vmatprep.mubr.msk.f32.mxu0 %vm138_vm0, %v125_v4  ;;  %v233_v7 = vld [vmem:[%s9447_s17 + $0x68] sm:$0xff]  ;;  %v232_v8 = vld [vmem:[%s9447_s17 + $0x60] sm:$0xff]  ;;  %v231_v10 = vld [vmem:[%s9447_s17 + $0x58] sm:$0xff] }
  0x37   :  { %8946 = vmatprep.subr.mxu0 %v129_v2  ;;  %271 = vmatprep.subr.mxu1 %v235_v5  ;;  %v127_v9 = vld [vmem:[%s9437_s9] sm:$0xff]  ;;  %v230_v11 = vld [vmem:[%s9447_s17 + $0x50] sm:$0xff] }
  0x38   :  { %8947 = vmatpush3.msra.mxu0 %v129_v2  ;;  %272 = vmatpush1.msra.mxu1 %v234_v6 }
  0x39   :  { %8948 = vmatprep.subr.mxu0 %v128_v3  ;;  %273 = vmatprep.subr.mxu1 %v233_v7 }
  0x3a   :  { %66 = vsyncpa [#allocation5], 0  ;;  %8949 = vmatpush3.msra.mxu0 %v128_v3  ;;  %v126_v12 = vld [vmem:[%s9432_s5 + $0x8] sm:$0xff]  ;;  %274 = vmatpush1.msra.mxu1 %v232_v8  ;;  %v228_v14 = vld [vmem:[%s9447_s17 + $0x40] sm:$0xff]  ;;  %v9412_v23 = vmov 0.0   ;;  %vm248_vm1 = vcmask 523264   ;;  %v238_v29 = vlaneseq }
  0x3b   :  { %v229_v13 = vld [vmem:[%s9447_s17 + $0x48] sm:$0xff]  ;;  %8950 = vmatprep.subr.mxu0 %v127_v9  ;;  %275 = vmatprep.subr.mxu1 %v231_v10  ;;  %v227_v15 = vld [vmem:[%s9447_s17 + $0x38] sm:$0xff]  ;;  %v226_v16 = vld [vmem:[%s9447_s17 + $0x30] sm:$0xff]  ;;  %vm9413_vm2 = vmmov 0   ;;  %s9414_s0 = smov 48   ;;  %s9415_s5 = smov 64  }
  0x3c   :  { %8951 = vmatpush3.msra.mxu0 %v127_v9  ;;  %276 = vmatpush1.msra.mxu1 %v230_v11  ;;  %v225_v17 = vld [vmem:[%s9447_s17 + $0x28] sm:$0xff]  ;;  %v224_v18 = vld [vmem:[%s9447_s17 + $0x20] sm:$0xff]  ;;  %v223_v19 = vld [vmem:[%s9447_s17 + $0x18] sm:$0xff]  ;;  %v9614_v30 = vshrl.u32 %v238_v29, 7  ;;  %vm343_vm3 = vcmask 130048   ;;  %vm419_vm4 = vcmask 64512  }
  0x3d   :  { %8953 = vmatmul.mubr.msk.f32.vlgmr.msra.gmra.mxu0 %vm138_vm0, %v126_v12  ;;  %277 = vmatprep.subr.mxu1 %v229_v13  ;;  %v222_v20 = vld [vmem:[%s9447_s17 + $0x10] sm:$0xff]  ;;  %v221_v21 = vld [vmem:[%s9447_s17 + $0x8] sm:$0xff]  ;;  %v220_v22 = vld [vmem:[%s9447_s17] sm:$0xff]  ;;  %s9416_s9 = smov 112   ;;  %s9418_s17 = smov 32   ;;  %vm8046_vm5 = vcmask 57344  }
  0x3e   :  { %278 = vmatpush1.msra.mxu1 %v228_v14  ;;  %319 = vmatprep.mubr.f32.mxu1 %v9412_v23  ;;  %v8096_v25 = vld [vmem:[%s9442_s13] ss:$0 sm:$0xff]  ;;  %v9621_v31 = vsub.s32 0, %v9614_v30  ;;  %v9634_v39 = vsub.s32 1, %v9614_v30  ;;  %s9417_s13 = smov 96   ;;  %v9671_v4 = vld [vmem:[%s9457_s25 + $0x18] sm:$0xff] }
  0x3f   :  { %279 = vmatprep.subr.mxu1 %v227_v15  ;;  %8955 = vmatprep.subr.mxu0 %v9412_v23  ;;  %v236_v32 = vld [vmem:[%s9452_s21] sm:$0x3]  ;;  %v9674_v5 = vld [vmem:[%s9457_s25 + $0x10] sm:$0xff]  ;;  %v9682_v10 = vld [vmem:[%s9457_s25 + $0x8] sm:$0xff]  ;;  %s9419_s21 = smov 80   ;;  %s9420_s27 = smov 16  }
  0x40   :  { %280 = vmatpush1.msra.mxu1 %v226_v16  ;;  %8957 = vmatprep.mubr.msk.f32.mxu0 %vm9413_vm2, %v9412_v23  ;;  %v241_v33 = vrot.slane %v236_v32, %v9621_v31  ;;  %v9637_v40 = vrot.slane %v236_v32, %v9634_v39  ;;  %v9686_v11 = vld [vmem:[%s9457_s25] sm:$0xff]  ;;  %s11322_s7 = sld [smem:[#allocation15_spill]]  ;;  %s9423_s15 = smov [#allocation4]  }
  0x41   :  { %281 = vmatprep.subr.mxu1 %v225_v17  ;;  %s11323_s10 = sld [smem:[#allocation17_spill]] }
  0x42   :  { %282 = vmatpush1.msra.mxu1 %v224_v18  ;;  %s11324_s11 = sld [smem:[#allocation18_spill]] }
  0x43   :  { %283 = vmatprep.subr.mxu1 %v223_v19 }
  0x44   :  { %284 = vmatpush1.msra.mxu1 %v222_v20 }
  0x45   :  { %285 = vmatprep.subr.mxu1 %v221_v21 }
  0x46   :  { %286 = vmatpush1.msra.mxu1 %v220_v22 }
  0x47   :  { %8975 = vmatprep.subr.mxu1 %v9412_v23 }
  0xfd   :  { %v8954_v24 = vpop.f32.mrf.mxu0 }
  0xfe   :  { %v9610_v28 = vadd.f32 %v8954_v24, %v8096_v25 }
  0xff   :  { %v211_v26 = vpop.f32.mrf.mxu0 }
 0x100   :  { %v9605_v27 = vadd.f32 %v8096_v25, %v211_v26 }
 0x102   :  { %8099 = vmatmul.mubr.msk.f32.vlgmr.msra.gmra.mxu1 %vm248_vm1, %v9605_v27 }
 0x103   :  { %325 = vmatprep.mubr.f32.mxu1 %v9412_v23  ;;  %8976 = vmatpush3.msra.mxu1 %v9671_v4 }
 0x104   :  { %8977 = vmatprep.subr.mxu1 %v9412_v23 }
 0x105   :  { %8978 = vmatpush3.msra.mxu1 %v9674_v5 }
 0x106   :  { %8100 = vmatmul.mubr.msk.f32.gmra.mxu1 %vm248_vm1, %v9610_v28  ;;  %8989 = vmatprep.subr.mxu1 %v9412_v23 }
 0x107   :  { %8979 = vmatprep.mubr.msk.f32.mxu1 %vm9413_vm2, %v9412_v23 }
 0x1c2   :  { %v321_v34 = vpop.f32.mrf.mxu1 }
 0x1c3   :  { %v9625_v35 = vadd.f32 %v321_v34, %v241_v33 }
 0x1c4   :  { %v323_v36 = vpop.f32.mrf.mxu1 }
 0x1c5   :  { %506 = vrot.lane.b32.xlu1 %v9625_v35, %s9414_s0  ;;  %341 = vrot.lane.b32.xlu0 %v9625_v35, %s9415_s5  ;;  %v9642_v42 = vadd.f32 %v323_v36, %v9637_v40 }
 0x1c6   :  { %v327_v37 = vpop.f32.mrf.mxu1 }
 0x1c7   :  { %v9631_v38 = vadd.f32 %v327_v37, %v241_v33  ;;  %v9721_v37 = vld [vmem:[%s9457_s25 + $0x28] sm:$0xff] }
 0x1c8   :  { %v9707_v18 = vpop.f32.mrf.mxu1 }
 0x237   :  { %v342_v41 = vpop.permute.xlu0 %341  ;;  %v507_v52 = vpop.permute.xlu1 %506 }
 0x238   :  { %8956 = vmatpush3.xpose.msk.msra.mxu0 %vm343_vm3, %v342_v41 }
 0x239   :  { %8960 = vmatprep.subr.mxu0 %v9412_v23 }
 0x23b   :  { %8958 = vmatmul.mubr.msk.f32.vlgmr.msra.gmra.mxu0 %vm343_vm3, %v9625_v35 }
 0x23c   :  { %8961 = vmatpush3.msra.mxu0 %v9642_v42  ;;  %8962 = vmatprep.mubr.msk.f32.mxu0 %vm9413_vm2, %v9412_v23 }
 0x23d   :  { %8965 = vmatprep.subr.mxu0 %v9412_v23 }
 0x2fb   :  { %v414_v43 = vpop.f32.mrf.mxu0 }
 0x2fc   :  { %v418_v44 = vmul.f32 0.25, %v414_v43 }
 0x2fd   :  { %v8959_v45 = vpop.f32.mrf.mxu0 }
 0x2fe   :  { %v420_v46 = vsel %vm419_vm4, %v418_v44, -inf }
 0x2ff   :  { %421 = vmax.xlane.f32.xlu0 %v420_v46  ;;  %v9734_v46 = vld [vmem:[%s9457_s25 + $0x20] sm:$0xff] }
 0x388   :  { %v422_v47 = vpop.xlane.xlu0 %421 }
 0x389   :  { %v423_v48 = vsub.f32 %v418_v44, %v422_v47 }
 0x38b   :  { %v424_v49 = vmul.f32 1.442695, %v423_v48 }
 0x38d   :  { %9277 = vpow2.f32 %v424_v49 }
 0x39a   :  { %v9278_v50 = vpop.eup %9277 }
 0x39b   :  { %v426_v51 = vsel %vm419_vm4, %v9278_v50, 0.0 }
 0x39c   :  { %427 = vadd.xlane.f32.xlu1 %v426_v51 }
 0x3ad   :  { %504 = vrot.lane.b32.xlu1 %v9625_v35, %s9416_s9 }
 0x425   :  { %v428_v53 = vpop.xlane.xlu1 %427 }
 0x426   :  { %9279 = vrcp.f32 %v428_v53 }
 0x429   :  { %v505_v56 = vpop.permute.xlu1 %504 }
 0x433   :  { %v9280_v54 = vpop.eup %9279 }
 0x434   :  { %v430_v55 = vmul.f32 %v9280_v54, %v9278_v50 }
 0x436   :  { %8963 = vmatmul.mubr.msk.f32.vlgmr.msra.gmra.mxu0 %vm419_vm4, %v430_v55 }
 0x437   :  { %8966 = vmatpush3.xpose.msk.msra.mxu0 %vm343_vm3, %v507_v52  ;;  %8967 = vmatprep.mubr.msk.f32.mxu0 %vm9413_vm2, %v9412_v23 }
 0x438   :  { %8970 = vmatprep.subr.mxu0 %v9412_v23 }
 0x43a   :  { %8968 = vmatmul.mubr.msk.f32.vlgmr.msra.gmra.mxu0 %vm343_vm3, %v505_v56 }
 0x43b   :  { %8972 = vmatprep.mubr.msk.f32.mxu0 %vm9413_vm2, %v9412_v23 }
 0x4f6   :  { %v500_v57 = vpop.f32.mrf.mxu0 }
 0x4f8   :  { %v8964_v58 = vpop.f32.mrf.mxu0 }
 0x4fa   :  { %v578_v59 = vpop.f32.mrf.mxu0 }
 0x4fb   :  { %v582_v60 = vmul.f32 0.25, %v578_v59 }
 0x4fc   :  { %v8969_v61 = vpop.f32.mrf.mxu0 }
 0x4fd   :  { %v583_v62 = vsel %vm419_vm4, %v582_v60, -inf }
 0x4fe   :  { %584 = vmax.xlane.f32.xlu1 %v583_v62  ;;  %v9757_v62 = vld [vmem:[%s9457_s25 + $0x38] sm:$0xff] }
 0x50f   :  { %817 = vrot.lane.b32.xlu1 %v9625_v35, %s9417_s13 }
 0x587   :  { %v585_v63 = vpop.xlane.xlu1 %584 }
 0x588   :  { %v586_v0 = vsub.f32 %v582_v60, %v585_v63  ;;  %v9760_v63 = vld [vmem:[%s9457_s25 + $0x30] sm:$0xff]  ;;  %s11313_s25 = sld [smem:[#allocation7_spill]] }
 0x58a   :  { %v587_v1 = vmul.f32 1.442695, %v586_v0 }
 0x58b   :  { %v818_v15 = vpop.permute.xlu1 %817 }
 0x58c   :  { %9281 = vpow2.f32 %v587_v1 }
 0x599   :  { %v9282_v2 = vpop.eup %9281 }
 0x59a   :  { %v589_v3 = vsel %vm419_vm4, %v9282_v2, 0.0 }
 0x59b   :  { %590 = vadd.xlane.f32.xlu0 %v589_v3 }
 0x5b1   :  { %595 = vrot.lane.b32.xlu0 %v9642_v42, %s9416_s9 }
 0x5b5   :  { %819 = vrot.lane.b32.xlu0 %v9625_v35, %s9418_s17 }
 0x624   :  { %v591_v6 = vpop.xlane.xlu0 %590 }
 0x625   :  { %9283 = vrcp.f32 %v591_v6 }
 0x628   :  { %v596_v7 = vpop.permute.xlu0 %595 }
 0x629   :  { %8971 = vmatpush3.msra.mxu0 %v596_v7 }
 0x62a   :  { %8982 = vmatprep.subr.mxu0 %v9412_v23 }
 0x62c   :  { %v820_v13 = vpop.permute.xlu0 %819 }
 0x632   :  { %v9284_v8 = vpop.eup %9283 }
 0x633   :  { %v593_v9 = vmul.f32 %v9284_v8, %v9282_v2  ;;  %v9786_v8 = vadd.f32 %v9707_v18, %v9637_v40 }
 0x635   :  { %8973 = vmatmul.mubr.msk.f32.vlgmr.msra.gmra.mxu0 %vm419_vm4, %v593_v9 }
 0x636   :  { %8983 = vmatpush3.msra.mxu0 %v9682_v10  ;;  %8986 = vmatprep.mubr.msk.f32.mxu0 %vm9413_vm2, %v9412_v23 }
 0x637   :  { %8984 = vmatprep.subr.mxu0 %v9412_v23 }
 0x638   :  { %8985 = vmatpush3.msra.mxu0 %v9686_v11 }
 0x639   :  { %8987 = vmatmul.mubr.msk.f32.vlgmr.msra.gmra.mxu0 %vm343_vm3, %v500_v57  ;;  %8994 = vmatprep.subr.mxu0 %v9412_v23 }
 0x63a   :  { %8996 = vmatprep.mubr.msk.f32.mxu0 %vm9413_vm2, %v9412_v23 }
 0x6f5   :  { %v667_v12 = vpop.f32.mrf.mxu0 }
 0x6f6   :  { %8980 = vmatmul.mubr.msk.f32.vlgmr.msra.gmra.mxu1 %vm343_vm3, %v667_v12 }
 0x6f7   :  { %8990 = vmatpush3.xpose.msk.msra.mxu1 %vm343_vm3, %v820_v13  ;;  %v8974_v14 = vpop.f32.mrf.mxu0  ;;  %8991 = vmatprep.mubr.msk.f32.mxu1 %vm9413_vm2, %v9412_v23 }
 0x6f8   :  { %8999 = vmatprep.subr.mxu1 %v9412_v23 }
 0x6f9   :  { %v9702_v16 = vpop.f32.mrf.mxu0 }
 0x6fa   :  { %8992 = vmatmul.mubr.msk.f32.vlgmr.msra.gmra.mxu1 %vm343_vm3, %v818_v15 }
 0x6fb   :  { %v8988_v17 = vpop.f32.mrf.mxu0  ;;  %9003 = vmatprep.mubr.msk.f32.mxu1 %vm9413_vm2, %v9412_v23  ;;  %9000 = vmatpush3.msra.mxu1 %v9721_v37 }
 0x6fc   :  { %9001 = vmatprep.subr.mxu1 %v9412_v23 }
 0x6fd   :  { %9002 = vmatpush3.msra.mxu1 %v9734_v46 }
 0x6fe   :  { %9011 = vmatprep.subr.mxu1 %v9412_v23 }
 0x7b6   :  { %v9709_v19 = vpop.f32.mrf.mxu1 }
 0x7b8   :  { %v8981_v20 = vpop.f32.mrf.mxu1 }
 0x7ba   :  { %v891_v21 = vpop.f32.mrf.mxu1 }
 0x7bb   :  { %v895_v22 = vmul.f32 0.25, %v891_v21 }
 0x7bc   :  { %v8993_v24 = vpop.f32.mrf.mxu1 }
 0x7bd   :  { %v896_v25 = vsel %vm419_vm4, %v895_v22, -inf }
 0x7be   :  { %897 = vmax.xlane.f32.xlu0 %v896_v25 }
 0x7d4   :  { %907 = vrot.lane.b32.xlu0 %v9642_v42, %s9417_s13 }
 0x7d8   :  { %1057 = vrot.lane.b32.xlu0 %v9625_v35, %s9419_s21 }
 0x847   :  { %v898_v26 = vpop.xlane.xlu0 %897 }
 0x848   :  { %v899_v29 = vsub.f32 %v895_v22, %v898_v26 }
 0x84a   :  { %v900_v32 = vmul.f32 1.442695, %v899_v29 }
 0x84b   :  { %v908_v33 = vpop.permute.xlu0 %907 }
 0x84c   :  { %9285 = vpow2.f32 %v900_v32  ;;  %8995 = vmatpush3.msra.mxu0 %v908_v33 }
 0x84d   :  { %9006 = vmatprep.subr.mxu0 %v9412_v23 }
 0x859   :  { %v9286_v34 = vpop.eup %9285 }
 0x85a   :  { %v902_v36 = vsel %vm419_vm4, %v9286_v34, 0.0 }
 0x85b   :  { %903 = vadd.xlane.f32.xlu1 %v902_v36 }
 0x86c   :  { %1059 = vrot.lane.b32.xlu1 %v9625_v35, %s9420_s27  ;;  %v1058_v35 = vpop.permute.xlu0 %1057 }
 0x8e4   :  { %v904_v41 = vpop.xlane.xlu1 %903 }
 0x8e5   :  { %9287 = vrcp.f32 %v904_v41 }
 0x8e8   :  { %v1060_v45 = vpop.permute.xlu1 %1059 }
 0x8f2   :  { %v9288_v43 = vpop.eup %9287 }
 0x8f3   :  { %v906_v44 = vmul.f32 %v9288_v43, %v9286_v34 }
 0x8f5   :  { %8997 = vmatmul.mubr.msk.f32.vlgmr.msra.gmra.mxu0 %vm419_vm4, %v906_v44 }
 0x8f6   :  { %9007 = vmatpush3.xpose.msk.msra.mxu0 %vm343_vm3, %v1060_v45  ;;  %9008 = vmatprep.mubr.msk.f32.mxu0 %vm9413_vm2, %v9412_v23 }
 0x8f7   :  { %9016 = vmatprep.subr.mxu0 %v9412_v23 }
 0x8f9   :  { %9009 = vmatmul.mubr.msk.f32.vlgmr.msra.gmra.mxu0 %vm343_vm3, %v1058_v35 }
 0x8fa   :  { %9020 = vmatprep.mubr.msk.f32.mxu0 %vm9413_vm2, %v9412_v23  ;;  %9017 = vmatpush3.msra.mxu0 %v9757_v62 }
 0x8fb   :  { %9018 = vmatprep.subr.mxu0 %v9412_v23 }
 0x8fc   :  { %9019 = vmatpush3.msra.mxu0 %v9760_v63 }
 0x8fd   :  { %9028 = vmatprep.subr.mxu0 %v9412_v23 }
 0x9b5   :  { %v979_v47 = vpop.f32.mrf.mxu0 }
 0x9b6   :  { %9004 = vmatmul.mubr.msk.f32.vlgmr.msra.gmra.mxu1 %vm343_vm3, %v979_v47 }
 0x9b7   :  { %v8998_v48 = vpop.f32.mrf.mxu0  ;;  %9013 = vmatprep.mubr.msk.f32.mxu1 %vm9413_vm2, %v9412_v23 }
 0x9b9   :  { %v1131_v49 = vpop.f32.mrf.mxu0 }
 0x9ba   :  { %v1135_v50 = vmul.f32 0.25, %v1131_v49 }
 0x9bb   :  { %v9010_v51 = vpop.f32.mrf.mxu0 }
 0x9bc   :  { %v1136_v52 = vsel %vm419_vm4, %v1135_v50, -inf }
 0x9bd   :  { %1137 = vmax.xlane.f32.xlu0 %v1136_v52 }
 0x9d3   :  { %1147 = vrot.lane.b32.xlu0 %v9642_v42, %s9419_s21  ;;  %v814_v42 = vadd.f32 %v9702_v16, %v9709_v19 }
 0x9d7   :  { %1462 = vrot.lane.b32.xlu0 %v9631_v38, %s9414_s0 }
 0x9db   :  { %1460 = vrot.lane.b32.xlu0 %v9631_v38, %s9416_s9 }
 0xa46   :  { %v1138_v53 = vpop.xlane.xlu0 %1137 }
 0xa47   :  { %v1139_v54 = vsub.f32 %v1135_v50, %v1138_v53 }
 0xa49   :  { %v1140_v55 = vmul.f32 1.442695, %v1139_v54 }
 0xa4a   :  { %v1148_v56 = vpop.permute.xlu0 %1147 }
 0xa4b   :  { %9289 = vpow2.f32 %v1140_v55  ;;  %9012 = vmatpush3.msra.mxu1 %v1148_v56 }
 0xa4c   :  { %9023 = vmatprep.subr.mxu1 %v9412_v23 }
 0xa4e   :  { %v1463_v6 = vpop.permute.xlu0 %1462 }
 0xa52   :  { %v1461_v7 = vpop.permute.xlu0 %1460 }
 0xa58   :  { %v9290_v57 = vpop.eup %9289 }
 0xa59   :  { %v1142_v58 = vsel %vm419_vm4, %v9290_v57, 0.0 }
 0xa5a   :  { %1143 = vadd.xlane.f32.xlu1 %v1142_v58 }
 0xa6b   :  { %1299 = vrot.lane.b32.xlu1 %v9631_v38, %s9415_s5 }
 0xa76   :  { %v1052_v59 = vpop.f32.mrf.mxu1 }
 0xa77   :  { %v9754_v60 = vadd.f32 %v1052_v59, %v814_v42 }
 0xa78   :  { %v9005_v61 = vpop.f32.mrf.mxu1 }
 0xae3   :  { %v1144_v0 = vpop.xlane.xlu1 %1143 }
 0xae4   :  { %9291 = vrcp.f32 %v1144_v0 }
 0xae7   :  { %v1300_v3 = vpop.permute.xlu1 %1299 }
 0xaf1   :  { %v9292_v1 = vpop.eup %9291 }
 0xaf2   :  { %v1146_v2 = vmul.f32 %v9292_v1, %v9290_v57 }
 0xaf4   :  { %9014 = vmatmul.mubr.msk.f32.vlgmr.msra.gmra.mxu1 %vm419_vm4, %v1146_v2 }
 0xaf5   :  { %9024 = vmatpush3.xpose.msk.msra.mxu1 %vm343_vm3, %v1300_v3  ;;  %9025 = vmatprep.mubr.msk.f32.mxu1 %vm9413_vm2, %v9412_v23 }
 0xaf6   :  { %9033 = vmatprep.subr.mxu1 %v9412_v23 }
 0xaf8   :  { %9026 = vmatmul.mubr.msk.f32.vlgmr.msra.gmra.mxu1 %vm343_vm3, %v9631_v38 }
 0xaf9   :  { %9034 = vmatpush3.xpose.msk.msra.mxu1 %vm343_vm3, %v1463_v6  ;;  %9035 = vmatprep.mubr.msk.f32.mxu1 %vm9413_vm2, %v9412_v23 }
 0xafa   :  { %9043 = vmatprep.subr.mxu1 %v9412_v23 }
 0xafc   :  { %9036 = vmatmul.mubr.msk.f32.vlgmr.msra.gmra.mxu1 %vm343_vm3, %v1461_v7 }
 0xafd   :  { %9044 = vmatpush3.msra.mxu1 %v9671_v4  ;;  %9047 = vmatprep.mubr.msk.f32.mxu1 %vm9413_vm2, %v9412_v23 }
 0xafe   :  { %9045 = vmatprep.subr.mxu1 %v9412_v23 }
 0xaff   :  { %9046 = vmatpush3.msra.mxu1 %v9674_v5 }
 0xb00   :  { %9057 = vmatprep.subr.mxu1 %v9412_v23 }
 0xbb4   :  { %v1219_v9 = vpop.f32.mrf.mxu1 }
 0xbb5   :  { %9021 = vmatmul.mubr.msk.f32.vlgmr.msra.gmra.mxu0 %vm343_vm3, %v1219_v9 }
 0xbb6   :  { %9029 = vmatpush3.msra.mxu0 %v9786_v8  ;;  %v9015_v12 = vpop.f32.mrf.mxu1  ;;  %9030 = vmatprep.mubr.msk.f32.mxu0 %vm9413_vm2, %v9412_v23 }
 0xbb7   :  { %9038 = vmatprep.subr.mxu0 %v9412_v23 }
 0xbb8   :  { %v1371_v4 = vpop.f32.mrf.mxu1 }
 0xbb9   :  { %v1375_v13 = vmul.f32 0.25, %v1371_v4 }
 0xbba   :  { %v9027_v5 = vpop.f32.mrf.mxu1 }
 0xbbb   :  { %v1376_v14 = vsel %vm419_vm4, %v1375_v13, -inf }
 0xbbc   :  { %1377 = vmax.xlane.f32.xlu0 %v1376_v14  ;;  %v1534_v15 = vpop.f32.mrf.mxu1 }
 0xbbd   :  { %v1538_v40 = vmul.f32 0.25, %v1534_v15 }
 0xbbe   :  { %v9037_v16 = vpop.f32.mrf.mxu1 }
 0xbbf   :  { %v1539_v17 = vsel %vm419_vm4, %v1538_v40, -inf }
 0xbc0   :  { %1540 = vmax.xlane.f32.xlu1 %v1539_v17 }
 0xbd1   :  { %1551 = vrot.lane.b32.xlu1 %v9786_v8, %s9416_s9 }
 0xbd5   :  { %1773 = vrot.lane.b32.xlu1 %v9631_v38, %s9417_s13 }
 0xc45   :  { %v1378_v18 = vpop.xlane.xlu0 %1377 }
 0xc46   :  { %v1379_v19 = vsub.f32 %v1375_v13, %v1378_v18  ;;  %v8133_v18 = vld [vmem:[%s9462_s29] ss:$0 sm:$0xff]  ;;  %s11314_s29 = sld [smem:[#allocation8_spill]] }
 0xc48   :  { %v1380_v20 = vmul.f32 1.442695, %v1379_v19 }
 0xc49   :  { %v1541_v21 = vpop.xlane.xlu1 %1540 }
 0xc4a   :  { %9293 = vpow2.f32 %v1380_v20  ;;  %v1542_v22 = vsub.f32 %v1538_v40, %v1541_v21 }
 0xc4c   :  { %v1543_v24 = vmul.f32 1.442695, %v1542_v22 }
 0xc4d   :  { %v1552_v35 = vpop.permute.xlu1 %1551 }
 0xc4e   :  { %9295 = vpow2.f32 %v1543_v24 }
 0xc57   :  { %v9294_v25 = vpop.eup %9293 }
 0xc58   :  { %v1382_v26 = vsel %vm419_vm4, %v9294_v25, 0.0 }
 0xc59   :  { %1383 = vadd.xlane.f32.xlu0 %v1382_v26 }
 0xc5b   :  { %v9296_v29 = vpop.eup %9295 }
 0xc5c   :  { %v1545_v32 = vsel %vm419_vm4, %v9296_v29, 0.0 }
 0xc5d   :  { %1546 = vadd.xlane.f32.xlu0 %v1545_v32 }
 0xc73   :  { %1775 = vrot.lane.b32.xlu0 %v9631_v38, %s9418_s17 }
 0xc75   :  { %v1292_v33 = vpop.f32.mrf.mxu0 }
 0xc76   :  { %v1296_v34 = vadd.f32 %v1292_v33, %v9754_v60 }
 0xc77   :  { %v9022_v36 = vpop.f32.mrf.mxu0 }
 0xc78   :  { %1297 = vst.msk [vmem:[#allocation2] sm:$0xff] %vm248_vm1, %v1296_v34 }
 0xc7f   :  { %v2254_v17 = vld [vmem:[#allocation2] sm:$0xff] }
 0xc80   :  { %v2263_v19 = vadd.f32 %v8133_v18, %v2254_v17 }
 0xc82   :  { %v2265_v22 = vadd.f32 %v2263_v19, %v9605_v27 }
 0xc84   :  { %v2269_v24 = vsel %vm248_vm1, %v2265_v22, 0.0 }
 0xce2   :  { %v1384_v41 = vpop.xlane.xlu0 %1383 }
 0xce3   :  { %9297 = vrcp.f32 %v1384_v41 }
 0xce6   :  { %v1547_v43 = vpop.xlane.xlu0 %1546 }
 0xce7   :  { %9299 = vrcp.f32 %v1547_v43 }
 0xcea   :  { %v1776_v52 = vpop.permute.xlu0 %1775 }
 0xcf0   :  { %v9298_v44 = vpop.eup %9297 }
 0xcf1   :  { %v1386_v45 = vmul.f32 %v9298_v44, %v9294_v25 }
 0xcf3   :  { %9031 = vmatmul.mubr.msk.f32.vlgmr.msra.gmra.mxu0 %vm419_vm4, %v1386_v45 }
 0xcf4   :  { %v9300_v47 = vpop.eup %9299  ;;  %9039 = vmatpush3.msra.mxu0 %v1552_v35  ;;  %9040 = vmatprep.mubr.msk.f32.mxu0 %vm9413_vm2, %v9412_v23 }
 0xcf5   :  { %v1549_v48 = vmul.f32 %v9300_v47, %v9296_v29  ;;  %9050 = vmatprep.subr.mxu0 %v9412_v23 }
 0xcf7   :  { %9041 = vmatmul.mubr.msk.f32.vlgmr.msra.gmra.mxu0 %vm419_vm4, %v1549_v48 }
 0xcf8   :  { %9051 = vmatpush3.msra.mxu0 %v9682_v10  ;;  %9054 = vmatprep.mubr.msk.f32.mxu0 %vm9413_vm2, %v9412_v23 }
 0xcf9   :  { %9052 = vmatprep.subr.mxu0 %v9412_v23 }
 0xcfa   :  { %9053 = vmatpush3.msra.mxu0 %v9686_v11  ;;  %v1774_v11 = vpop.permute.xlu1 %1773 }
 0xcfb   :  { %9062 = vmatprep.subr.mxu0 %v9412_v23 }
 0xdb3   :  { %v1456_v49 = vpop.f32.mrf.mxu0 }
 0xdb4   :  { %9055 = vmatmul.mubr.msk.f32.vlgmr.msra.gmra.mxu0 %vm343_vm3, %v1456_v49 }
 0xdb5   :  { %v9032_v50 = vpop.f32.mrf.mxu0  ;;  %9064 = vmatprep.mubr.msk.f32.mxu0 %vm9413_vm2, %v9412_v23 }
 0xdb7   :  { %v1623_v51 = vpop.f32.mrf.mxu0 }
 0xdb8   :  { %9048 = vmatmul.mubr.msk.f32.vlgmr.msra.gmra.mxu1 %vm343_vm3, %v1623_v51 }
 0xdb9   :  { %9058 = vmatpush3.xpose.msk.msra.mxu1 %vm343_vm3, %v1776_v52  ;;  %v9042_v10 = vpop.f32.mrf.mxu0  ;;  %9059 = vmatprep.mubr.msk.f32.mxu1 %vm9413_vm2, %v9412_v23 }
 0xdba   :  { %9067 = vmatprep.subr.mxu1 %v9412_v23  ;;  %v2425_v10 = vld [vmem:[%s9477_s14 + $0x388] sm:$0xff] }
 0xdbc   :  { %9060 = vmatmul.mubr.msk.f32.vlgmr.msra.gmra.mxu1 %vm343_vm3, %v1774_v11  ;;  %v2427_v11 = vld [vmem:[%s9477_s14 + $0x398] sm:$0xff] }
 0xdbd   :  { %9068 = vmatpush3.msra.mxu1 %v9721_v37  ;;  %9071 = vmatprep.mubr.msk.f32.mxu1 %vm9413_vm2, %v9412_v23 }
 0xdbe   :  { %9069 = vmatprep.subr.mxu1 %v9412_v23 }
 0xdbf   :  { %9070 = vmatpush3.msra.mxu1 %v9734_v46 }
 0xdc0   :  { %9079 = vmatprep.subr.mxu1 %v9412_v23 }
 0xe74   :  { %v1769_v53 = vpop.f32.mrf.mxu0 }
 0xe76   :  { %v9056_v54 = vpop.f32.mrf.mxu0 }
 0xe77   :  { %v2409_v54 = vld [vmem:[%s9477_s14 + $0x308] sm:$0xff] }
 0xe78   :  { %v1696_v55 = vpop.f32.mrf.mxu1 }
 0xe79   :  { %v1770_v56 = vadd.f32 %v1769_v53, %v1696_v55  ;;  %v2426_v53 = vld [vmem:[%s9477_s14 + $0x390] sm:$0xff]  ;;  %v2411_v55 = vld [vmem:[%s9477_s14 + $0x318] sm:$0xff] }
 0xe7a   :  { %v9049_v57 = vpop.f32.mrf.mxu1 }
 0xe7b   :  { %v2410_v57 = vld [vmem:[%s9477_s14 + $0x310] sm:$0xff] }
 0xe7c   :  { %v1847_v58 = vpop.f32.mrf.mxu1 }
 0xe7d   :  { %v1851_v42 = vmul.f32 0.25, %v1847_v58  ;;  %v2393_v58 = vld [vmem:[%s9477_s14 + $0x288] sm:$0xff] }
 0xe7e   :  { %v9061_v59 = vpop.f32.mrf.mxu1 }
 0xe7f   :  { %v1852_v60 = vsel %vm419_vm4, %v1851_v42, -inf  ;;  %v2392_v59 = vld [vmem:[%s9477_s14 + $0x280] sm:$0xff] }
 0xe80   :  { %1853 = vmax.xlane.f32.xlu1 %v1852_v60  ;;  %v2394_v60 = vld [vmem:[%s9477_s14 + $0x290] sm:$0xff] }
 0xe91   :  { %2015 = vrot.lane.b32.xlu1 %v9631_v38, %s9420_s27 }
 0xe95   :  { %2013 = vrot.lane.b32.xlu1 %v9631_v38, %s9419_s21 }
 0xf09   :  { %v1854_v37 = vpop.xlane.xlu1 %1853 }
 0xf0a   :  { %v1855_v46 = vsub.f32 %v1851_v42, %v1854_v37  ;;  %v2395_v42 = vld [vmem:[%s9477_s14 + $0x298] sm:$0xff]  ;;  %v2377_v37 = vld [vmem:[%s9477_s14 + $0x208] sm:$0xff] }
 0xf0c   :  { %v1856_v61 = vmul.f32 1.442695, %v1855_v46  ;;  %v2379_v46 = vld [vmem:[%s9477_s14 + $0x218] sm:$0xff] }
 0xf0d   :  { %v2016_v7 = vpop.permute.xlu1 %2015 }
 0xf0e   :  { %9301 = vpow2.f32 %v1856_v61  ;;  %v2376_v61 = vld [vmem:[%s9477_s14 + $0x200] sm:$0xff] }
 0xf11   :  { %v2014_v9 = vpop.permute.xlu1 %2013 }
 0xf1b   :  { %v9302_v0 = vpop.eup %9301 }
 0xf1c   :  { %v1858_v1 = vsel %vm419_vm4, %v9302_v0, 0.0 }
 0xf1d   :  { %1859 = vadd.xlane.f32.xlu0 %v1858_v1  ;;  %v2361_v1 = vld [vmem:[%s9477_s14 + $0x188] sm:$0xff] }
 0xf33   :  { %1863 = vrot.lane.b32.xlu0 %v9786_v8, %s9417_s13 }
 0xfa6   :  { %v1860_v2 = vpop.xlane.xlu0 %1859 }
 0xfa7   :  { %9303 = vrcp.f32 %v1860_v2  ;;  %v2363_v2 = vld [vmem:[%s9477_s14 + $0x198] sm:$0xff] }
 0xfaa   :  { %v1864_v3 = vpop.permute.xlu0 %1863 }
 0xfab   :  { %9063 = vmatpush3.msra.mxu0 %v1864_v3  ;;  %v2360_v3 = vld [vmem:[%s9477_s14 + $0x180] sm:$0xff] }
 0xfac   :  { %9074 = vmatprep.subr.mxu0 %v9412_v23 }
 0xfb4   :  { %v9304_v6 = vpop.eup %9303 }
 0xfb5   :  { %v1862_v38 = vmul.f32 %v9304_v6, %v9302_v0  ;;  %v2378_v0 = vld [vmem:[%s9477_s14 + $0x210] sm:$0xff] }
 0xfb6   :  { %v2362_v6 = vld [vmem:[%s9477_s14 + $0x190] sm:$0xff] }
 0xfb7   :  { %9065 = vmatmul.mubr.msk.f32.vlgmr.msra.gmra.mxu0 %vm419_vm4, %v1862_v38  ;;  %v2347_v38 = vld [vmem:[%s9477_s14 + $0x118] sm:$0xff] }
 0xfb8   :  { %9075 = vmatpush3.xpose.msk.msra.mxu0 %vm343_vm3, %v2016_v7  ;;  %9076 = vmatprep.mubr.msk.f32.mxu0 %vm9413_vm2, %v9412_v23  ;;  %v2345_v7 = vld [vmem:[%s9477_s14 + $0x108] sm:$0xff] }
 0xfb9   :  { %9084 = vmatprep.subr.mxu0 %v9412_v23 }
 0xfbb   :  { %9077 = vmatmul.mubr.msk.f32.vlgmr.msra.gmra.mxu0 %vm343_vm3, %v2014_v9  ;;  %v2344_v9 = vld [vmem:[%s9477_s14 + $0x100] sm:$0xff] }
 0xfbc   :  { %9085 = vmatpush3.msra.mxu0 %v9757_v62  ;;  %9088 = vmatprep.mubr.msk.f32.mxu0 %vm9413_vm2, %v9412_v23 }
 0xfbd   :  { %9086 = vmatprep.subr.mxu0 %v9412_v23 }
 0xfbe   :  { %9087 = vmatpush3.msra.mxu0 %v9760_v63 }
 0xfbf   :  { %2623 = vmatprep.subr.mxu0 %v2427_v11  ;;  %v2382_v11 = vld [vmem:[%s9477_s14 + $0x230] sm:$0xff] }
0x1077   :  { %v1935_v12 = vpop.f32.mrf.mxu0 }
0x1078   :  { %9072 = vmatmul.mubr.msk.f32.vlgmr.msra.gmra.mxu1 %vm343_vm3, %v1935_v12  ;;  %v2346_v12 = vld [vmem:[%s9477_s14 + $0x110] sm:$0xff] }
0x1079   :  { %v9066_v4 = vpop.f32.mrf.mxu0  ;;  %9081 = vmatprep.mubr.msk.f32.mxu1 %vm9413_vm2, %v9412_v23 }
0x107a   :  { %v2329_v4 = vld [vmem:[%s9477_s14 + $0x88] sm:$0xff] }
0x107b   :  { %v2087_v13 = vpop.f32.mrf.mxu0 }
0x107c   :  { %v2091_v5 = vmul.f32 0.25, %v2087_v13  ;;  %v2331_v13 = vld [vmem:[%s9477_s14 + $0x98] sm:$0xff] }
0x107d   :  { %v9078_v14 = vpop.f32.mrf.mxu0 }
0x107e   :  { %v2092_v62 = vsel %vm419_vm4, %v2091_v5, -inf  ;;  %v2330_v14 = vld [vmem:[%s9477_s14 + $0x90] sm:$0xff] }
0x107f   :  { %2093 = vmax.xlane.f32.xlu0 %v2092_v62  ;;  %v2313_v62 = vld [vmem:[%s9477_s14 + $0x8] sm:$0xff] }
0x1095   :  { %2103 = vrot.lane.b32.xlu0 %v9786_v8, %s9419_s21 }
0x1108   :  { %v2094_v15 = vpop.xlane.xlu0 %2093 }
0x1109   :  { %v2095_v40 = vsub.f32 %v2091_v5, %v2094_v15  ;;  %v2328_v5 = vld [vmem:[%s9477_s14 + $0x80] sm:$0xff]  ;;  %v2315_v15 = vld [vmem:[%s9477_s14 + $0x18] sm:$0xff] }
0x110b   :  { %v2096_v63 = vmul.f32 1.442695, %v2095_v40  ;;  %v2312_v40 = vld [vmem:[%s9477_s14] sm:$0xff] }
0x110c   :  { %v2104_v16 = vpop.permute.xlu0 %2103 }
0x110d   :  { %9305 = vpow2.f32 %v2096_v63  ;;  %9080 = vmatpush3.msra.mxu1 %v2104_v16  ;;  %v2314_v63 = vld [vmem:[%s9477_s14 + $0x10] sm:$0xff] }
0x110e   :  { %2546 = vmatprep.subr.mxu1 %v2425_v10  ;;  %v2380_v10 = vld [vmem:[%s9477_s14 + $0x220] sm:$0xff] }
0x111a   :  { %v9306_v20 = vpop.eup %9305 }
0x111b   :  { %v2098_v21 = vsel %vm419_vm4, %v9306_v20, 0.0 }
0x111c   :  { %2099 = vadd.xlane.f32.xlu1 %v2098_v21 }
0x1120   :  { %2270 = vadd.xlane.f32.xlu1 %v2269_v24 }
0x1138   :  { %v2008_v25 = vpop.f32.mrf.mxu1 }
0x1139   :  { %v2012_v8 = vadd.f32 %v2008_v25, %v1770_v56  ;;  %v2408_v56 = vld [vmem:[%s9477_s14 + $0x300] sm:$0xff] }
0x113a   :  { %v9073_v26 = vpop.f32.mrf.mxu1 }
0x11a5   :  { %v2100_v29 = vpop.xlane.xlu1 %2099 }
0x11a6   :  { %9307 = vrcp.f32 %v2100_v29  ;;  %v9919_v29 = vld [vmem:[%s9472_s8] ss:$0 sm:$0xff]  ;;  %s11316_s8 = sld [smem:[#allocation10_spill]] }
0x11a9   :  { %v2271_v44 = vpop.xlane.xlu1 %2270 }
0x11aa   :  { %v2276_v45 = vmul.f32 0.015625, %v2271_v44  ;;  %v2415_v44 = vld [vmem:[%s9477_s14 + $0x338] sm:$0xff] }
0x11ac   :  { %v9866_v47 = vsub.f32 %v2265_v22, %v2276_v45  ;;  %v2412_v45 = vld [vmem:[%s9477_s14 + $0x320] sm:$0xff] }
0x11ae   :  { %v2280_v51 = vmul.f32 %v9866_v47, %v9866_v47 }
0x11b0   :  { %v2282_v52 = vsel %vm248_vm1, %v2280_v51, 0.0  ;;  %v2381_v51 = vld [vmem:[%s9477_s14 + $0x228] sm:$0xff] }
0x11b3   :  { %v9308_v32 = vpop.eup %9307 }
0x11b4   :  { %v2102_v33 = vmul.f32 %v9308_v32, %v9306_v20 }
0x11b6   :  { %9082 = vmatmul.mubr.msk.f32.vlgmr.msra.gmra.mxu1 %vm419_vm4, %v2102_v33 }
0x11b7   :  { %2594 = vmatprep.mubr.f32.mxu1 %v9412_v23 }
0x1276   :  { %v2175_v34 = vpop.f32.mrf.mxu1 }
0x1277   :  { %9089 = vmatmul.mubr.msk.f32.vlgmr.msra.gmra.mxu0 %vm343_vm3, %v2175_v34  ;;  %v2429_v34 = vld [vmem:[%s9477_s14 + $0x3a8] sm:$0xff] }
0x1278   :  { %v9083_v36 = vpop.f32.mrf.mxu1  ;;  %2671 = vmatprep.mubr.f32.mxu0 %v9412_v23  ;;  %2624 = vmatpush1.msra.mxu0 %v2426_v53  ;;  %v2367_v53 = vld [vmem:[%s9477_s14 + $0x1b8] sm:$0xff] }
0x1279   :  { %2625 = vmatprep.subr.mxu0 %v2411_v55  ;;  %v2431_v36 = vld [vmem:[%s9477_s14 + $0x3b8] sm:$0xff]  ;;  %v2366_v55 = vld [vmem:[%s9477_s14 + $0x1b0] sm:$0xff] }
0x127a   :  { %2626 = vmatpush1.msra.mxu0 %v2410_v57  ;;  %v2351_v57 = vld [vmem:[%s9477_s14 + $0x138] sm:$0xff] }
0x127b   :  { %2627 = vmatprep.subr.mxu0 %v2395_v42  ;;  %v2350_v42 = vld [vmem:[%s9477_s14 + $0x130] sm:$0xff] }
0x127c   :  { %2628 = vmatpush1.msra.mxu0 %v2394_v60  ;;  %v2335_v60 = vld [vmem:[%s9477_s14 + $0xb8] sm:$0xff] }
0x127d   :  { %2629 = vmatprep.subr.mxu0 %v2379_v46  ;;  %v2334_v46 = vld [vmem:[%s9477_s14 + $0xb0] sm:$0xff] }
0x127e   :  { %2630 = vmatpush1.msra.mxu0 %v2378_v0  ;;  %v2319_v0 = vld [vmem:[%s9477_s14 + $0x38] sm:$0xff] }
0x127f   :  { %2631 = vmatprep.subr.mxu0 %v2363_v2  ;;  %v2318_v2 = vld [vmem:[%s9477_s14 + $0x30] sm:$0xff] }
0x1280   :  { %2632 = vmatpush1.msra.mxu0 %v2362_v6  ;;  %v2435_v6 = vld [vmem:[%s9477_s14 + $0x3d8] sm:$0xff] }
0x1281   :  { %2633 = vmatprep.subr.mxu0 %v2347_v38 }
0x1282   :  { %2634 = vmatpush1.msra.mxu0 %v2346_v12 }
0x1283   :  { %2635 = vmatprep.subr.mxu0 %v2331_v13 }
0x1284   :  { %2636 = vmatpush1.msra.mxu0 %v2330_v14  ;;  %v2432_v14 = vld [vmem:[%s9477_s14 + $0x3c0] sm:$0xff] }
0x1285   :  { %2637 = vmatprep.subr.mxu0 %v2315_v15  ;;  %v2417_v15 = vld [vmem:[%s9477_s14 + $0x348] sm:$0xff] }
0x1286   :  { %2638 = vmatpush1.msra.mxu0 %v2314_v63  ;;  %v2416_v63 = vld [vmem:[%s9477_s14 + $0x340] sm:$0xff] }
0x1287   :  { %2777 = vmatprep.subr.mxu0 %v2431_v36  ;;  %v2355_v36 = vld [vmem:[%s9477_s14 + $0x158] sm:$0xff] }
0x1337   :  { %v2248_v27 = vpop.f32.mrf.mxu0 }
0x1338   :  { %v2252_v41 = vadd.f32 %v2248_v27, %v2012_v8  ;;  %v9915_v8 = vld [vmem:[%s9467_s3] ss:$0 sm:$0xff]  ;;  %s11315_s3 = sld [smem:[#allocation9_spill]] }
0x1339   :  { %v9090_v43 = vpop.f32.mrf.mxu0  ;;  %v2428_v27 = vld [vmem:[%s9477_s14 + $0x3a0] sm:$0xff] }
0x133a   :  { %2253 = vst.msk [vmem:[#allocation2 + $0x8] sm:$0xff] %vm248_vm1, %v2252_v41  ;;  %v2430_v41 = vld [vmem:[%s9477_s14 + $0x3b0] sm:$0xff]  ;;  %v2413_v43 = vld [vmem:[%s9477_s14 + $0x328] sm:$0xff] }
0x1341   :  { %v2255_v35 = vld [vmem:[#allocation2 + $0x8] sm:$0xff] }
0x1342   :  { %v2264_v48 = vadd.f32 %v8133_v18, %v2255_v35  ;;  %v2414_v35 = vld [vmem:[%s9477_s14 + $0x330] sm:$0xff] }
0x1344   :  { %v9869_v49 = vadd.f32 %v2264_v48, %v9610_v28  ;;  %v2424_v28 = vld [vmem:[%s9477_s14 + $0x380] sm:$0xff]  ;;  %v2399_v48 = vld [vmem:[%s9477_s14 + $0x2b8] sm:$0xff] }
0x1345   :  { %2547 = vmatpush1.msra.mxu1 %v2424_v28  ;;  %v2365_v28 = vld [vmem:[%s9477_s14 + $0x1a8] sm:$0xff] }
0x1346   :  { %v2272_v50 = vsel %vm248_vm1, %v9869_v49, 0.0  ;;  %2548 = vmatprep.subr.mxu1 %v2409_v54  ;;  %v2364_v54 = vld [vmem:[%s9477_s14 + $0x1a0] sm:$0xff] }
0x1347   :  { %2273 = vadd.xlane.f32.xlu1 %v2272_v50  ;;  %2549 = vmatpush1.msra.mxu1 %v2408_v56  ;;  %v2398_v50 = vld [vmem:[%s9477_s14 + $0x2b0] sm:$0xff]  ;;  %v2349_v56 = vld [vmem:[%s9477_s14 + $0x128] sm:$0xff] }
0x1348   :  { %2550 = vmatprep.subr.mxu1 %v2393_v58  ;;  %v2348_v58 = vld [vmem:[%s9477_s14 + $0x120] sm:$0xff] }
0x1349   :  { %2551 = vmatpush1.msra.mxu1 %v2392_v59  ;;  %v2333_v59 = vld [vmem:[%s9477_s14 + $0xa8] sm:$0xff] }
0x134a   :  { %2552 = vmatprep.subr.mxu1 %v2377_v37  ;;  %v2332_v37 = vld [vmem:[%s9477_s14 + $0xa0] sm:$0xff] }
0x134b   :  { %2283 = vadd.xlane.f32.xlu1 %v2282_v52  ;;  %2553 = vmatpush1.msra.mxu1 %v2376_v61  ;;  %v2383_v52 = vld [vmem:[%s9477_s14 + $0x238] sm:$0xff]  ;;  %v2317_v61 = vld [vmem:[%s9477_s14 + $0x28] sm:$0xff] }
0x134c   :  { %2554 = vmatprep.subr.mxu1 %v2361_v1  ;;  %v2316_v1 = vld [vmem:[%s9477_s14 + $0x20] sm:$0xff] }
0x134d   :  { %2555 = vmatpush1.msra.mxu1 %v2360_v3  ;;  %v2433_v3 = vld [vmem:[%s9477_s14 + $0x3c8] sm:$0xff] }
0x134e   :  { %2556 = vmatprep.subr.mxu1 %v2345_v7 }
0x134f   :  { %2557 = vmatpush1.msra.mxu1 %v2344_v9 }
0x1350   :  { %2558 = vmatprep.subr.mxu1 %v2329_v4 }
0x1351   :  { %2559 = vmatpush1.msra.mxu1 %v2328_v5 }
0x1352   :  { %2560 = vmatprep.subr.mxu1 %v2313_v62  ;;  %v2434_v62 = vld [vmem:[%s9477_s14 + $0x3d0] sm:$0xff] }
0x1353   :  { %2561 = vmatpush1.msra.mxu1 %v2312_v40  ;;  %v2419_v40 = vld [vmem:[%s9477_s14 + $0x358] sm:$0xff] }
0x1354   :  { %2700 = vmatprep.subr.mxu1 %v2429_v34  ;;  %v2353_v34 = vld [vmem:[%s9477_s14 + $0x148] sm:$0xff] }
0x13d0   :  { %v2274_v16 = vpop.xlane.xlu1 %2273 }
0x13d1   :  { %v2277_v17 = vmul.f32 0.015625, %v2274_v16  ;;  %v2418_v16 = vld [vmem:[%s9477_s14 + $0x350] sm:$0xff] }
0x13d3   :  { %v9909_v18 = vsub.f32 %v9869_v49, %v2277_v17  ;;  %v2396_v49 = vld [vmem:[%s9477_s14 + $0x2a0] sm:$0xff]  ;;  %v2401_v17 = vld [vmem:[%s9477_s14 + $0x2c8] sm:$0xff] }
0x13d4   :  { %v2284_v19 = vpop.xlane.xlu1 %2283 }
0x13d5   :  { %v2288_v20 = vmul.f32 0.015625, %v2284_v19  ;;  %v2281_v21 = vmul.f32 %v9909_v18, %v9909_v18  ;;  %v2400_v19 = vld [vmem:[%s9477_s14 + $0x2c0] sm:$0xff] }
0x13d7   :  { %v2290_v22 = vadd.f32 1e-05, %v2288_v20  ;;  %v2285_v24 = vsel %vm248_vm1, %v2281_v21, 0.0  ;;  %v2402_v20 = vld [vmem:[%s9477_s14 + $0x2d0] sm:$0xff]  ;;  %v2385_v21 = vld [vmem:[%s9477_s14 + $0x248] sm:$0xff] }
0x13d8   :  { %2286 = vadd.xlane.f32.xlu1 %v2285_v24  ;;  %v2384_v24 = vld [vmem:[%s9477_s14 + $0x240] sm:$0xff] }
0x13d9   :  { %9309 = vrsqrt.f32 %v2290_v22  ;;  %v2387_v22 = vld [vmem:[%s9477_s14 + $0x258] sm:$0xff] }
0x13e6   :  { %v9310_v25 = vpop.eup %9309 }
0x13e7   :  { %v2294_v26 = vmul.f32 %v9310_v25, %v9866_v47  ;;  %v2397_v47 = vld [vmem:[%s9477_s14 + $0x2a8] sm:$0xff]  ;;  %v2386_v25 = vld [vmem:[%s9477_s14 + $0x250] sm:$0xff] }
0x13e9   :  { %v2302_v32 = vmul.f32 %v9915_v8, %v2294_v26  ;;  %v2371_v26 = vld [vmem:[%s9477_s14 + $0x1d8] sm:$0xff] }
0x13eb   :  { %v9923_v33 = vadd.f32 %v9919_v29, %v2302_v32  ;;  %v2370_v32 = vld [vmem:[%s9477_s14 + $0x1d0] sm:$0xff] }
0x13ed   :  { %8136 = vmatmul.mubr.msk.f32.vlgmr.msra.gmra.mxu1 %vm248_vm1, %v9923_v33  ;;  %8138 = vmatmul.mubr.msk.f32.vlgmr.msra.gmra.mxu0 %vm248_vm1, %v9923_v33 }
0x13ee   :  { %2701 = vmatpush1.msra.mxu1 %v2428_v27  ;;  %2778 = vmatpush1.msra.mxu0 %v2430_v41  ;;  %v2352_v27 = vld [vmem:[%s9477_s14 + $0x140] sm:$0xff]  ;;  %v2354_v41 = vld [vmem:[%s9477_s14 + $0x150] sm:$0xff] }
0x13ef   :  { %2702 = vmatprep.subr.mxu1 %v2413_v43  ;;  %2779 = vmatprep.subr.mxu0 %v2415_v44  ;;  %v2337_v43 = vld [vmem:[%s9477_s14 + $0xc8] sm:$0xff]  ;;  %v2339_v44 = vld [vmem:[%s9477_s14 + $0xd8] sm:$0xff] }
0x13f0   :  { %2703 = vmatpush1.msra.mxu1 %v2412_v45  ;;  %2780 = vmatpush1.msra.mxu0 %v2414_v35  ;;  %v2336_v45 = vld [vmem:[%s9477_s14 + $0xc0] sm:$0xff]  ;;  %v2338_v35 = vld [vmem:[%s9477_s14 + $0xd0] sm:$0xff] }
0x13f1   :  { %2704 = vmatprep.subr.mxu1 %v2397_v47  ;;  %2781 = vmatprep.subr.mxu0 %v2399_v48  ;;  %v2321_v47 = vld [vmem:[%s9477_s14 + $0x48] sm:$0xff]  ;;  %v2323_v48 = vld [vmem:[%s9477_s14 + $0x58] sm:$0xff] }
0x13f2   :  { %2705 = vmatpush1.msra.mxu1 %v2396_v49  ;;  %2782 = vmatpush1.msra.mxu0 %v2398_v50  ;;  %v2320_v49 = vld [vmem:[%s9477_s14 + $0x40] sm:$0xff]  ;;  %v2322_v50 = vld [vmem:[%s9477_s14 + $0x50] sm:$0xff] }
0x13f3   :  { %2706 = vmatprep.subr.mxu1 %v2381_v51  ;;  %2783 = vmatprep.subr.mxu0 %v2383_v52  ;;  %v2437_v51 = vld [vmem:[%s9477_s14 + $0x3e8] sm:$0xff]  ;;  %v2439_v52 = vld [vmem:[%s9477_s14 + $0x3f8] sm:$0xff] }
0x13f4   :  { %2707 = vmatpush1.msra.mxu1 %v2380_v10  ;;  %2784 = vmatpush1.msra.mxu0 %v2382_v11  ;;  %v2436_v10 = vld [vmem:[%s9477_s14 + $0x3e0] sm:$0xff]  ;;  %v2438_v11 = vld [vmem:[%s9477_s14 + $0x3f0] sm:$0xff] }
0x13f5   :  { %2708 = vmatprep.subr.mxu1 %v2365_v28  ;;  %2785 = vmatprep.subr.mxu0 %v2367_v53  ;;  %v2421_v28 = vld [vmem:[%s9477_s14 + $0x368] sm:$0xff]  ;;  %v2423_v53 = vld [vmem:[%s9477_s14 + $0x378] sm:$0xff] }
0x13f6   :  { %2709 = vmatpush1.msra.mxu1 %v2364_v54  ;;  %2786 = vmatpush1.msra.mxu0 %v2366_v55  ;;  %v2420_v54 = vld [vmem:[%s9477_s14 + $0x360] sm:$0xff]  ;;  %v2422_v55 = vld [vmem:[%s9477_s14 + $0x370] sm:$0xff] }
0x13f7   :  { %2710 = vmatprep.subr.mxu1 %v2349_v56  ;;  %2787 = vmatprep.subr.mxu0 %v2351_v57  ;;  %v2405_v56 = vld [vmem:[%s9477_s14 + $0x2e8] sm:$0xff]  ;;  %v2407_v57 = vld [vmem:[%s9477_s14 + $0x2f8] sm:$0xff] }
0x13f8   :  { %2711 = vmatpush1.msra.mxu1 %v2348_v58  ;;  %2788 = vmatpush1.msra.mxu0 %v2350_v42  ;;  %v2404_v58 = vld [vmem:[%s9477_s14 + $0x2e0] sm:$0xff]  ;;  %v2406_v42 = vld [vmem:[%s9477_s14 + $0x2f0] sm:$0xff] }
0x13f9   :  { %2600 = vmatprep.mubr.f32.mxu1 %v9412_v23  ;;  %2677 = vmatprep.mubr.f32.mxu0 %v9412_v23 }
0x13fa   :  { %2712 = vmatprep.subr.mxu1 %v2333_v59  ;;  %2789 = vmatprep.subr.mxu0 %v2335_v60  ;;  %v2389_v59 = vld [vmem:[%s9477_s14 + $0x268] sm:$0xff]  ;;  %v2391_v60 = vld [vmem:[%s9477_s14 + $0x278] sm:$0xff] }
0x13fb   :  { %2713 = vmatpush1.msra.mxu1 %v2332_v37  ;;  %2790 = vmatpush1.msra.mxu0 %v2334_v46  ;;  %v2388_v37 = vld [vmem:[%s9477_s14 + $0x260] sm:$0xff]  ;;  %v2390_v46 = vld [vmem:[%s9477_s14 + $0x270] sm:$0xff] }
0x13fc   :  { %2714 = vmatprep.subr.mxu1 %v2317_v61  ;;  %2791 = vmatprep.subr.mxu0 %v2319_v0  ;;  %v2373_v61 = vld [vmem:[%s9477_s14 + $0x1e8] sm:$0xff]  ;;  %v2375_v0 = vld [vmem:[%s9477_s14 + $0x1f8] sm:$0xff] }
0x13fd   :  { %2715 = vmatpush1.msra.mxu1 %v2316_v1  ;;  %2792 = vmatpush1.msra.mxu0 %v2318_v2  ;;  %v2372_v1 = vld [vmem:[%s9477_s14 + $0x1e0] sm:$0xff]  ;;  %v2374_v2 = vld [vmem:[%s9477_s14 + $0x1f0] sm:$0xff] }
0x13fe   :  { %2854 = vmatprep.subr.mxu1 %v2433_v3  ;;  %2931 = vmatprep.subr.mxu0 %v2435_v6  ;;  %v2357_v3 = vld [vmem:[%s9477_s14 + $0x168] sm:$0xff]  ;;  %v2359_v6 = vld [vmem:[%s9477_s14 + $0x178] sm:$0xff] }
0x1461   :  { %v2287_v7 = vpop.xlane.xlu1 %2286 }
0x1462   :  { %v2289_v38 = vmul.f32 0.015625, %v2287_v7  ;;  %v2356_v7 = vld [vmem:[%s9477_s14 + $0x160] sm:$0xff] }
0x1464   :  { %v2291_v9 = vadd.f32 1e-05, %v2289_v38  ;;  %v2358_v38 = vld [vmem:[%s9477_s14 + $0x170] sm:$0xff] }
0x1466   :  { %9311 = vrsqrt.f32 %v2291_v9  ;;  %v2341_v9 = vld [vmem:[%s9477_s14 + $0xe8] sm:$0xff] }
0x1473   :  { %v9312_v12 = vpop.eup %9311 }
0x1474   :  { %v2295_v4 = vmul.f32 %v9312_v12, %v9909_v18  ;;  %v2403_v18 = vld [vmem:[%s9477_s14 + $0x2d8] sm:$0xff] }
0x1475   :  { %v2343_v12 = vld [vmem:[%s9477_s14 + $0xf8] sm:$0xff] }
0x1476   :  { %v2303_v13 = vmul.f32 %v9915_v8, %v2295_v4  ;;  %v2369_v8 = vld [vmem:[%s9477_s14 + $0x1c8] sm:$0xff]  ;;  %v2340_v4 = vld [vmem:[%s9477_s14 + $0xe0] sm:$0xff] }
0x1478   :  { %v9968_v5 = vadd.f32 %v9919_v29, %v2303_v13  ;;  %v2368_v29 = vld [vmem:[%s9477_s14 + $0x1c0] sm:$0xff]  ;;  %v2342_v13 = vld [vmem:[%s9477_s14 + $0xf0] sm:$0xff] }
0x147a   :  { %8137 = vmatmul.mubr.msk.f32.gmra.mxu1 %vm248_vm1, %v9968_v5  ;;  %8139 = vmatmul.mubr.msk.f32.gmra.mxu0 %vm248_vm1, %v9968_v5 }
0x147b   :  { %2748 = vmatprep.mubr.f32.mxu1 %v9412_v23  ;;  %2825 = vmatprep.mubr.f32.mxu0 %v9412_v23 }
0x147e   :  { %8140 = vmatmul.mubr.msk.f32.vlgmr.msra.gmra.mxu1 %vm248_vm1, %v9923_v33  ;;  %8142 = vmatmul.mubr.msk.f32.vlgmr.msra.gmra.mxu0 %vm248_vm1, %v9923_v33 }
0x147f   :  { %2855 = vmatpush1.msra.mxu1 %v2432_v14  ;;  %2932 = vmatpush1.msra.mxu0 %v2434_v62  ;;  %v2325_v14 = vld [vmem:[%s9477_s14 + $0x68] sm:$0xff]  ;;  %v2327_v62 = vld [vmem:[%s9477_s14 + $0x78] sm:$0xff] }
0x1480   :  { %2856 = vmatprep.subr.mxu1 %v2417_v15  ;;  %2933 = vmatprep.subr.mxu0 %v2419_v40  ;;  %v2324_v15 = vld [vmem:[%s9477_s14 + $0x60] sm:$0xff]  ;;  %v2326_v40 = vld [vmem:[%s9477_s14 + $0x70] sm:$0xff]  ;;  %s11317_s14 = sld [smem:[#allocation11_spill]] }
0x1481   :  { %2857 = vmatpush1.msra.mxu1 %v2416_v63  ;;  %2934 = vmatpush1.msra.mxu0 %v2418_v16  ;;  %v3209_v63 = vld [vmem:[%s9487_s24 + $0xf8] sm:$0xff] }
0x1482   :  { %2754 = vmatprep.mubr.f32.mxu1 %v9412_v23  ;;  %2831 = vmatprep.mubr.f32.mxu0 %v9412_v23  ;;  %v3241_v16 = vld [vmem:[%s9487_s24 + $0x1f8] sm:$0xff] }
0x1483   :  { %2858 = vmatprep.subr.mxu1 %v2401_v17  ;;  %2935 = vmatprep.subr.mxu0 %v2403_v18  ;;  %v3193_v17 = vld [vmem:[%s9487_s24 + $0x78] sm:$0xff] }
0x1484   :  { %8141 = vmatmul.mubr.msk.f32.gmra.mxu1 %vm248_vm1, %v9968_v5  ;;  %8143 = vmatmul.mubr.msk.f32.gmra.mxu0 %vm248_vm1, %v9968_v5  ;;  %v3225_v18 = vld [vmem:[%s9487_s24 + $0x178] sm:$0xff] }
0x1485   :  { %2859 = vmatpush1.msra.mxu1 %v2400_v19  ;;  %2936 = vmatpush1.msra.mxu0 %v2402_v20  ;;  %v3208_v19 = vld [vmem:[%s9487_s24 + $0xf0] sm:$0xff] }
0x1486   :  { %2860 = vmatprep.subr.mxu1 %v2385_v21  ;;  %2937 = vmatprep.subr.mxu0 %v2387_v22  ;;  %v3240_v20 = vld [vmem:[%s9487_s24 + $0x1f0] sm:$0xff] }
0x1487   :  { %2861 = vmatpush1.msra.mxu1 %v2384_v24  ;;  %2938 = vmatpush1.msra.mxu0 %v2386_v25  ;;  %v3192_v21 = vld [vmem:[%s9487_s24 + $0x70] sm:$0xff]  ;;  %v3207_v24 = vld [vmem:[%s9487_s24 + $0xe8] sm:$0xff] }
0x1488   :  { %2862 = vmatprep.subr.mxu1 %v2369_v8  ;;  %2939 = vmatprep.subr.mxu0 %v2371_v26  ;;  %v3224_v22 = vld [vmem:[%s9487_s24 + $0x170] sm:$0xff]  ;;  %v3239_v25 = vld [vmem:[%s9487_s24 + $0x1e8] sm:$0xff] }
0x1489   :  { %2863 = vmatpush1.msra.mxu1 %v2368_v29  ;;  %2940 = vmatpush1.msra.mxu0 %v2370_v32  ;;  %v3191_v8 = vld [vmem:[%s9487_s24 + $0x68] sm:$0xff]  ;;  %v3206_v29 = vld [vmem:[%s9487_s24 + $0xe0] sm:$0xff] }
0x148a   :  { %2864 = vmatprep.subr.mxu1 %v2353_v34  ;;  %2941 = vmatprep.subr.mxu0 %v2355_v36  ;;  %v3223_v26 = vld [vmem:[%s9487_s24 + $0x168] sm:$0xff]  ;;  %v3238_v32 = vld [vmem:[%s9487_s24 + $0x1e0] sm:$0xff] }
0x148b   :  { %2865 = vmatpush1.msra.mxu1 %v2352_v27  ;;  %2942 = vmatpush1.msra.mxu0 %v2354_v41  ;;  %v3190_v34 = vld [vmem:[%s9487_s24 + $0x60] sm:$0xff]  ;;  %v3205_v27 = vld [vmem:[%s9487_s24 + $0xd8] sm:$0xff] }
0x148c   :  { %2866 = vmatprep.subr.mxu1 %v2337_v43  ;;  %2943 = vmatprep.subr.mxu0 %v2339_v44  ;;  %v3222_v36 = vld [vmem:[%s9487_s24 + $0x160] sm:$0xff]  ;;  %v3237_v41 = vld [vmem:[%s9487_s24 + $0x1d8] sm:$0xff] }
0x148d   :  { %2867 = vmatpush1.msra.mxu1 %v2336_v45  ;;  %2944 = vmatpush1.msra.mxu0 %v2338_v35  ;;  %v3189_v43 = vld [vmem:[%s9487_s24 + $0x58] sm:$0xff]  ;;  %v3204_v45 = vld [vmem:[%s9487_s24 + $0xd0] sm:$0xff] }
0x148e   :  { %2868 = vmatprep.subr.mxu1 %v2321_v47  ;;  %2945 = vmatprep.subr.mxu0 %v2323_v48  ;;  %v3221_v44 = vld [vmem:[%s9487_s24 + $0x158] sm:$0xff]  ;;  %v3236_v35 = vld [vmem:[%s9487_s24 + $0x1d0] sm:$0xff] }
0x148f   :  { %2869 = vmatpush1.msra.mxu1 %v2320_v49  ;;  %2902 = vmatprep.mubr.f32.mxu1 %v9412_v23  ;;  %v3188_v47 = vld [vmem:[%s9487_s24 + $0x50] sm:$0xff] }
0x1490   :  { %2946 = vmatpush1.msra.mxu0 %v2322_v50  ;;  %2979 = vmatprep.mubr.f32.mxu0 %v9412_v23  ;;  %v3220_v48 = vld [vmem:[%s9487_s24 + $0x150] sm:$0xff]  ;;  %v10099_v50 = vsub.s32 3, %v9614_v30 }
0x1491   :  { %8144 = vmatmul.mubr.msk.f32.vlgmr.msra.gmra.mxu1 %vm248_vm1, %v9923_v33  ;;  %8146 = vmatmul.mubr.msk.f32.vlgmr.msra.gmra.mxu0 %vm248_vm1, %v9923_v33 }
0x1492   :  { %3008 = vmatprep.subr.mxu1 %v2437_v51  ;;  %3085 = vmatprep.subr.mxu0 %v2439_v52  ;;  %v3203_v51 = vld [vmem:[%s9487_s24 + $0xc8] sm:$0xff] }
0x1493   :  { %3009 = vmatpush1.msra.mxu1 %v2436_v10  ;;  %3086 = vmatpush1.msra.mxu0 %v2438_v11  ;;  %v3235_v52 = vld [vmem:[%s9487_s24 + $0x1c8] sm:$0xff] }
0x1494   :  { %3010 = vmatprep.subr.mxu1 %v2421_v28  ;;  %3087 = vmatprep.subr.mxu0 %v2423_v53  ;;  %v3187_v11 = vld [vmem:[%s9487_s24 + $0x48] sm:$0xff]  ;;  %v10108_v53 = vld [vmem:[%s9482_s19] sm:$0xff] }
0x1495   :  { %2908 = vmatprep.mubr.f32.mxu1 %v9412_v23  ;;  %2985 = vmatprep.mubr.f32.mxu0 %v9412_v23  ;;  %v3219_v28 = vld [vmem:[%s9487_s24 + $0x148] sm:$0xff] }
0x1496   :  { %3011 = vmatpush1.msra.mxu1 %v2420_v54  ;;  %3088 = vmatpush1.msra.mxu0 %v2422_v55  ;;  %v3202_v54 = vld [vmem:[%s9487_s24 + $0xc0] sm:$0xff] }
0x1497   :  { %8145 = vmatmul.mubr.msk.f32.gmra.mxu1 %vm248_vm1, %v9968_v5  ;;  %8147 = vmatmul.mubr.msk.f32.gmra.mxu0 %vm248_vm1, %v9968_v5  ;;  %v3234_v55 = vld [vmem:[%s9487_s24 + $0x1c0] sm:$0xff] }
0x1498   :  { %3012 = vmatprep.subr.mxu1 %v2405_v56  ;;  %3089 = vmatprep.subr.mxu0 %v2407_v57  ;;  %v10114_v56 = vrot.slane %v10108_v53, %v9634_v39  ;;  %v3186_v57 = vld [vmem:[%s9487_s24 + $0x40] sm:$0xff] }
0x1499   :  { %3013 = vmatpush1.msra.mxu1 %v2404_v58  ;;  %3090 = vmatpush1.msra.mxu0 %v2406_v42  ;;  %v3218_v58 = vld [vmem:[%s9487_s24 + $0x140] sm:$0xff] }
0x149a   :  { %3014 = vmatprep.subr.mxu1 %v2389_v59  ;;  %3091 = vmatprep.subr.mxu0 %v2391_v60  ;;  %v10120_v59 = vrot.slane %v10108_v53, %v10099_v50  ;;  %v3201_v60 = vld [vmem:[%s9487_s24 + $0xb8] sm:$0xff] }
0x149b   :  { %3015 = vmatpush1.msra.mxu1 %v2388_v37  ;;  %3092 = vmatpush1.msra.mxu0 %v2390_v46  ;;  %v3233_v37 = vld [vmem:[%s9487_s24 + $0x1b8] sm:$0xff] }
0x149c   :  { %3016 = vmatprep.subr.mxu1 %v2373_v61  ;;  %3093 = vmatprep.subr.mxu0 %v2375_v0  ;;  %v3185_v61 = vld [vmem:[%s9487_s24 + $0x38] sm:$0xff] }
0x149d   :  { %3017 = vmatpush1.msra.mxu1 %v2372_v1  ;;  %3094 = vmatpush1.msra.mxu0 %v2374_v2  ;;  %v3217_v0 = vld [vmem:[%s9487_s24 + $0x138] sm:$0xff]  ;;  %v3200_v2 = vld [vmem:[%s9487_s24 + $0xb0] sm:$0xff] }
0x149e   :  { %3018 = vmatprep.subr.mxu1 %v2357_v3  ;;  %3095 = vmatprep.subr.mxu0 %v2359_v6  ;;  %v3232_v3 = vld [vmem:[%s9487_s24 + $0x1b0] sm:$0xff] }
0x149f   :  { %3019 = vmatpush1.msra.mxu1 %v2356_v7  ;;  %3096 = vmatpush1.msra.mxu0 %v2358_v38  ;;  %v3184_v7 = vld [vmem:[%s9487_s24 + $0x30] sm:$0xff] }
0x14a0   :  { %3020 = vmatprep.subr.mxu1 %v2341_v9  ;;  %3097 = vmatprep.subr.mxu0 %v2343_v12  ;;  %v3216_v38 = vld [vmem:[%s9487_s24 + $0x130] sm:$0xff]  ;;  %v3199_v9 = vld [vmem:[%s9487_s24 + $0xa8] sm:$0xff] }
0x14a1   :  { %3021 = vmatpush1.msra.mxu1 %v2340_v4  ;;  %3098 = vmatpush1.msra.mxu0 %v2342_v13  ;;  %v3231_v12 = vld [vmem:[%s9487_s24 + $0x1a8] sm:$0xff] }
0x14a2   :  { %3022 = vmatprep.subr.mxu1 %v2325_v14  ;;  %3099 = vmatprep.subr.mxu0 %v2327_v62  ;;  %v3183_v4 = vld [vmem:[%s9487_s24 + $0x28] sm:$0xff]  ;;  %v10137_v14 = vsub.s32 2, %v9614_v30 }
0x14a3   :  { %3023 = vmatpush1.msra.mxu1 %v2324_v15  ;;  %3056 = vmatprep.mubr.f32.mxu1 %v9412_v23  ;;  %v3215_v13 = vld [vmem:[%s9487_s24 + $0x128] sm:$0xff]  ;;  %v3198_v15 = vld [vmem:[%s9487_s24 + $0xa0] sm:$0xff] }
0x14a4   :  { %3100 = vmatpush1.msra.mxu0 %v2326_v40  ;;  %3133 = vmatprep.mubr.f32.mxu0 %v9412_v23  ;;  %v3230_v40 = vld [vmem:[%s9487_s24 + $0x1a0] sm:$0xff] }
0x14a5   :  { %8148 = vmatmul.mubr.msk.f32.vlgmr.msra.gmra.mxu1 %vm248_vm1, %v9923_v33  ;;  %8150 = vmatmul.mubr.msk.f32.vlgmr.msra.gmra.mxu0 %vm248_vm1, %v9923_v33 }
0x14a6   :  { %8277 = vmatprep.subr.mxu1 %v3209_v63  ;;  %8315 = vmatprep.subr.mxu0 %v3241_v16  ;;  %v3182_v16 = vld [vmem:[%s9487_s24 + $0x20] sm:$0xff] }
0x14a7   :  { %8278 = vmatpush3.msra.mxu1 %v3193_v17  ;;  %8316 = vmatpush3.msra.mxu0 %v3225_v18  ;;  %v3214_v17 = vld [vmem:[%s9487_s24 + $0x120] sm:$0xff]  ;;  %v3197_v18 = vld [vmem:[%s9487_s24 + $0x98] sm:$0xff] }
0x14a8   :  { %8279 = vmatprep.subr.mxu1 %v3208_v19  ;;  %8317 = vmatprep.subr.mxu0 %v3240_v20  ;;  %v3229_v19 = vld [vmem:[%s9487_s24 + $0x198] sm:$0xff]  ;;  %v10147_v20 = vrot.slane %v10108_v53, %v9621_v31 }
0x14a9   :  { %3062 = vmatprep.mubr.f32.mxu1 %v9412_v23  ;;  %3139 = vmatprep.mubr.f32.mxu0 %v9412_v23 }
0x14aa   :  { %8280 = vmatpush3.msra.mxu1 %v3192_v21  ;;  %8318 = vmatpush3.msra.mxu0 %v3224_v22  ;;  %v10151_v21 = vrot.slane %v10108_v53, %v10137_v14  ;;  %v3181_v22 = vld [vmem:[%s9487_s24 + $0x18] sm:$0xff] }
0x14ab   :  { %8149 = vmatmul.mubr.msk.f32.gmra.mxu1 %vm248_vm1, %v9968_v5  ;;  %8151 = vmatmul.mubr.msk.f32.gmra.mxu0 %vm248_vm1, %v9968_v5 }
0x14ac   :  { %8281 = vmatprep.subr.mxu1 %v3207_v24  ;;  %8319 = vmatprep.subr.mxu0 %v3239_v25  ;;  %v3213_v24 = vld [vmem:[%s9487_s24 + $0x118] sm:$0xff]  ;;  %v3196_v25 = vld [vmem:[%s9487_s24 + $0x90] sm:$0xff] }
0x14ad   :  { %8282 = vmatpush3.msra.mxu1 %v3191_v8  ;;  %8320 = vmatpush3.msra.mxu0 %v3223_v26  ;;  %v10096_v49 = vpop.f32.mrf.mxu1  ;;  %v10103_v10 = vpop.f32.mrf.mxu0  ;;  %v3228_v8 = vld [vmem:[%s9487_s24 + $0x190] sm:$0xff] }
0x14ae   :  { %8283 = vmatprep.subr.mxu1 %v3206_v29  ;;  %8321 = vmatprep.subr.mxu0 %v3238_v32  ;;  %v3180_v26 = vld [vmem:[%s9487_s24 + $0x10] sm:$0xff]  ;;  %v3195_v32 = vld [vmem:[%s9487_s24 + $0x88] sm:$0xff] }
0x14af   :  { %8284 = vmatpush3.msra.mxu1 %v3190_v34  ;;  %8322 = vmatpush3.msra.mxu0 %v3222_v36  ;;  %v2598_v42 = vpop.f32.mrf.mxu1  ;;  %v2675_v46 = vpop.f32.mrf.mxu0  ;;  %v3212_v29 = vld [vmem:[%s9487_s24 + $0x110] sm:$0xff]  ;;  %v3227_v34 = vld [vmem:[%s9487_s24 + $0x188] sm:$0xff]  ;;  %v2597_v36 = vadd.f32 %v10096_v49, %v10147_v20 }
0x14b0   :  { %8285 = vmatprep.subr.mxu1 %v3205_v27  ;;  %8323 = vmatprep.subr.mxu0 %v3237_v41  ;;  %v2599_v1 = vadd.f32 %v2598_v42, %v10114_v56  ;;  %v2676_v6 = vadd.f32 %v2675_v46, %v10120_v59  ;;  %v2674_v27 = vadd.f32 %v10103_v10, %v10151_v21  ;;  %v3179_v41 = vld [vmem:[%s9487_s24 + $0x8] sm:$0xff]  ;;  %v3257_v10 = vld [vmem:[%s9487_s24 + $0x278] sm:$0xff]  ;;  %v3270_v46 = vld [vmem:[%s9487_s24 + $0x2e0] sm:$0xff] }
0x14b1   :  { %8286 = vmatpush3.msra.mxu1 %v3189_v43  ;;  %8324 = vmatpush3.msra.mxu0 %v3221_v44  ;;  %v3211_v43 = vld [vmem:[%s9487_s24 + $0x108] sm:$0xff]  ;;  %v3194_v44 = vld [vmem:[%s9487_s24 + $0x80] sm:$0xff] }
0x14b2   :  { %8287 = vmatprep.subr.mxu1 %v3204_v45  ;;  %8325 = vmatprep.subr.mxu0 %v3236_v35  ;;  %v3147_v62 = vmax.f32 %v2599_v1, 0.0  ;;  %v3149_v63 = vmax.f32 %v2676_v6, 0.0  ;;  %v3226_v45 = vld [vmem:[%s9487_s24 + $0x180] sm:$0xff]  ;;  %v3148_v49 = vmax.f32 %v2674_v27, 0.0  ;;  %v3303_v42 = vld [vmem:[%s9487_s24 + $0x3e8] sm:$0xff]  ;;  %v3253_v6 = vld [vmem:[%s9487_s24 + $0x258] sm:$0xff] }
0x14b3   :  { %8288 = vmatpush3.msra.mxu1 %v3188_v47  ;;  %8326 = vmatpush3.msra.mxu0 %v3220_v48  ;;  %v3178_v35 = vld [vmem:[%s9487_s24] sm:$0xff]  ;;  %v3146_v48 = vmax.f32 %v2597_v36, 0.0  ;;  %v3295_v36 = vld [vmem:[%s9487_s24 + $0x3a8] sm:$0xff] }
0x14b4   :  { %8289 = vmatprep.subr.mxu1 %v3203_v51  ;;  %8327 = vmatprep.subr.mxu0 %v3235_v52  ;;  %v3210_v47 = vld [vmem:[%s9487_s24 + $0x100] sm:$0xff]  ;;  %v3273_v51 = vld [vmem:[%s9487_s24 + $0x2f8] sm:$0xff]  ;;  %v3247_v27 = vld [vmem:[%s9487_s24 + $0x228] sm:$0xff] }
0x14b5   :  { %8290 = vmatpush3.msra.mxu1 %v3187_v11  ;;  %8328 = vmatpush3.msra.mxu0 %v3219_v28  ;;  %v3305_v52 = vld [vmem:[%s9487_s24 + $0x3f8] sm:$0xff]  ;;  %v3272_v28 = vld [vmem:[%s9487_s24 + $0x2f0] sm:$0xff]  ;;  %v3286_v1 = vld [vmem:[%s9487_s24 + $0x360] sm:$0xff] }
0x14b6   :  { %8291 = vmatprep.subr.mxu1 %v3202_v54  ;;  %8329 = vmatprep.subr.mxu0 %v3234_v55  ;;  %v3289_v11 = vld [vmem:[%s9487_s24 + $0x378] sm:$0xff]  ;;  %v3304_v54 = vld [vmem:[%s9487_s24 + $0x3f0] sm:$0xff] }
0x14b7   :  { %8292 = vmatpush3.msra.mxu1 %v3186_v57  ;;  %8330 = vmatpush3.msra.mxu0 %v3218_v58  ;;  %v3256_v55 = vld [vmem:[%s9487_s24 + $0x270] sm:$0xff]  ;;  %v3271_v58 = vld [vmem:[%s9487_s24 + $0x2e8] sm:$0xff] }
0x14b8   :  { %8293 = vmatprep.subr.mxu1 %v3201_v60  ;;  %8331 = vmatprep.subr.mxu0 %v3233_v37  ;;  %v3288_v57 = vld [vmem:[%s9487_s24 + $0x370] sm:$0xff]  ;;  %v3255_v60 = vld [vmem:[%s9487_s24 + $0x268] sm:$0xff] }
0x14b9   :  { %8294 = vmatpush3.msra.mxu1 %v3185_v61  ;;  %8332 = vmatpush3.msra.mxu0 %v3217_v0  ;;  %v3287_v37 = vld [vmem:[%s9487_s24 + $0x368] sm:$0xff]  ;;  %v3302_v61 = vld [vmem:[%s9487_s24 + $0x3e0] sm:$0xff] }
0x14ba   :  { %8295 = vmatprep.subr.mxu1 %v3200_v2  ;;  %8333 = vmatprep.subr.mxu0 %v3232_v3  ;;  %v3254_v0 = vld [vmem:[%s9487_s24 + $0x260] sm:$0xff]  ;;  %v3269_v2 = vld [vmem:[%s9487_s24 + $0x2d8] sm:$0xff] }
0x14bb   :  { %8296 = vmatpush3.msra.mxu1 %v3184_v7  ;;  %8334 = vmatpush3.msra.mxu0 %v3216_v38  ;;  %v3301_v3 = vld [vmem:[%s9487_s24 + $0x3d8] sm:$0xff]  ;;  %v3268_v38 = vld [vmem:[%s9487_s24 + $0x2d0] sm:$0xff] }
0x14bc   :  { %8297 = vmatprep.subr.mxu1 %v3199_v9  ;;  %8335 = vmatprep.subr.mxu0 %v3231_v12  ;;  %v3285_v7 = vld [vmem:[%s9487_s24 + $0x358] sm:$0xff]  ;;  %v3300_v9 = vld [vmem:[%s9487_s24 + $0x3d0] sm:$0xff] }
0x14bd   :  { %8298 = vmatpush3.msra.mxu1 %v3183_v4  ;;  %8336 = vmatpush3.msra.mxu0 %v3215_v13  ;;  %v3252_v12 = vld [vmem:[%s9487_s24 + $0x250] sm:$0xff]  ;;  %v3267_v13 = vld [vmem:[%s9487_s24 + $0x2c8] sm:$0xff] }
0x14be   :  { %8299 = vmatprep.subr.mxu1 %v3198_v15  ;;  %8337 = vmatprep.subr.mxu0 %v3230_v40  ;;  %v3284_v4 = vld [vmem:[%s9487_s24 + $0x350] sm:$0xff]  ;;  %v3251_v15 = vld [vmem:[%s9487_s24 + $0x248] sm:$0xff] }
0x14bf   :  { %8300 = vmatpush3.msra.mxu1 %v3182_v16  ;;  %3505 = vmatprep.mubr.f32.mxu1 %v3147_v62  ;;  %v3299_v62 = vld [vmem:[%s9487_s24 + $0x3c8] sm:$0xff]  ;;  %v3298_v16 = vld [vmem:[%s9487_s24 + $0x3c0] sm:$0xff] }
0x14c0   :  { %8338 = vmatpush3.msra.mxu0 %v3214_v17  ;;  %3580 = vmatprep.mubr.f32.mxu0 %v3149_v63  ;;  %v3283_v40 = vld [vmem:[%s9487_s24 + $0x348] sm:$0xff]  ;;  %v3266_v63 = vld [vmem:[%s9487_s24 + $0x2c0] sm:$0xff] }
0x14c1   :  { %8301 = vmatprep.subr.mxu1 %v3197_v18  ;;  %8339 = vmatprep.subr.mxu0 %v3229_v19  ;;  %v3250_v17 = vld [vmem:[%s9487_s24 + $0x240] sm:$0xff]  ;;  %v3265_v19 = vld [vmem:[%s9487_s24 + $0x2b8] sm:$0xff] }
0x14c2   :  { %8302 = vmatpush3.msra.mxu1 %v3181_v22  ;;  %8340 = vmatpush3.msra.mxu0 %v3213_v24  ;;  %v3282_v18 = vld [vmem:[%s9487_s24 + $0x340] sm:$0xff]  ;;  %v3297_v22 = vld [vmem:[%s9487_s24 + $0x3b8] sm:$0xff] }
0x14c3   :  { %8303 = vmatprep.subr.mxu1 %v3196_v25  ;;  %8341 = vmatprep.subr.mxu0 %v3228_v8  ;;  %v3249_v24 = vld [vmem:[%s9487_s24 + $0x238] sm:$0xff]  ;;  %v3264_v8 = vld [vmem:[%s9487_s24 + $0x2b0] sm:$0xff] }
0x14c4   :  { %8304 = vmatpush3.msra.mxu1 %v3180_v26  ;;  %8342 = vmatpush3.msra.mxu0 %v3212_v29  ;;  %v3281_v25 = vld [vmem:[%s9487_s24 + $0x338] sm:$0xff]  ;;  %v3296_v26 = vld [vmem:[%s9487_s24 + $0x3b0] sm:$0xff] }
0x14c5   :  { %8305 = vmatprep.subr.mxu1 %v3195_v32  ;;  %8343 = vmatprep.subr.mxu0 %v3227_v34  ;;  %v3248_v29 = vld [vmem:[%s9487_s24 + $0x230] sm:$0xff]  ;;  %v3263_v34 = vld [vmem:[%s9487_s24 + $0x2a8] sm:$0xff] }
0x14c6   :  { %8306 = vmatpush3.msra.mxu1 %v3179_v41  ;;  %8344 = vmatpush3.msra.mxu0 %v3211_v43  ;;  %v3280_v32 = vld [vmem:[%s9487_s24 + $0x330] sm:$0xff]  ;;  %v3279_v41 = vld [vmem:[%s9487_s24 + $0x328] sm:$0xff]  ;;  %v3262_v43 = vld [vmem:[%s9487_s24 + $0x2a0] sm:$0xff] }
0x14c7   :  { %8307 = vmatprep.subr.mxu1 %v3194_v44  ;;  %8345 = vmatprep.subr.mxu0 %v3226_v45  ;;  %v3294_v44 = vld [vmem:[%s9487_s24 + $0x3a0] sm:$0xff] }
0x14c8   :  { %8308 = vmatpush3.msra.mxu1 %v3178_v35  ;;  %8346 = vmatpush3.msra.mxu0 %v3210_v47  ;;  %v3246_v45 = vld [vmem:[%s9487_s24 + $0x220] sm:$0xff]  ;;  %v3261_v47 = vld [vmem:[%s9487_s24 + $0x298] sm:$0xff] }
0x14c9   :  { %3506 = vmatmul.mubr.f32.vlgmr.msra.gmra.mxu1 %v3146_v48  ;;  %3581 = vmatmul.mubr.f32.vlgmr.msra.gmra.mxu0 %v3148_v49  ;;  %v3278_v35 = vld [vmem:[%s9487_s24 + $0x320] sm:$0xff]  ;;  %v3293_v48 = vld [vmem:[%s9487_s24 + $0x398] sm:$0xff] }
0x14ca   :  { %8353 = vmatprep.subr.mxu1 %v3273_v51  ;;  %8391 = vmatprep.subr.mxu0 %v3305_v52  ;;  %v3245_v49 = vld [vmem:[%s9487_s24 + $0x218] sm:$0xff]  ;;  %v3260_v52 = vld [vmem:[%s9487_s24 + $0x290] sm:$0xff] }
0x14cb   :  { %8354 = vmatpush3.msra.mxu1 %v3257_v10  ;;  %8392 = vmatpush3.msra.mxu0 %v3289_v11  ;;  %v3277_v51 = vld [vmem:[%s9487_s24 + $0x318] sm:$0xff]  ;;  %v3292_v10 = vld [vmem:[%s9487_s24 + $0x390] sm:$0xff] }
0x14cc   :  { %8355 = vmatprep.subr.mxu1 %v3272_v28  ;;  %8393 = vmatprep.subr.mxu0 %v3304_v54  ;;  %v3244_v11 = vld [vmem:[%s9487_s24 + $0x210] sm:$0xff]  ;;  %v3259_v54 = vld [vmem:[%s9487_s24 + $0x288] sm:$0xff] }
0x14cd   :  { %8356 = vmatpush3.msra.mxu1 %v3256_v55  ;;  %8394 = vmatpush3.msra.mxu0 %v3288_v57  ;;  %v3276_v28 = vld [vmem:[%s9487_s24 + $0x310] sm:$0xff]  ;;  %v3291_v55 = vld [vmem:[%s9487_s24 + $0x388] sm:$0xff] }
0x14ce   :  { %8357 = vmatprep.subr.mxu1 %v3271_v58  ;;  %8395 = vmatprep.subr.mxu0 %v3303_v42  ;;  %v3243_v57 = vld [vmem:[%s9487_s24 + $0x208] sm:$0xff]  ;;  %v3258_v42 = vld [vmem:[%s9487_s24 + $0x280] sm:$0xff] }
0x14cf   :  { %8358 = vmatpush3.msra.mxu1 %v3255_v60  ;;  %8396 = vmatpush3.msra.mxu0 %v3287_v37  ;;  %v3275_v58 = vld [vmem:[%s9487_s24 + $0x308] sm:$0xff]  ;;  %v3290_v60 = vld [vmem:[%s9487_s24 + $0x380] sm:$0xff] }
0x14d0   :  { %8359 = vmatprep.subr.mxu1 %v3270_v46  ;;  %8397 = vmatprep.subr.mxu0 %v3302_v61  ;;  %v3242_v37 = vld [vmem:[%s9487_s24 + $0x200] sm:$0xff]  ;;  %v3337_v61 = vld [vmem:[%s9487_s24 + $0x4f8] sm:$0xff] }
0x14d1   :  { %8360 = vmatpush3.msra.mxu1 %v3254_v0  ;;  %8398 = vmatpush3.msra.mxu0 %v3286_v1  ;;  %v3274_v46 = vld [vmem:[%s9487_s24 + $0x300] sm:$0xff]  ;;  %v3369_v0 = vld [vmem:[%s9487_s24 + $0x5f8] sm:$0xff]  ;;  %v10238_v1 = vsub.s32 4, %v9614_v30 }
0x14d2   :  { %8361 = vmatprep.subr.mxu1 %v3269_v2  ;;  %8399 = vmatprep.subr.mxu0 %v3301_v3  ;;  %v10241_v2 = vsub.s32 6, %v9614_v30  ;;  %v10244_v3 = vsub.s32 5, %v9614_v30 }
0x14d3   :  { %8362 = vmatpush3.msra.mxu1 %v3253_v6  ;;  %8400 = vmatpush3.msra.mxu0 %v3285_v7  ;;  %v10247_v6 = vsub.s32 7, %v9614_v30 }
0x14d4   :  { %8363 = vmatprep.subr.mxu1 %v3268_v38  ;;  %8401 = vmatprep.subr.mxu0 %v3300_v9  ;;  %v2467_v30 = vrot.slane %v10108_v53, %v10244_v3 }
0x14d5   :  { %8364 = vmatpush3.msra.mxu1 %v3252_v12  ;;  %8402 = vmatpush3.msra.mxu0 %v3284_v4 }
0x14d6   :  { %8365 = vmatprep.subr.mxu1 %v3267_v13  ;;  %8403 = vmatprep.subr.mxu0 %v3299_v62  ;;  %v2463_v62 = vrot.slane %v10108_v53, %v10238_v1 }
0x14d7   :  { %8366 = vmatpush3.msra.mxu1 %v3251_v15  ;;  %8404 = vmatpush3.msra.mxu0 %v3283_v40  ;;  %v2471_v15 = vrot.slane %v10108_v53, %v10241_v2 }
0x14d8   :  { %8367 = vmatprep.subr.mxu1 %v3266_v63  ;;  %8405 = vmatprep.subr.mxu0 %v3298_v16 }
0x14d9   :  { %8368 = vmatpush3.msra.mxu1 %v3250_v17  ;;  %8406 = vmatpush3.msra.mxu0 %v3282_v18 }
0x14da   :  { %8369 = vmatprep.subr.mxu1 %v3265_v19  ;;  %8407 = vmatprep.subr.mxu0 %v3297_v22 }
0x14db   :  { %8370 = vmatpush3.msra.mxu1 %v3249_v24  ;;  %8408 = vmatpush3.msra.mxu0 %v3281_v25 }
0x14dc   :  { %8371 = vmatprep.subr.mxu1 %v3264_v8  ;;  %8409 = vmatprep.subr.mxu0 %v3296_v26 }
0x14dd   :  { %8372 = vmatpush3.msra.mxu1 %v3248_v29  ;;  %8410 = vmatpush3.msra.mxu0 %v3280_v32 }
0x14de   :  { %8373 = vmatprep.subr.mxu1 %v3263_v34  ;;  %8411 = vmatprep.subr.mxu0 %v3295_v36 }
0x14df   :  { %8374 = vmatpush3.msra.mxu1 %v3247_v27  ;;  %8412 = vmatpush3.msra.mxu0 %v3279_v41  ;;  %v3321_v41 = vld [vmem:[%s9487_s24 + $0x478] sm:$0xff] }
0x14e0   :  { %8375 = vmatprep.subr.mxu1 %v3262_v43  ;;  %8413 = vmatprep.subr.mxu0 %v3294_v44  ;;  %v3353_v43 = vld [vmem:[%s9487_s24 + $0x578] sm:$0xff]  ;;  %v3336_v44 = vld [vmem:[%s9487_s24 + $0x4f0] sm:$0xff] }
0x14e1   :  { %8376 = vmatpush3.msra.mxu1 %v3246_v45  ;;  %8414 = vmatpush3.msra.mxu0 %v3278_v35  ;;  %v3368_v45 = vld [vmem:[%s9487_s24 + $0x5f0] sm:$0xff] }
0x14e2   :  { %8377 = vmatprep.subr.mxu1 %v3261_v47  ;;  %8415 = vmatprep.subr.mxu0 %v3293_v48 }
0x14e3   :  { %8378 = vmatpush3.msra.mxu1 %v3245_v49  ;;  %8416 = vmatpush3.msra.mxu0 %v3277_v51  ;;  %v3320_v51 = vld [vmem:[%s9487_s24 + $0x470] sm:$0xff] }
0x14e4   :  { %8379 = vmatprep.subr.mxu1 %v3260_v52  ;;  %8417 = vmatprep.subr.mxu0 %v3292_v10  ;;  %v3352_v52 = vld [vmem:[%s9487_s24 + $0x570] sm:$0xff] }
0x14e5   :  { %8380 = vmatpush3.msra.mxu1 %v3244_v11  ;;  %8418 = vmatpush3.msra.mxu0 %v3276_v28  ;;  %v3335_v28 = vld [vmem:[%s9487_s24 + $0x4e8] sm:$0xff] }
0x14e6   :  { %8381 = vmatprep.subr.mxu1 %v3259_v54  ;;  %8419 = vmatprep.subr.mxu0 %v3291_v55  ;;  %v3367_v54 = vld [vmem:[%s9487_s24 + $0x5e8] sm:$0xff] }
0x14e7   :  { %8382 = vmatpush3.msra.mxu1 %v3243_v57  ;;  %8420 = vmatpush3.msra.mxu0 %v3275_v58 }
0x14e8   :  { %8383 = vmatprep.subr.mxu1 %v3258_v42  ;;  %8421 = vmatprep.subr.mxu0 %v3290_v60  ;;  %v3319_v60 = vld [vmem:[%s9487_s24 + $0x468] sm:$0xff] }
0x14e9   :  { %8384 = vmatpush3.msra.mxu1 %v3242_v37  ;;  %8422 = vmatpush3.msra.mxu0 %v3274_v46  ;;  %v3351_v37 = vld [vmem:[%s9487_s24 + $0x568] sm:$0xff]  ;;  %v3334_v46 = vld [vmem:[%s9487_s24 + $0x4e0] sm:$0xff] }
0x14ea   :  { %8429 = vmatprep.subr.mxu1 %v3337_v61  ;;  %8467 = vmatprep.subr.mxu0 %v3369_v0  ;;  %v3366_v61 = vld [vmem:[%s9487_s24 + $0x5e0] sm:$0xff] }
0x14eb   :  { %v3318_v0 = vld [vmem:[%s9487_s24 + $0x460] sm:$0xff] }
0x153a   :  { %v2602_v7 = vpop.f32.mrf.mxu1  ;;  %v2679_v38 = vpop.f32.mrf.mxu0 }
0x153b   :  { %v2603_v9 = vadd.f32 %v2602_v7, %v10147_v20  ;;  %v2680_v12 = vadd.f32 %v2679_v38, %v10151_v21  ;;  %v2475_v20 = vrot.slane %v10108_v53, %v10247_v6  ;;  %v3350_v7 = vld [vmem:[%s9487_s24 + $0x560] sm:$0xff]  ;;  %v3333_v38 = vld [vmem:[%s9487_s24 + $0x4d8] sm:$0xff] }
0x153c   :  { %v2604_v4 = vpop.f32.mrf.mxu1  ;;  %v2681_v13 = vpop.f32.mrf.mxu0 }
0x153d   :  { %v2605_v40 = vadd.f32 %v2604_v4, %v10114_v56  ;;  %v2682_v63 = vadd.f32 %v2681_v13, %v10120_v59  ;;  %v3162_v19 = vmax.f32 %v2603_v9, 0.0  ;;  %v3164_v22 = vmax.f32 %v2680_v12, 0.0  ;;  %v3365_v9 = vld [vmem:[%s9487_s24 + $0x5d8] sm:$0xff]  ;;  %v10280_v13 = vld [vmem:[%s9482_s19 + $0x8] sm:$0xff]  ;;  %s11318_s19 = sld [smem:[#allocation14_spill]] }
0x153e   :  { %v2750_v16 = vpop.f32.mrf.mxu1  ;;  %v2827_v21 = vpop.f32.mrf.mxu0  ;;  %v3317_v12 = vld [vmem:[%s9487_s24 + $0x458] sm:$0xff] }
0x153f   :  { %v3163_v17 = vmax.f32 %v2605_v40, 0.0  ;;  %v3165_v18 = vmax.f32 %v2682_v63, 0.0  ;;  %v2751_v24 = vadd.f32 %v2750_v16, %v2463_v62  ;;  %v2828_v25 = vadd.f32 %v2827_v21, %v2471_v15  ;;  %v3349_v4 = vld [vmem:[%s9487_s24 + $0x558] sm:$0xff] }
0x1540   :  { %v2752_v8 = vpop.f32.mrf.mxu1  ;;  %v2829_v56 = vpop.f32.mrf.mxu0  ;;  %v10286_v40 = vrot.slane %v10280_v13, %v9634_v39  ;;  %v10290_v63 = vrot.slane %v10280_v13, %v10099_v50 }
0x1541   :  { %v2753_v26 = vadd.f32 %v2752_v8, %v2467_v30  ;;  %v2830_v59 = vadd.f32 %v2829_v56, %v2475_v20  ;;  %3510 = vmatprep.mubr.f32.mxu1 %v3163_v17  ;;  %3585 = vmatprep.mubr.f32.mxu0 %v3165_v18  ;;  %v3150_v32 = vmax.f32 %v2751_v24, 0.0  ;;  %v3152_v34 = vmax.f32 %v2828_v25, 0.0  ;;  %v3331_v17 = vld [vmem:[%s9487_s24 + $0x4c8] sm:$0xff]  ;;  %v3330_v8 = vld [vmem:[%s9487_s24 + $0x4c0] sm:$0xff] }
0x1542   :  { %3511 = vmatmul.mubr.f32.gmra.mxu1 %v3162_v19  ;;  %3586 = vmatmul.mubr.f32.gmra.mxu0 %v3164_v22  ;;  %v3363_v18 = vld [vmem:[%s9487_s24 + $0x5c8] sm:$0xff]  ;;  %v3362_v56 = vld [vmem:[%s9487_s24 + $0x5c0] sm:$0xff] }
0x1543   :  { %v3151_v53 = vmax.f32 %v2753_v26, 0.0  ;;  %v3153_v29 = vmax.f32 %v2830_v59, 0.0  ;;  %v3315_v19 = vld [vmem:[%s9487_s24 + $0x448] sm:$0xff] }
0x1544   :  { %v2756_v36 = vpop.f32.mrf.mxu1  ;;  %v2833_v27 = vpop.f32.mrf.mxu0  ;;  %v3347_v22 = vld [vmem:[%s9487_s24 + $0x548] sm:$0xff] }
0x1545   :  { %3655 = vmatprep.mubr.f32.mxu1 %v3151_v53  ;;  %3730 = vmatprep.mubr.f32.mxu0 %v3153_v29  ;;  %v2757_v35 = vadd.f32 %v2756_v36, %v2463_v62  ;;  %v2834_v47 = vadd.f32 %v2833_v27, %v2471_v15  ;;  %v3332_v62 = vld [vmem:[%s9487_s24 + $0x4d0] sm:$0xff]  ;;  %v3314_v53 = vld [vmem:[%s9487_s24 + $0x440] sm:$0xff]  ;;  %v3329_v36 = vld [vmem:[%s9487_s24 + $0x4b8] sm:$0xff] }
0x1546   :  { %v2758_v48 = vpop.f32.mrf.mxu1  ;;  %v2835_v49 = vpop.f32.mrf.mxu0  ;;  %3656 = vmatmul.mubr.f32.vlgmr.msra.gmra.mxu1 %v3150_v32  ;;  %3731 = vmatmul.mubr.f32.vlgmr.msra.gmra.mxu0 %v3152_v34  ;;  %v3364_v15 = vld [vmem:[%s9487_s24 + $0x5d0] sm:$0xff]  ;;  %v3346_v29 = vld [vmem:[%s9487_s24 + $0x540] sm:$0xff]  ;;  %v3361_v27 = vld [vmem:[%s9487_s24 + $0x5b8] sm:$0xff] }
0x1547   :  { %v2759_v10 = vadd.f32 %v2758_v48, %v2467_v30  ;;  %v2836_v11 = vadd.f32 %v2835_v49, %v2475_v20  ;;  %8430 = vmatpush3.msra.mxu1 %v3321_v41  ;;  %8468 = vmatpush3.msra.mxu0 %v3353_v43  ;;  %v3166_v58 = vmax.f32 %v2757_v35, 0.0  ;;  %v3168_v42 = vmax.f32 %v2834_v47, 0.0  ;;  %v3316_v30 = vld [vmem:[%s9487_s24 + $0x450] sm:$0xff]  ;;  %v3313_v41 = vld [vmem:[%s9487_s24 + $0x438] sm:$0xff]  ;;  %v3327_v48 = vld [vmem:[%s9487_s24 + $0x4a8] sm:$0xff] }
0x1548   :  { %8431 = vmatprep.subr.mxu1 %v3336_v44  ;;  %8469 = vmatprep.subr.mxu0 %v3368_v45  ;;  %v3348_v20 = vld [vmem:[%s9487_s24 + $0x550] sm:$0xff]  ;;  %v3345_v43 = vld [vmem:[%s9487_s24 + $0x538] sm:$0xff]  ;;  %v3359_v49 = vld [vmem:[%s9487_s24 + $0x5a8] sm:$0xff] }
0x1549   :  { %v3167_v55 = vmax.f32 %v2759_v10, 0.0  ;;  %v3169_v57 = vmax.f32 %v2836_v11, 0.0  ;;  %8432 = vmatpush3.msra.mxu1 %v3320_v51  ;;  %8470 = vmatpush3.msra.mxu0 %v3352_v52  ;;  %v3328_v44 = vld [vmem:[%s9487_s24 + $0x4b0] sm:$0xff]  ;;  %v3311_v51 = vld [vmem:[%s9487_s24 + $0x428] sm:$0xff]  ;;  %v3326_v10 = vld [vmem:[%s9487_s24 + $0x4a0] sm:$0xff] }
0x154a   :  { %8433 = vmatprep.subr.mxu1 %v3335_v28  ;;  %8471 = vmatprep.subr.mxu0 %v3367_v54  ;;  %v3360_v45 = vld [vmem:[%s9487_s24 + $0x5b0] sm:$0xff]  ;;  %v3343_v52 = vld [vmem:[%s9487_s24 + $0x528] sm:$0xff]  ;;  %v3358_v11 = vld [vmem:[%s9487_s24 + $0x5a0] sm:$0xff] }
0x154b   :  { %3660 = vmatprep.mubr.f32.mxu1 %v3167_v55  ;;  %3735 = vmatprep.mubr.f32.mxu0 %v3169_v57  ;;  %v3312_v35 = vld [vmem:[%s9487_s24 + $0x430] sm:$0xff]  ;;  %v3310_v28 = vld [vmem:[%s9487_s24 + $0x420] sm:$0xff] }
0x154c   :  { %3661 = vmatmul.mubr.f32.gmra.mxu1 %v3166_v58  ;;  %3736 = vmatmul.mubr.f32.gmra.mxu0 %v3168_v42  ;;  %v3344_v47 = vld [vmem:[%s9487_s24 + $0x530] sm:$0xff]  ;;  %v3342_v54 = vld [vmem:[%s9487_s24 + $0x520] sm:$0xff]  ;;  %v3325_v58 = vld [vmem:[%s9487_s24 + $0x498] sm:$0xff] }
0x154d   :  { %8434 = vmatpush3.msra.mxu1 %v3319_v60  ;;  %8472 = vmatpush3.msra.mxu0 %v3351_v37  ;;  %v3357_v42 = vld [vmem:[%s9487_s24 + $0x598] sm:$0xff]  ;;  %v2479_v60 = vrot.slane %v10280_v13, %v9621_v31  ;;  %v2487_v37 = vrot.slane %v10280_v13, %v10137_v14 }
0x154e   :  { %8435 = vmatprep.subr.mxu1 %v3334_v46  ;;  %8473 = vmatprep.subr.mxu0 %v3366_v61  ;;  %v3309_v46 = vld [vmem:[%s9487_s24 + $0x418] sm:$0xff] }
0x154f   :  { %8436 = vmatpush3.msra.mxu1 %v3318_v0  ;;  %8474 = vmatpush3.msra.mxu0 %v3350_v7  ;;  %v3341_v61 = vld [vmem:[%s9487_s24 + $0x518] sm:$0xff]  ;;  %v3324_v0 = vld [vmem:[%s9487_s24 + $0x490] sm:$0xff] }
0x1550   :  { %8437 = vmatprep.subr.mxu1 %v3333_v38  ;;  %8475 = vmatprep.subr.mxu0 %v3365_v9  ;;  %v3356_v7 = vld [vmem:[%s9487_s24 + $0x590] sm:$0xff] }
0x1551   :  { %v10294_v16 = vpop.f32.mrf.mxu1  ;;  %v10296_v21 = vpop.f32.mrf.mxu0  ;;  %8438 = vmatpush3.msra.mxu1 %v3317_v12  ;;  %8476 = vmatpush3.msra.mxu0 %v3349_v4  ;;  %v3308_v38 = vld [vmem:[%s9487_s24 + $0x410] sm:$0xff] }
0x1552   :  { %8439 = vmatprep.subr.mxu1 %v3332_v62  ;;  %8477 = vmatprep.subr.mxu0 %v3364_v15  ;;  %v3340_v9 = vld [vmem:[%s9487_s24 + $0x510] sm:$0xff]  ;;  %v3323_v62 = vld [vmem:[%s9487_s24 + $0x488] sm:$0xff] }
0x1553   :  { %v2906_v24 = vpop.f32.mrf.mxu1  ;;  %v2983_v25 = vpop.f32.mrf.mxu0  ;;  %8440 = vmatpush3.msra.mxu1 %v3316_v30  ;;  %8478 = vmatpush3.msra.mxu0 %v3348_v20  ;;  %v3355_v15 = vld [vmem:[%s9487_s24 + $0x588] sm:$0xff]  ;;  %v2905_v30 = vadd.f32 %v10294_v16, %v2479_v60  ;;  %v2982_v20 = vadd.f32 %v10296_v21, %v2487_v37  ;;  %v3306_v21 = vld [vmem:[%s9487_s24 + $0x400] sm:$0xff] }
0x1554   :  { %v2907_v26 = vadd.f32 %v2906_v24, %v10286_v40  ;;  %v2984_v59 = vadd.f32 %v2983_v25, %v10290_v63  ;;  %8441 = vmatprep.subr.mxu1 %v3331_v17  ;;  %8479 = vmatprep.subr.mxu0 %v3363_v18  ;;  %v3307_v17 = vld [vmem:[%s9487_s24 + $0x408] sm:$0xff] }
0x1555   :  { %8442 = vmatpush3.msra.mxu1 %v3315_v19  ;;  %8480 = vmatpush3.msra.mxu0 %v3347_v22  ;;  %v3339_v18 = vld [vmem:[%s9487_s24 + $0x508] sm:$0xff]  ;;  %v3322_v19 = vld [vmem:[%s9487_s24 + $0x480] sm:$0xff] }
0x1556   :  { %v3155_v32 = vmax.f32 %v2907_v26, 0.0  ;;  %v3157_v34 = vmax.f32 %v2984_v59, 0.0  ;;  %8443 = vmatprep.subr.mxu1 %v3330_v8  ;;  %8481 = vmatprep.subr.mxu0 %v3362_v56  ;;  %v3354_v22 = vld [vmem:[%s9487_s24 + $0x580] sm:$0xff]  ;;  %v3154_v26 = vmax.f32 %v2905_v30, 0.0  ;;  %v3156_v59 = vmax.f32 %v2982_v20, 0.0  ;;  %v3395_v30 = vld [vmem:[%s9487_s24 + $0x6c8] sm:$0xff] }
0x1557   :  { %8444 = vmatpush3.msra.mxu1 %v3314_v53  ;;  %8482 = vmatpush3.msra.mxu0 %v3346_v29  ;;  %v2910_v55 = vpop.f32.mrf.mxu1  ;;  %v2987_v57 = vpop.f32.mrf.mxu0  ;;  %v3338_v56 = vld [vmem:[%s9487_s24 + $0x500] sm:$0xff]  ;;  %v10354_v53 = vrot.slane %v10280_v13, %v10244_v3  ;;  %v3427_v20 = vld [vmem:[%s9487_s24 + $0x7c8] sm:$0xff] }
0x1558   :  { %3805 = vmatprep.mubr.f32.mxu1 %v3155_v32  ;;  %3880 = vmatprep.mubr.f32.mxu0 %v3157_v34  ;;  %v10360_v32 = vrot.slane %v10280_v13, %v10247_v6  ;;  %v2911_v34 = vadd.f32 %v2910_v55, %v2479_v60  ;;  %v3383_v55 = vld [vmem:[%s9487_s24 + $0x668] sm:$0xff]  ;;  %v3398_v60 = vld [vmem:[%s9487_s24 + $0x6e0] sm:$0xff] }
0x1559   :  { %8445 = vmatprep.subr.mxu1 %v3329_v36  ;;  %8483 = vmatprep.subr.mxu0 %v3361_v27  ;;  %v2912_v12 = vpop.f32.mrf.mxu1  ;;  %v2989_v4 = vpop.f32.mrf.mxu0  ;;  %v2988_v36 = vadd.f32 %v2987_v57, %v2487_v37  ;;  %v3430_v37 = vld [vmem:[%s9487_s24 + $0x7e0] sm:$0xff] }
0x155a   :  { %8446 = vmatpush3.msra.mxu1 %v3313_v41  ;;  %8484 = vmatpush3.msra.mxu0 %v3345_v43  ;;  %v2913_v24 = vadd.f32 %v2912_v12, %v10286_v40  ;;  %v2990_v25 = vadd.f32 %v2989_v4, %v10290_v63  ;;  %v3401_v40 = vld [vmem:[%s9487_s24 + $0x6f8] sm:$0xff]  ;;  %v3396_v12 = vld [vmem:[%s9487_s24 + $0x6d0] sm:$0xff] }
0x155b   :  { %8447 = vmatprep.subr.mxu1 %v3328_v44  ;;  %8485 = vmatprep.subr.mxu0 %v3360_v45  ;;  %v3433_v63 = vld [vmem:[%s9487_s24 + $0x7f8] sm:$0xff]  ;;  %v3428_v4 = vld [vmem:[%s9487_s24 + $0x7d0] sm:$0xff] }
0x155c   :  { %8448 = vmatpush3.msra.mxu1 %v3312_v35  ;;  %8486 = vmatpush3.msra.mxu0 %v3344_v47  ;;  %v3171_v27 = vmax.f32 %v2913_v24, 0.0  ;;  %v3173_v41 = vmax.f32 %v2990_v25, 0.0  ;;  %v3385_v44 = vld [vmem:[%s9487_s24 + $0x678] sm:$0xff]  ;;  %v3400_v35 = vld [vmem:[%s9487_s24 + $0x6f0] sm:$0xff]  ;;  %v3378_v24 = vld [vmem:[%s9487_s24 + $0x640] sm:$0xff] }
0x155d   :  { %8449 = vmatprep.subr.mxu1 %v3327_v48  ;;  %8487 = vmatprep.subr.mxu0 %v3359_v49  ;;  %v3417_v45 = vld [vmem:[%s9487_s24 + $0x778] sm:$0xff]  ;;  %v3432_v47 = vld [vmem:[%s9487_s24 + $0x7f0] sm:$0xff]  ;;  %v3410_v25 = vld [vmem:[%s9487_s24 + $0x740] sm:$0xff] }
0x155e   :  { %8450 = vmatpush3.msra.mxu1 %v3311_v51  ;;  %8488 = vmatpush3.msra.mxu0 %v3343_v52  ;;  %v3384_v49 = vld [vmem:[%s9487_s24 + $0x670] sm:$0xff] }
0x155f   :  { %8451 = vmatprep.subr.mxu1 %v3326_v10  ;;  %8489 = vmatprep.subr.mxu0 %v3358_v11  ;;  %v3416_v51 = vld [vmem:[%s9487_s24 + $0x770] sm:$0xff]  ;;  %v3170_v10 = vmax.f32 %v2911_v34, 0.0  ;;  %v3172_v11 = vmax.f32 %v2988_v36, 0.0  ;;  %v3391_v36 = vld [vmem:[%s9487_s24 + $0x6a8] sm:$0xff] }
0x1560   :  { %8452 = vmatpush3.msra.mxu1 %v3310_v28  ;;  %8490 = vmatpush3.msra.mxu0 %v3342_v54  ;;  %v3399_v28 = vld [vmem:[%s9487_s24 + $0x6e8] sm:$0xff]  ;;  %v3408_v34 = vld [vmem:[%s9487_s24 + $0x730] sm:$0xff] }
0x1561   :  { %8453 = vmatprep.subr.mxu1 %v3325_v58  ;;  %8491 = vmatprep.subr.mxu0 %v3357_v42  ;;  %v3431_v54 = vld [vmem:[%s9487_s24 + $0x7e8] sm:$0xff] }
0x1562   :  { %8454 = vmatpush3.msra.mxu1 %v3309_v46  ;;  %8492 = vmatpush3.msra.mxu0 %v3341_v61  ;;  %v3415_v58 = vld [vmem:[%s9487_s24 + $0x768] sm:$0xff]  ;;  %v3382_v46 = vld [vmem:[%s9487_s24 + $0x660] sm:$0xff] }
0x1563   :  { %8455 = vmatprep.subr.mxu1 %v3324_v0  ;;  %8493 = vmatprep.subr.mxu0 %v3356_v7  ;;  %v3414_v61 = vld [vmem:[%s9487_s24 + $0x760] sm:$0xff]  ;;  %v3397_v0 = vld [vmem:[%s9487_s24 + $0x6d8] sm:$0xff] }
0x1564   :  { %8456 = vmatpush3.msra.mxu1 %v3308_v38  ;;  %8494 = vmatpush3.msra.mxu0 %v3340_v9  ;;  %v3429_v7 = vld [vmem:[%s9487_s24 + $0x7d8] sm:$0xff] }
0x1565   :  { %v10346_v8 = vpop.f32.mrf.mxu1  ;;  %v10348_v16 = vpop.f32.mrf.mxu0  ;;  %8457 = vmatprep.subr.mxu1 %v3323_v62  ;;  %8495 = vmatprep.subr.mxu0 %v3355_v15  ;;  %v3381_v38 = vld [vmem:[%s9487_s24 + $0x658] sm:$0xff]  ;;  %v3380_v62 = vld [vmem:[%s9487_s24 + $0x650] sm:$0xff] }
0x1566   :  { %8458 = vmatpush3.msra.mxu1 %v3307_v17  ;;  %8496 = vmatpush3.msra.mxu0 %v3339_v18  ;;  %v3413_v9 = vld [vmem:[%s9487_s24 + $0x758] sm:$0xff]  ;;  %v3412_v15 = vld [vmem:[%s9487_s24 + $0x750] sm:$0xff]  ;;  %v3379_v17 = vld [vmem:[%s9487_s24 + $0x648] sm:$0xff] }
0x1567   :  { %8459 = vmatprep.subr.mxu1 %v3322_v19  ;;  %8497 = vmatprep.subr.mxu0 %v3354_v22  ;;  %v3060_v29 = vpop.f32.mrf.mxu1  ;;  %v3137_v43 = vpop.f32.mrf.mxu0  ;;  %v3411_v18 = vld [vmem:[%s9487_s24 + $0x748] sm:$0xff]  ;;  %v3394_v19 = vld [vmem:[%s9487_s24 + $0x6c0] sm:$0xff] }
0x1568   :  { %8460 = vmatpush3.msra.mxu1 %v3306_v21  ;;  %8498 = vmatpush3.msra.mxu0 %v3338_v56  ;;  %v3061_v48 = vadd.f32 %v3060_v29, %v10354_v53  ;;  %v3138_v52 = vadd.f32 %v3137_v43, %v10360_v32  ;;  %v3426_v22 = vld [vmem:[%s9487_s24 + $0x7c0] sm:$0xff]  ;;  %v3393_v21 = vld [vmem:[%s9487_s24 + $0x6b8] sm:$0xff]  ;;  %v3376_v29 = vld [vmem:[%s9487_s24 + $0x630] sm:$0xff] }
0x1569   :  { %3806 = vmatmul.mubr.f32.vlgmr.msra.gmra.mxu1 %v3154_v26  ;;  %3881 = vmatmul.mubr.f32.vlgmr.msra.gmra.mxu0 %v3156_v59  ;;  %v3425_v56 = vld [vmem:[%s9487_s24 + $0x7b8] sm:$0xff]  ;;  %v3407_v43 = vld [vmem:[%s9487_s24 + $0x728] sm:$0xff] }
0x156a   :  { %8505 = vmatprep.subr.mxu1 %v3401_v40  ;;  %8543 = vmatprep.subr.mxu0 %v3433_v63  ;;  %v3159_v57 = vmax.f32 %v3061_v48, 0.0  ;;  %v3161_v42 = vmax.f32 %v3138_v52, 0.0  ;;  %v3377_v26 = vld [vmem:[%s9487_s24 + $0x638] sm:$0xff]  ;;  %v3392_v40 = vld [vmem:[%s9487_s24 + $0x6b0] sm:$0xff]  ;;  %v3374_v48 = vld [vmem:[%s9487_s24 + $0x620] sm:$0xff] }
0x156b   :  { %3810 = vmatprep.mubr.f32.mxu1 %v3171_v27  ;;  %3885 = vmatprep.mubr.f32.mxu0 %v3173_v41  ;;  %v3409_v59 = vld [vmem:[%s9487_s24 + $0x738] sm:$0xff]  ;;  %v3424_v63 = vld [vmem:[%s9487_s24 + $0x7b0] sm:$0xff]  ;;  %v3423_v27 = vld [vmem:[%s9487_s24 + $0x7a8] sm:$0xff] }
0x156c   :  { %8506 = vmatpush3.msra.mxu1 %v3385_v44  ;;  %8544 = vmatpush3.msra.mxu0 %v3417_v45  ;;  %v3375_v41 = vld [vmem:[%s9487_s24 + $0x628] sm:$0xff]  ;;  %v3390_v44 = vld [vmem:[%s9487_s24 + $0x6a0] sm:$0xff]  ;;  %v3421_v52 = vld [vmem:[%s9487_s24 + $0x798] sm:$0xff] }
0x156d   :  { %8507 = vmatprep.subr.mxu1 %v3400_v35  ;;  %8545 = vmatprep.subr.mxu0 %v3432_v47  ;;  %v3422_v45 = vld [vmem:[%s9487_s24 + $0x7a0] sm:$0xff]  ;;  %v3064_v35 = vpop.f32.mrf.mxu1  ;;  %v3141_v47 = vpop.f32.mrf.mxu0 }
0x156e   :  { %8508 = vmatpush3.msra.mxu1 %v3384_v49  ;;  %8546 = vmatpush3.msra.mxu0 %v3416_v51  ;;  %v3406_v49 = vld [vmem:[%s9487_s24 + $0x720] sm:$0xff]  ;;  %v3389_v51 = vld [vmem:[%s9487_s24 + $0x698] sm:$0xff] }
0x156f   :  { %3811 = vmatmul.mubr.f32.gmra.mxu1 %v3170_v10  ;;  %3886 = vmatmul.mubr.f32.gmra.mxu0 %v3172_v11  ;;  %v2495_v10 = vrot.slane %v10280_v13, %v10238_v1  ;;  %v2503_v11 = vrot.slane %v10280_v13, %v10241_v2  ;;  %v3387_v13 = vld [vmem:[%s9487_s24 + $0x688] sm:$0xff] }
0x1570   :  { %8509 = vmatprep.subr.mxu1 %v3399_v28  ;;  %8547 = vmatprep.subr.mxu0 %v3431_v54  ;;  %v3373_v28 = vld [vmem:[%s9487_s24 + $0x618] sm:$0xff] }
0x1571   :  { %8510 = vmatpush3.msra.mxu1 %v3383_v55  ;;  %3955 = vmatprep.mubr.f32.mxu1 %v3159_v57  ;;  %v3405_v54 = vld [vmem:[%s9487_s24 + $0x718] sm:$0xff]  ;;  %v3388_v55 = vld [vmem:[%s9487_s24 + $0x690] sm:$0xff] }
0x1572   :  { %8548 = vmatpush3.msra.mxu0 %v3415_v58  ;;  %4030 = vmatprep.mubr.f32.mxu0 %v3161_v42  ;;  %v3420_v57 = vld [vmem:[%s9487_s24 + $0x790] sm:$0xff]  ;;  %v3066_v58 = vpop.f32.mrf.mxu1  ;;  %v3143_v42 = vpop.f32.mrf.mxu0 }
0x1573   :  { %8511 = vmatprep.subr.mxu1 %v3398_v60  ;;  %8549 = vmatprep.subr.mxu0 %v3430_v37  ;;  %v3372_v60 = vld [vmem:[%s9487_s24 + $0x610] sm:$0xff] }
0x1574   :  { %8512 = vmatpush3.msra.mxu1 %v3382_v46  ;;  %8550 = vmatpush3.msra.mxu0 %v3414_v61  ;;  %v3404_v37 = vld [vmem:[%s9487_s24 + $0x710] sm:$0xff]  ;;  %v3419_v46 = vld [vmem:[%s9487_s24 + $0x788] sm:$0xff]  ;;  %v3059_v61 = vadd.f32 %v10346_v8, %v2495_v10 }
0x1575   :  { %8513 = vmatprep.subr.mxu1 %v3397_v0  ;;  %8551 = vmatprep.subr.mxu0 %v3429_v7  ;;  %v3136_v0 = vadd.f32 %v10348_v16, %v2503_v11  ;;  %v3371_v7 = vld [vmem:[%s9487_s24 + $0x608] sm:$0xff] }
0x1576   :  { %8514 = vmatpush3.msra.mxu1 %v3381_v38  ;;  %8552 = vmatpush3.msra.mxu0 %v3413_v9  ;;  %v3403_v38 = vld [vmem:[%s9487_s24 + $0x708] sm:$0xff]  ;;  %v3067_v9 = vadd.f32 %v3066_v58, %v10354_v53  ;;  %v3158_v8 = vmax.f32 %v3059_v61, 0.0 }
0x1577   :  { %8515 = vmatprep.subr.mxu1 %v3396_v12  ;;  %8553 = vmatprep.subr.mxu0 %v3428_v4  ;;  %v3144_v12 = vadd.f32 %v3143_v42, %v10360_v32  ;;  %v3386_v4 = vld [vmem:[%s9487_s24 + $0x680] sm:$0xff]  ;;  %v3160_v16 = vmax.f32 %v3136_v0, 0.0 }
0x1578   :  { %8516 = vmatpush3.msra.mxu1 %v3380_v62  ;;  %8554 = vmatpush3.msra.mxu0 %v3412_v15  ;;  %v3418_v62 = vld [vmem:[%s9487_s24 + $0x780] sm:$0xff] }
0x1579   :  { %8517 = vmatprep.subr.mxu1 %v3395_v30  ;;  %8555 = vmatprep.subr.mxu0 %v3427_v20  ;;  %v3370_v15 = vld [vmem:[%s9487_s24 + $0x600] sm:$0xff]  ;;  %v3065_v20 = vadd.f32 %v3064_v35, %v2495_v10  ;;  %v3177_v53 = vmax.f32 %v3144_v12, 0.0 }
0x157a   :  { %8518 = vmatpush3.msra.mxu1 %v3379_v17  ;;  %8556 = vmatpush3.msra.mxu0 %v3411_v18  ;;  %v3402_v30 = vld [vmem:[%s9487_s24 + $0x700] sm:$0xff]  ;;  %v3142_v17 = vadd.f32 %v3141_v47, %v2503_v11  ;;  %v3175_v18 = vmax.f32 %v3067_v9, 0.0  ;;  %s11319_s24 = sld [smem:[#allocation12_spill]] }
0x157b   :  { %8519 = vmatprep.subr.mxu1 %v3394_v19  ;;  %8557 = vmatprep.subr.mxu0 %v3426_v22  ;;  %v3174_v32 = vmax.f32 %v3065_v20, 0.0 }
0x157c   :  { %8520 = vmatpush3.msra.mxu1 %v3378_v24  ;;  %8558 = vmatpush3.msra.mxu0 %v3410_v25  ;;  %v3176_v19 = vmax.f32 %v3142_v17, 0.0 }
0x157d   :  { %8521 = vmatprep.subr.mxu1 %v3393_v21  ;;  %8559 = vmatprep.subr.mxu0 %v3425_v56 }
0x157e   :  { %8522 = vmatpush3.msra.mxu1 %v3377_v26  ;;  %8560 = vmatpush3.msra.mxu0 %v3409_v59 }
0x157f   :  { %8523 = vmatprep.subr.mxu1 %v3392_v40  ;;  %8561 = vmatprep.subr.mxu0 %v3424_v63 }
0x1580   :  { %8524 = vmatpush3.msra.mxu1 %v3376_v29  ;;  %8562 = vmatpush3.msra.mxu0 %v3408_v34  ;;  %v8152_v34 = vld [vmem:[%s9492_s30] ss:$0 sm:$0xff]  ;;  %s11320_s30 = sld [smem:[#allocation13_spill]] }
0x1581   :  { %8525 = vmatprep.subr.mxu1 %v3391_v36  ;;  %8563 = vmatprep.subr.mxu0 %v3423_v27 }
0x1582   :  { %8526 = vmatpush3.msra.mxu1 %v3375_v41  ;;  %8564 = vmatpush3.msra.mxu0 %v3407_v43 }
0x1583   :  { %8527 = vmatprep.subr.mxu1 %v3390_v44  ;;  %8565 = vmatprep.subr.mxu0 %v3422_v45 }
0x1584   :  { %8528 = vmatpush3.msra.mxu1 %v3374_v48  ;;  %8566 = vmatpush3.msra.mxu0 %v3406_v49 }
0x1585   :  { %8529 = vmatprep.subr.mxu1 %v3389_v51  ;;  %8567 = vmatprep.subr.mxu0 %v3421_v52 }
0x1586   :  { %8530 = vmatpush3.msra.mxu1 %v3373_v28  ;;  %8568 = vmatpush3.msra.mxu0 %v3405_v54 }
0x1587   :  { %8531 = vmatprep.subr.mxu1 %v3388_v55  ;;  %8569 = vmatprep.subr.mxu0 %v3420_v57 }
0x1588   :  { %8532 = vmatpush3.msra.mxu1 %v3372_v60  ;;  %8570 = vmatpush3.msra.mxu0 %v3404_v37 }
0x1589   :  { %8533 = vmatprep.subr.mxu1 %v3387_v13  ;;  %8571 = vmatprep.subr.mxu0 %v3419_v46  ;;  %v8309_v22 = vpop.f32.mrf.mxu1  ;;  %v8347_v24 = vpop.f32.mrf.mxu0 }
0x158a   :  { %8534 = vmatpush3.msra.mxu1 %v3371_v7  ;;  %8572 = vmatpush3.msra.mxu0 %v3403_v38 }
0x158b   :  { %8535 = vmatprep.subr.mxu1 %v3386_v4  ;;  %8573 = vmatprep.subr.mxu0 %v3418_v62  ;;  %v8310_v25 = vpop.f32.mrf.mxu1  ;;  %v8348_v21 = vpop.f32.mrf.mxu0 }
0x158c   :  { %8536 = vmatpush3.msra.mxu1 %v3370_v15  ;;  %8574 = vmatpush3.msra.mxu0 %v3402_v30  ;;  %v8311_v7 = vadd.f32 %v8310_v25, %v8309_v22  ;;  %v8349_v9 = vadd.f32 %v8348_v21, %v8347_v24 }
0x158d   :  { %3956 = vmatmul.mubr.f32.vlgmr.msra.gmra.mxu1 %v3158_v8  ;;  %4031 = vmatmul.mubr.f32.vlgmr.msra.gmra.mxu0 %v3160_v16 }
0x158e   :  { %3960 = vmatprep.mubr.f32.mxu1 %v3175_v18  ;;  %4035 = vmatprep.mubr.f32.mxu0 %v3177_v53  ;;  %v3508_v38 = vadd.f32 %v8311_v7, %v8152_v34 }
0x158f   :  { %9091 = vmatprep.subr.mxu0 %v9412_v23 }
0x1590   :  { %v3583_v4 = vadd.f32 %v8349_v9, %v3508_v38  ;;  %v10462_v38 = vld [vmem:[%s11313_s25] ss:$0 sm:$0xff] }
0x1591   :  { %3961 = vmatmul.mubr.f32.gmra.mxu1 %v3174_v32  ;;  %4036 = vmatmul.mubr.f32.gmra.mxu0 %v3176_v19 }
0x1592   :  { %4185 = vmatprep.mubr.f32.mxu1 %v9412_v23  ;;  %9093 = vmatprep.mubr.msk.f32.mxu0 %vm9413_vm2, %v9412_v23 }
0x1602   :  { %v8312_v56 = vpop.f32.mrf.mxu1  ;;  %v8350_v26 = vpop.f32.mrf.mxu0 }
0x1604   :  { %v8313_v59 = vpop.f32.mrf.mxu1  ;;  %v8351_v40 = vpop.f32.mrf.mxu0 }
0x1605   :  { %v8314_v63 = vadd.f32 %v8313_v59, %v8312_v56  ;;  %v8352_v29 = vadd.f32 %v8351_v40, %v8350_v26 }
0x1606   :  { %v8385_v36 = vpop.f32.mrf.mxu1  ;;  %v8423_v27 = vpop.f32.mrf.mxu0 }
0x1607   :  { %v3513_v41 = vadd.f32 %v8314_v63, %v8152_v34 }
0x1608   :  { %v8386_v43 = vpop.f32.mrf.mxu1  ;;  %v8424_v44 = vpop.f32.mrf.mxu0 }
0x1609   :  { %v3588_v45 = vadd.f32 %v8352_v29, %v3513_v41  ;;  %v8387_v12 = vadd.f32 %v8386_v43, %v8385_v36  ;;  %v8425_v15 = vadd.f32 %v8424_v44, %v8423_v27 }
0x160b   :  { %v3658_v62 = vadd.f32 %v8387_v12, %v3583_v4  ;;  %v10465_v12 = vld [vmem:[%s11314_s29] ss:$0 sm:$0xff] }
0x160c   :  { %v8388_v35 = vpop.f32.mrf.mxu1  ;;  %v8426_v47 = vpop.f32.mrf.mxu0 }
0x160d   :  { %v3733_v8 = vadd.f32 %v8425_v15, %v3658_v62  ;;  %v4103_v15 = vld [vmem:[%s11315_s3] sm:$0x3] }
0x160e   :  { %v8389_v48 = vpop.f32.mrf.mxu1  ;;  %v8427_v49 = vpop.f32.mrf.mxu0 }
0x160f   :  { %v8390_v51 = vadd.f32 %v8389_v48, %v8388_v35  ;;  %v8428_v52 = vadd.f32 %v8427_v49, %v8426_v47  ;;  %v4102_v48 = vld [vmem:[%s9507_s20 + $0x78] sm:$0xff]  ;;  %v4100_v49 = vld [vmem:[%s9507_s20 + $0x68] sm:$0xff] }
0x1610   :  { %4137 = vmatprep.subr.mxu1 %v4102_v48 }
0x1611   :  { %v3663_v10 = vadd.f32 %v8390_v51, %v3588_v45  ;;  %v4099_v51 = vld [vmem:[%s9507_s20 + $0x60] sm:$0xff] }
0x1613   :  { %v3738_v11 = vadd.f32 %v8428_v52, %v3663_v10  ;;  %v4098_v52 = vld [vmem:[%s9507_s20 + $0x58] sm:$0xff]  ;;  %v4097_v10 = vld [vmem:[%s9507_s20 + $0x50] sm:$0xff] }
0x1629   :  { %v8461_v28 = vpop.f32.mrf.mxu1  ;;  %v8499_v54 = vpop.f32.mrf.mxu0 }
0x162b   :  { %v8462_v55 = vpop.f32.mrf.mxu1  ;;  %v8500_v57 = vpop.f32.mrf.mxu0 }
0x162c   :  { %v8463_v30 = vadd.f32 %v8462_v55, %v8461_v28  ;;  %v8501_v18 = vadd.f32 %v8500_v57, %v8499_v54  ;;  %v4095_v28 = vld [vmem:[%s9507_s20 + $0x40] sm:$0xff]  ;;  %v4094_v54 = vld [vmem:[%s9507_s20 + $0x38] sm:$0xff]  ;;  %v4093_v55 = vld [vmem:[%s9507_s20 + $0x30] sm:$0xff] }
0x162d   :  { %v4092_v57 = vld [vmem:[%s9507_s20 + $0x28] sm:$0xff] }
0x162e   :  { %v3808_v16 = vadd.f32 %v8463_v30, %v3733_v8  ;;  %v10476_v30 = vrot.slane %v4103_v15, %v9621_v31 }
0x162f   :  { %v8464_v58 = vpop.f32.mrf.mxu1  ;;  %v8502_v42 = vpop.f32.mrf.mxu0 }
0x1630   :  { %v3883_v19 = vadd.f32 %v8501_v18, %v3808_v16 }
0x1631   :  { %v8465_v60 = vpop.f32.mrf.mxu1  ;;  %v8503_v37 = vpop.f32.mrf.mxu0 }
0x1632   :  { %v8466_v13 = vadd.f32 %v8465_v60, %v8464_v58  ;;  %v8504_v46 = vadd.f32 %v8503_v37, %v8502_v42  ;;  %v4091_v58 = vld [vmem:[%s9507_s20 + $0x20] sm:$0xff]  ;;  %v4090_v42 = vld [vmem:[%s9507_s20 + $0x18] sm:$0xff]  ;;  %v4089_v60 = vld [vmem:[%s9507_s20 + $0x10] sm:$0xff] }
0x1633   :  { %v4088_v37 = vld [vmem:[%s9507_s20 + $0x8] sm:$0xff] }
0x1634   :  { %v3813_v61 = vadd.f32 %v8466_v13, %v3738_v11  ;;  %v4096_v11 = vld [vmem:[%s9507_s20 + $0x48] sm:$0xff]  ;;  %v4087_v13 = vld [vmem:[%s9507_s20] sm:$0xff] }
0x1636   :  { %v3888_v0 = vadd.f32 %v8504_v46, %v3813_v61 }
0x164d   :  { %v8537_v20 = vpop.f32.mrf.mxu1  ;;  %v8575_v17 = vpop.f32.mrf.mxu0 }
0x164f   :  { %v8538_v53 = vpop.f32.mrf.mxu1  ;;  %v8576_v32 = vpop.f32.mrf.mxu0 }
0x1650   :  { %v8539_v56 = vadd.f32 %v8538_v53, %v8537_v20  ;;  %v8577_v22 = vadd.f32 %v8576_v32, %v8575_v17  ;;  %v10484_v20 = vrot.slane %v4103_v15, %v9634_v39 }
0x1651   :  { %v8540_v26 = vpop.f32.mrf.mxu1  ;;  %v8578_v59 = vpop.f32.mrf.mxu0 }
0x1652   :  { %v3958_v40 = vadd.f32 %v8539_v56, %v3883_v19 }
0x1653   :  { %v8541_v25 = vpop.f32.mrf.mxu1  ;;  %v8579_v24 = vpop.f32.mrf.mxu0 }
0x1654   :  { %v4033_v21 = vadd.f32 %v8577_v22, %v3958_v40  ;;  %v8542_v63 = vadd.f32 %v8541_v25, %v8540_v26  ;;  %v8580_v34 = vadd.f32 %v8579_v24, %v8578_v59 }
0x1656   :  { %v3963_v29 = vadd.f32 %v8542_v63, %v3888_v0  ;;  %v4041_v36 = vadd.f32 %v4033_v21, %v9923_v33  ;;  %v4101_v33 = vld [vmem:[%s9507_s20 + $0x70] sm:$0xff]  ;;  %s11321_s20 = sld [smem:[#allocation16_spill]] }
0x1657   :  { %4138 = vmatpush1.msra.mxu1 %v4101_v33 }
0x1658   :  { %v10440_v27 = vadd.f32 %v8580_v34, %v3963_v29  ;;  %v4045_v41 = vsel %vm248_vm1, %v4041_v36, 0.0  ;;  %4139 = vmatprep.subr.mxu1 %v4100_v49 }
0x1659   :  { %4046 = vadd.xlane.f32.xlu0 %v4045_v41  ;;  %4140 = vmatpush1.msra.mxu1 %v4099_v51 }
0x165a   :  { %4141 = vmatprep.subr.mxu1 %v4098_v52  ;;  %v4042_v48 = vadd.f32 %v10440_v27, %v9968_v5 }
0x165b   :  { %4142 = vmatpush1.msra.mxu1 %v4097_v10 }
0x165c   :  { %4143 = vmatprep.subr.mxu1 %v4096_v11  ;;  %v4048_v33 = vsel %vm248_vm1, %v4042_v48, 0.0 }
0x165d   :  { %4144 = vmatpush1.msra.mxu1 %v4095_v28 }
0x165e   :  { %4145 = vmatprep.subr.mxu1 %v4094_v54 }
0x165f   :  { %4146 = vmatpush1.msra.mxu1 %v4093_v55 }
0x1660   :  { %4147 = vmatprep.subr.mxu1 %v4092_v57 }
0x1661   :  { %4148 = vmatpush1.msra.mxu1 %v4091_v58  ;;  %v10525_v58 = vld [vmem:[%s11316_s8 + $0x18] sm:$0xff] }
0x1662   :  { %4149 = vmatprep.subr.mxu1 %v4090_v42  ;;  %v10528_v42 = vld [vmem:[%s11316_s8 + $0x10] sm:$0xff] }
0x1663   :  { %4150 = vmatpush1.msra.mxu1 %v4089_v60 }
0x1664   :  { %4151 = vmatprep.subr.mxu1 %v4088_v37 }
0x1665   :  { %4152 = vmatpush1.msra.mxu1 %v4087_v13 }
0x1666   :  { %9111 = vmatprep.subr.mxu1 %v9412_v23 }
0x16e2   :  { %v4047_v43 = vpop.xlane.xlu0 %4046 }
0x16e3   :  { %v4051_v44 = vmul.f32 0.015625, %v4047_v43 }
0x16e5   :  { %v4053_v45 = vsub.f32 %v4041_v36, %v4051_v44 }
0x16e7   :  { %v4055_v35 = vmul.f32 %v4053_v45, %v4053_v45 }
0x16e9   :  { %v4057_v47 = vsel %vm248_vm1, %v4055_v35, 0.0 }
0x16ea   :  { %4058 = vadd.xlane.f32.xlu1 %v4057_v47 }
0x1773   :  { %v4059_v46 = vpop.xlane.xlu1 %4058 }
0x1774   :  { %v4063_v61 = vmul.f32 0.015625, %v4059_v46  ;;  %v10535_v46 = vld [vmem:[%s11316_s8 + $0x8] sm:$0xff] }
0x1776   :  { %v4065_v0 = vadd.f32 1e-05, %v4063_v61  ;;  %v10539_v61 = vld [vmem:[%s11316_s8] sm:$0xff] }
0x1778   :  { %9313 = vrsqrt.f32 %v4065_v0 }
0x1785   :  { %v9314_v7 = vpop.eup %9313 }
0x1786   :  { %v4069_v9 = vmul.f32 %v9314_v7, %v4053_v45 }
0x1788   :  { %v4077_v4 = vmul.f32 %v10462_v38, %v4069_v9 }
0x178a   :  { %v10469_v62 = vadd.f32 %v10465_v12, %v4077_v4 }
0x178c   :  { %8155 = vmatmul.mubr.msk.f32.vlgmr.msra.gmra.mxu1 %vm248_vm1, %v10469_v62 }
0x178d   :  { %4191 = vmatprep.mubr.f32.mxu1 %v9412_v23  ;;  %9112 = vmatpush3.msra.mxu1 %v10525_v58 }
0x178e   :  { %9113 = vmatprep.subr.mxu1 %v9412_v23 }
0x178f   :  { %9114 = vmatpush3.msra.mxu1 %v10528_v42 }
0x1790   :  { %9125 = vmatprep.subr.mxu1 %v9412_v23 }
0x184c   :  { %v4187_v8 = vpop.f32.mrf.mxu1 }
0x184d   :  { %v10479_v16 = vadd.f32 %v4187_v8, %v10476_v30 }
0x184e   :  { %v4189_v17 = vpop.f32.mrf.mxu1 }
0x184f   :  { %4207 = vrot.lane.b32.xlu1 %v10479_v16, %s9415_s5  ;;  %v10489_v53 = vadd.f32 %v4189_v17, %v10484_v20 }
0x18c1   :  { %v4208_v18 = vpop.permute.xlu1 %4207 }
0x18c2   :  { %9092 = vmatpush3.xpose.msk.msra.mxu0 %vm343_vm3, %v4208_v18 }
0x18c3   :  { %9096 = vmatprep.subr.mxu0 %v9412_v23 }
0x18c5   :  { %9094 = vmatmul.mubr.msk.f32.vlgmr.msra.gmra.mxu0 %vm343_vm3, %v10479_v16 }
0x18c6   :  { %9097 = vmatpush3.msra.mxu0 %v10489_v53  ;;  %9098 = vmatprep.mubr.msk.f32.mxu0 %vm9413_vm2, %v9412_v23 }
0x18c7   :  { %9101 = vmatprep.subr.mxu0 %v9412_v23 }
0x1985   :  { %v4279_v32 = vpop.f32.mrf.mxu0 }
0x1986   :  { %v4283_v19 = vmul.f32 0.25, %v4279_v32 }
0x1987   :  { %v9095_v56 = vpop.f32.mrf.mxu0 }
0x1988   :  { %v4284_v26 = vsel %vm419_vm4, %v4283_v19, -inf }
0x1989   :  { %4285 = vmax.xlane.f32.xlu1 %v4284_v26 }
0x1a12   :  { %v4286_v59 = vpop.xlane.xlu1 %4285 }
0x1a13   :  { %v4287_v40 = vsub.f32 %v4283_v19, %v4286_v59 }
0x1a15   :  { %v4288_v22 = vmul.f32 1.442695, %v4287_v40 }
0x1a17   :  { %9315 = vpow2.f32 %v4288_v22 }
0x1a24   :  { %v9316_v25 = vpop.eup %9315 }
0x1a25   :  { %v4290_v24 = vsel %vm419_vm4, %v9316_v25, 0.0 }
0x1a26   :  { %4291 = vadd.xlane.f32.xlu0 %v4290_v24 }
0x1a3c   :  { %4370 = vrot.lane.b32.xlu0 %v10479_v16, %s9414_s0 }
0x1a40   :  { %4368 = vrot.lane.b32.xlu0 %v10479_v16, %s9416_s9 }
0x1aaf   :  { %v4292_v21 = vpop.xlane.xlu0 %4291 }
0x1ab0   :  { %9317 = vrcp.f32 %v4292_v21 }
0x1ab3   :  { %v4371_v29 = vpop.permute.xlu0 %4370 }
0x1ab7   :  { %v4369_v36 = vpop.permute.xlu0 %4368 }
0x1abd   :  { %v9318_v63 = vpop.eup %9317 }
0x1abe   :  { %v4294_v34 = vmul.f32 %v9318_v63, %v9316_v25 }
0x1ac0   :  { %9099 = vmatmul.mubr.msk.f32.vlgmr.msra.gmra.mxu0 %vm419_vm4, %v4294_v34 }
0x1ac1   :  { %9102 = vmatpush3.xpose.msk.msra.mxu0 %vm343_vm3, %v4371_v29  ;;  %9103 = vmatprep.mubr.msk.f32.mxu0 %vm9413_vm2, %v9412_v23 }
0x1ac2   :  { %9106 = vmatprep.subr.mxu0 %v9412_v23 }
0x1ac4   :  { %9104 = vmatmul.mubr.msk.f32.vlgmr.msra.gmra.mxu0 %vm343_vm3, %v4369_v36 }
0x1ac5   :  { %9108 = vmatprep.mubr.msk.f32.mxu0 %vm9413_vm2, %v9412_v23 }
0x1b80   :  { %v4364_v41 = vpop.f32.mrf.mxu0 }
0x1b82   :  { %v9100_v43 = vpop.f32.mrf.mxu0 }
0x1b84   :  { %v4442_v44 = vpop.f32.mrf.mxu0 }
0x1b85   :  { %v4446_v45 = vmul.f32 0.25, %v4442_v44 }
0x1b86   :  { %v9105_v35 = vpop.f32.mrf.mxu0 }
0x1b87   :  { %v4447_v47 = vsel %vm419_vm4, %v4446_v45, -inf }
0x1b88   :  { %4448 = vmax.xlane.f32.xlu1 %v4447_v47 }
0x1b99   :  { %4459 = vrot.lane.b32.xlu1 %v10489_v53, %s9416_s9 }
0x1bbd   :  { %4049 = vadd.xlane.f32.xlu1 %v4048_v33 }
0x1bce   :  { %4681 = vrot.lane.b32.xlu1 %v10479_v16, %s9417_s13 }
0x1c11   :  { %v4449_v49 = vpop.xlane.xlu1 %4448 }
0x1c12   :  { %v4450_v51 = vsub.f32 %v4446_v45, %v4449_v49  ;;  %v10580_v45 = vld [vmem:[%s11316_s8 + $0x28] sm:$0xff]  ;;  %v10593_v49 = vld [vmem:[%s11316_s8 + $0x20] sm:$0xff] }
0x1c14   :  { %v4451_v52 = vmul.f32 1.442695, %v4450_v51 }
0x1c15   :  { %v4460_v10 = vpop.permute.xlu1 %4459 }
0x1c16   :  { %9319 = vpow2.f32 %v4451_v52  ;;  %9107 = vmatpush3.msra.mxu0 %v4460_v10 }
0x1c17   :  { %9118 = vmatprep.subr.mxu0 %v9412_v23 }
0x1c23   :  { %v9320_v11 = vpop.eup %9319 }
0x1c24   :  { %v4453_v28 = vsel %vm419_vm4, %v9320_v11, 0.0 }
0x1c25   :  { %4454 = vadd.xlane.f32.xlu0 %v4453_v28 }
0x1c46   :  { %v4050_v5 = vpop.xlane.xlu1 %4049 }
0x1c47   :  { %v4052_v27 = vmul.f32 0.015625, %v4050_v5 }
0x1c49   :  { %v4054_v54 = vsub.f32 %v4042_v48, %v4052_v27 }
0x1c4b   :  { %v4056_v55 = vmul.f32 %v4054_v54, %v4054_v54 }
0x1c4d   :  { %v4060_v57 = vsel %vm248_vm1, %v4056_v55, 0.0 }
0x1c4e   :  { %4061 = vadd.xlane.f32.xlu0 %v4060_v57 }
0x1c64   :  { %4683 = vrot.lane.b32.xlu0 %v10479_v16, %s9418_s17 }
0x1cae   :  { %v4455_v60 = vpop.xlane.xlu0 %4454 }
0x1caf   :  { %9321 = vrcp.f32 %v4455_v60 }
0x1cbc   :  { %v9322_v37 = vpop.eup %9321 }
0x1cbd   :  { %v4457_v13 = vmul.f32 %v9322_v37, %v9320_v11 }
0x1cbf   :  { %9109 = vmatmul.mubr.msk.f32.vlgmr.msra.gmra.mxu0 %vm419_vm4, %v4457_v13 }
0x1cc0   :  { %9119 = vmatpush3.msra.mxu0 %v10535_v46  ;;  %9122 = vmatprep.mubr.msk.f32.mxu0 %vm9413_vm2, %v9412_v23 }
0x1cc1   :  { %9120 = vmatprep.subr.mxu0 %v9412_v23 }
0x1cc2   :  { %9121 = vmatpush3.msra.mxu0 %v10539_v61 }
0x1cc3   :  { %9123 = vmatmul.mubr.msk.f32.vlgmr.msra.gmra.mxu0 %vm343_vm3, %v4364_v41  ;;  %9130 = vmatprep.subr.mxu0 %v9412_v23 }
0x1cc4   :  { %9132 = vmatprep.mubr.msk.f32.mxu0 %vm9413_vm2, %v9412_v23 }
0x1cd7   :  { %v4062_v0 = vpop.xlane.xlu0 %4061 }
0x1cd8   :  { %v4064_v7 = vmul.f32 0.015625, %v4062_v0 }
0x1cda   :  { %v4066_v9 = vadd.f32 1e-05, %v4064_v7 }
0x1cdb   :  { %v4684_v32 = vpop.permute.xlu0 %4683 }
0x1cdc   :  { %9323 = vrsqrt.f32 %v4066_v9  ;;  %v10618_v9 = vld [vmem:[%s11316_s8 + $0x38] sm:$0xff] }
0x1ce9   :  { %v9324_v4 = vpop.eup %9323 }
0x1cea   :  { %v4070_v15 = vmul.f32 %v9324_v4, %v4054_v54  ;;  %v10621_v4 = vld [vmem:[%s11316_s8 + $0x30] sm:$0xff] }
0x1cec   :  { %v4078_v8 = vmul.f32 %v10462_v38, %v4070_v15  ;;  %v4682_v38 = vpop.permute.xlu1 %4681 }
0x1cee   :  { %v10552_v17 = vadd.f32 %v10465_v12, %v4078_v8 }
0x1cf0   :  { %8156 = vmatmul.mubr.msk.f32.gmra.mxu1 %vm248_vm1, %v10552_v17 }
0x1cf1   :  { %9115 = vmatprep.mubr.msk.f32.mxu1 %vm9413_vm2, %v9412_v23 }
0x1d7f   :  { %v4531_v18 = vpop.f32.mrf.mxu0 }
0x1d80   :  { %9116 = vmatmul.mubr.msk.f32.vlgmr.msra.gmra.mxu1 %vm343_vm3, %v4531_v18 }
0x1d81   :  { %9126 = vmatpush3.xpose.msk.msra.mxu1 %vm343_vm3, %v4684_v32  ;;  %v9110_v19 = vpop.f32.mrf.mxu0  ;;  %9127 = vmatprep.mubr.msk.f32.mxu1 %vm9413_vm2, %v9412_v23 }
0x1d82   :  { %9135 = vmatprep.subr.mxu1 %v9412_v23 }
0x1d83   :  { %v10563_v12 = vpop.f32.mrf.mxu0 }
0x1d84   :  { %9128 = vmatmul.mubr.msk.f32.vlgmr.msra.gmra.mxu1 %vm343_vm3, %v4682_v38 }
0x1d85   :  { %v9124_v56 = vpop.f32.mrf.mxu0  ;;  %9139 = vmatprep.mubr.msk.f32.mxu1 %vm9413_vm2, %v9412_v23  ;;  %9136 = vmatpush3.msra.mxu1 %v10580_v45 }
0x1d86   :  { %9137 = vmatprep.subr.mxu1 %v9412_v23 }
0x1d87   :  { %9138 = vmatpush3.msra.mxu1 %v10593_v49 }
0x1d88   :  { %9147 = vmatprep.subr.mxu1 %v9412_v23 }
0x1db0   :  { %v4193_v26 = vpop.f32.mrf.mxu1 }
0x1db1   :  { %v10604_v27 = vadd.f32 %v4193_v26, %v10476_v30 }
0x1db2   :  { %v10568_v59 = vpop.f32.mrf.mxu1 }
0x1e40   :  { %v4604_v40 = vpop.f32.mrf.mxu1 }
0x1e41   :  { %v4678_v37 = vadd.f32 %v10563_v12, %v4604_v40  ;;  %v10647_v12 = vadd.f32 %v10568_v59, %v10484_v20 }
0x1e42   :  { %v9117_v22 = vpop.f32.mrf.mxu1 }
0x1e44   :  { %v4755_v25 = vpop.f32.mrf.mxu1 }
0x1e45   :  { %v4759_v24 = vmul.f32 0.25, %v4755_v25 }
0x1e46   :  { %v9129_v21 = vpop.f32.mrf.mxu1 }
0x1e47   :  { %v4760_v63 = vsel %vm419_vm4, %v4759_v24, -inf }
0x1e48   :  { %4761 = vmax.xlane.f32.xlu0 %v4760_v63 }
0x1e5e   :  { %4771 = vrot.lane.b32.xlu0 %v10489_v53, %s9417_s13 }
0x1e62   :  { %4921 = vrot.lane.b32.xlu0 %v10479_v16, %s9419_s21 }
0x1ed1   :  { %v4762_v29 = vpop.xlane.xlu0 %4761 }
0x1ed2   :  { %v4763_v34 = vsub.f32 %v4759_v24, %v4762_v29 }
0x1ed4   :  { %v4764_v36 = vmul.f32 1.442695, %v4763_v34 }
0x1ed5   :  { %v4772_v41 = vpop.permute.xlu0 %4771 }
0x1ed6   :  { %9325 = vpow2.f32 %v4764_v36  ;;  %9131 = vmatpush3.msra.mxu0 %v4772_v41 }
0x1ed7   :  { %9142 = vmatprep.subr.mxu0 %v9412_v23 }
0x1ee3   :  { %v9326_v43 = vpop.eup %9325 }
0x1ee4   :  { %v4766_v44 = vsel %vm419_vm4, %v9326_v43, 0.0 }
0x1ee5   :  { %4767 = vadd.xlane.f32.xlu1 %v4766_v44 }
0x1ef6   :  { %4923 = vrot.lane.b32.xlu1 %v10479_v16, %s9420_s27  ;;  %v4922_v16 = vpop.permute.xlu0 %4921 }
0x1f6e   :  { %v4768_v35 = vpop.xlane.xlu1 %4767 }
0x1f6f   :  { %9327 = vrcp.f32 %v4768_v35 }
0x1f72   :  { %v4924_v33 = vpop.permute.xlu1 %4923 }
0x1f7c   :  { %v9328_v47 = vpop.eup %9327 }
0x1f7d   :  { %v4770_v48 = vmul.f32 %v9328_v47, %v9326_v43 }
0x1f7f   :  { %9133 = vmatmul.mubr.msk.f32.vlgmr.msra.gmra.mxu0 %vm419_vm4, %v4770_v48 }
0x1f80   :  { %9143 = vmatpush3.xpose.msk.msra.mxu0 %vm343_vm3, %v4924_v33  ;;  %9144 = vmatprep.mubr.msk.f32.mxu0 %vm9413_vm2, %v9412_v23 }
0x1f81   :  { %9152 = vmatprep.subr.mxu0 %v9412_v23 }
0x1f83   :  { %9145 = vmatmul.mubr.msk.f32.vlgmr.msra.gmra.mxu0 %vm343_vm3, %v4922_v16 }
0x1f84   :  { %9156 = vmatprep.mubr.msk.f32.mxu0 %vm9413_vm2, %v9412_v23  ;;  %9153 = vmatpush3.msra.mxu0 %v10618_v9 }
0x1f85   :  { %9154 = vmatprep.subr.mxu0 %v9412_v23 }
0x1f86   :  { %9155 = vmatpush3.msra.mxu0 %v10621_v4 }
0x1f87   :  { %9164 = vmatprep.subr.mxu0 %v9412_v23 }
0x203f   :  { %v4843_v51 = vpop.f32.mrf.mxu0 }
0x2040   :  { %9140 = vmatmul.mubr.msk.f32.vlgmr.msra.gmra.mxu1 %vm343_vm3, %v4843_v51 }
0x2041   :  { %v9134_v52 = vpop.f32.mrf.mxu0  ;;  %9149 = vmatprep.mubr.msk.f32.mxu1 %vm9413_vm2, %v9412_v23 }
0x2043   :  { %v4995_v10 = vpop.f32.mrf.mxu0 }
0x2044   :  { %v4999_v11 = vmul.f32 0.25, %v4995_v10 }
0x2045   :  { %v9146_v28 = vpop.f32.mrf.mxu0 }
0x2046   :  { %v5000_v5 = vsel %vm419_vm4, %v4999_v11, -inf }
0x2047   :  { %5001 = vmax.xlane.f32.xlu0 %v5000_v5 }
0x205d   :  { %5011 = vrot.lane.b32.xlu0 %v10489_v53, %s9419_s21 }
0x2061   :  { %5326 = vrot.lane.b32.xlu0 %v10604_v27, %s9414_s0 }
0x2065   :  { %5324 = vrot.lane.b32.xlu0 %v10604_v27, %s9416_s9 }
0x20d0   :  { %v5002_v54 = vpop.xlane.xlu0 %5001 }
0x20d1   :  { %v5003_v55 = vsub.f32 %v4999_v11, %v5002_v54 }
0x20d3   :  { %v5004_v57 = vmul.f32 1.442695, %v5003_v55 }
0x20d4   :  { %v5012_v60 = vpop.permute.xlu0 %5011 }
0x20d5   :  { %9329 = vpow2.f32 %v5004_v57  ;;  %9148 = vmatpush3.msra.mxu1 %v5012_v60 }
0x20d6   :  { %9159 = vmatprep.subr.mxu1 %v9412_v23 }
0x20d8   :  { %v5327_v19 = vpop.permute.xlu0 %5326 }
0x20dc   :  { %v5325_v38 = vpop.permute.xlu0 %5324 }
0x20e2   :  { %v9330_v53 = vpop.eup %9329 }
0x20e3   :  { %v5006_v30 = vsel %vm419_vm4, %v9330_v53, 0.0 }
0x20e4   :  { %5007 = vadd.xlane.f32.xlu1 %v5006_v30 }
0x20f5   :  { %5163 = vrot.lane.b32.xlu1 %v10604_v27, %s9415_s5 }
0x2100   :  { %v4916_v13 = vpop.f32.mrf.mxu1 }
0x2101   :  { %v10615_v0 = vadd.f32 %v4916_v13, %v4678_v37 }
0x2102   :  { %v9141_v7 = vpop.f32.mrf.mxu1 }
0x216d   :  { %v5008_v15 = vpop.xlane.xlu1 %5007 }
0x216e   :  { %9331 = vrcp.f32 %v5008_v15 }
0x2171   :  { %v5164_v32 = vpop.permute.xlu1 %5163 }
0x217b   :  { %v9332_v8 = vpop.eup %9331 }
0x217c   :  { %v5010_v18 = vmul.f32 %v9332_v8, %v9330_v53 }
0x217e   :  { %9150 = vmatmul.mubr.msk.f32.vlgmr.msra.gmra.mxu1 %vm419_vm4, %v5010_v18 }
0x217f   :  { %9160 = vmatpush3.xpose.msk.msra.mxu1 %vm343_vm3, %v5164_v32  ;;  %9161 = vmatprep.mubr.msk.f32.mxu1 %vm9413_vm2, %v9412_v23 }
0x2180   :  { %9169 = vmatprep.subr.mxu1 %v9412_v23 }
0x2182   :  { %9162 = vmatmul.mubr.msk.f32.vlgmr.msra.gmra.mxu1 %vm343_vm3, %v10604_v27 }
0x2183   :  { %9170 = vmatpush3.xpose.msk.msra.mxu1 %vm343_vm3, %v5327_v19  ;;  %9171 = vmatprep.mubr.msk.f32.mxu1 %vm9413_vm2, %v9412_v23 }
0x2184   :  { %9179 = vmatprep.subr.mxu1 %v9412_v23 }
0x2186   :  { %9172 = vmatmul.mubr.msk.f32.vlgmr.msra.gmra.mxu1 %vm343_vm3, %v5325_v38 }
0x2187   :  { %9180 = vmatpush3.msra.mxu1 %v10525_v58  ;;  %9183 = vmatprep.mubr.msk.f32.mxu1 %vm9413_vm2, %v9412_v23 }
0x2188   :  { %9181 = vmatprep.subr.mxu1 %v9412_v23 }
0x2189   :  { %9182 = vmatpush3.msra.mxu1 %v10528_v42 }
0x218a   :  { %9193 = vmatprep.subr.mxu1 %v9412_v23 }
0x223e   :  { %v5083_v56 = vpop.f32.mrf.mxu1 }
0x223f   :  { %9157 = vmatmul.mubr.msk.f32.vlgmr.msra.gmra.mxu0 %vm343_vm3, %v5083_v56 }
0x2240   :  { %9165 = vmatpush3.msra.mxu0 %v10647_v12  ;;  %v9151_v26 = vpop.f32.mrf.mxu1  ;;  %9166 = vmatprep.mubr.msk.f32.mxu0 %vm9413_vm2, %v9412_v23 }
0x2241   :  { %9174 = vmatprep.subr.mxu0 %v9412_v23 }
0x2242   :  { %v5235_v58 = vpop.f32.mrf.mxu1 }
0x2243   :  { %v5239_v40 = vmul.f32 0.25, %v5235_v58 }
0x2244   :  { %v9163_v42 = vpop.f32.mrf.mxu1 }
0x2245   :  { %v5240_v22 = vsel %vm419_vm4, %v5239_v40, -inf }
0x2246   :  { %5241 = vmax.xlane.f32.xlu0 %v5240_v22  ;;  %v5398_v25 = vpop.f32.mrf.mxu1 }
0x2247   :  { %v5402_v20 = vmul.f32 0.25, %v5398_v25 }
0x2248   :  { %v9173_v59 = vpop.f32.mrf.mxu1 }
0x2249   :  { %v5403_v24 = vsel %vm419_vm4, %v5402_v20, -inf }
0x224a   :  { %5404 = vmax.xlane.f32.xlu1 %v5403_v24 }
0x225b   :  { %5415 = vrot.lane.b32.xlu1 %v10647_v12, %s9416_s9 }
0x225f   :  { %5637 = vrot.lane.b32.xlu1 %v10604_v27, %s9417_s13 }
0x22cf   :  { %v5242_v21 = vpop.xlane.xlu0 %5241 }
0x22d0   :  { %v5243_v63 = vsub.f32 %v5239_v40, %v5242_v21 }
0x22d2   :  { %v5244_v29 = vmul.f32 1.442695, %v5243_v63 }
0x22d3   :  { %v5405_v34 = vpop.xlane.xlu1 %5404 }
0x22d4   :  { %9333 = vpow2.f32 %v5244_v29  ;;  %v5406_v36 = vsub.f32 %v5402_v20, %v5405_v34 }
0x22d6   :  { %v5407_v41 = vmul.f32 1.442695, %v5406_v36 }
0x22d7   :  { %v5416_v28 = vpop.permute.xlu1 %5415 }
0x22d8   :  { %9335 = vpow2.f32 %v5407_v41  ;;  %v8189_v41 = vld [vmem:[%s11317_s14] ss:$0 sm:$0xff] }
0x22e1   :  { %v9334_v43 = vpop.eup %9333 }
0x22e2   :  { %v5246_v44 = vsel %vm419_vm4, %v9334_v43, 0.0 }
0x22e3   :  { %5247 = vadd.xlane.f32.xlu0 %v5246_v44 }
0x22e5   :  { %v9336_v35 = vpop.eup %9335 }
0x22e6   :  { %v5409_v47 = vsel %vm419_vm4, %v9336_v35, 0.0 }
0x22e7   :  { %5410 = vadd.xlane.f32.xlu0 %v5409_v47 }
0x22fd   :  { %5639 = vrot.lane.b32.xlu0 %v10604_v27, %s9418_s17 }
0x22ff   :  { %v5156_v48 = vpop.f32.mrf.mxu0 }
0x2300   :  { %v5160_v33 = vadd.f32 %v5156_v48, %v10615_v0 }
0x2301   :  { %v9158_v16 = vpop.f32.mrf.mxu0 }
0x2302   :  { %5161 = vst.msk [vmem:[#allocation2] sm:$0xff] %vm248_vm1, %v5160_v33 }
0x2309   :  { %v6118_v36 = vld [vmem:[#allocation2] sm:$0xff] }
0x236c   :  { %v5248_v51 = vpop.xlane.xlu0 %5247 }
0x236d   :  { %9337 = vrcp.f32 %v5248_v51 }
0x2370   :  { %v5411_v52 = vpop.xlane.xlu0 %5410 }
0x2371   :  { %9339 = vrcp.f32 %v5411_v52 }
0x2374   :  { %v5640_v53 = vpop.permute.xlu0 %5639 }
0x237a   :  { %v9338_v10 = vpop.eup %9337 }
0x237b   :  { %v5250_v11 = vmul.f32 %v9338_v10, %v9334_v43  ;;  %v6127_v43 = vadd.f32 %v8189_v41, %v6118_v36  ;;  %v6176_v36 = vld [vmem:[%s11318_s19 + $0x8] sm:$0xff] }
0x237d   :  { %9167 = vmatmul.mubr.msk.f32.vlgmr.msra.gmra.mxu0 %vm419_vm4, %v5250_v11  ;;  %v6129_v47 = vadd.f32 %v6127_v43, %v10469_v62  ;;  %v6175_v43 = vld [vmem:[%s11318_s19] sm:$0xff] }
0x237e   :  { %v9340_v5 = vpop.eup %9339  ;;  %9175 = vmatpush3.msra.mxu0 %v5416_v28  ;;  %9176 = vmatprep.mubr.msk.f32.mxu0 %vm9413_vm2, %v9412_v23 }
0x237f   :  { %v5413_v54 = vmul.f32 %v9340_v5, %v9336_v35  ;;  %9186 = vmatprep.subr.mxu0 %v9412_v23  ;;  %v6133_v48 = vsel %vm248_vm1, %v6129_v47, 0.0 }
0x2381   :  { %9177 = vmatmul.mubr.msk.f32.vlgmr.msra.gmra.mxu0 %vm419_vm4, %v5413_v54 }
0x2382   :  { %9187 = vmatpush3.msra.mxu0 %v10535_v46  ;;  %9190 = vmatprep.mubr.msk.f32.mxu0 %vm9413_vm2, %v9412_v23 }
0x2383   :  { %9188 = vmatprep.subr.mxu0 %v9412_v23 }
0x2384   :  { %9189 = vmatpush3.msra.mxu0 %v10539_v61  ;;  %v5638_v61 = vpop.permute.xlu1 %5637 }
0x2385   :  { %9198 = vmatprep.subr.mxu0 %v9412_v23 }
0x243d   :  { %v5320_v55 = vpop.f32.mrf.mxu0 }
0x243e   :  { %9191 = vmatmul.mubr.msk.f32.vlgmr.msra.gmra.mxu0 %vm343_vm3, %v5320_v55 }
0x243f   :  { %v9168_v57 = vpop.f32.mrf.mxu0  ;;  %9200 = vmatprep.mubr.msk.f32.mxu0 %vm9413_vm2, %v9412_v23 }
0x2441   :  { %v5487_v60 = vpop.f32.mrf.mxu0 }
0x2442   :  { %9184 = vmatmul.mubr.msk.f32.vlgmr.msra.gmra.mxu1 %vm343_vm3, %v5487_v60 }
0x2443   :  { %9194 = vmatpush3.xpose.msk.msra.mxu1 %vm343_vm3, %v5640_v53  ;;  %v9178_v46 = vpop.f32.mrf.mxu0  ;;  %9195 = vmatprep.mubr.msk.f32.mxu1 %vm9413_vm2, %v9412_v23 }
0x2444   :  { %9203 = vmatprep.subr.mxu1 %v9412_v23 }
0x2446   :  { %9196 = vmatmul.mubr.msk.f32.vlgmr.msra.gmra.mxu1 %vm343_vm3, %v5638_v61 }
0x2447   :  { %9204 = vmatpush3.msra.mxu1 %v10580_v45  ;;  %9207 = vmatprep.mubr.msk.f32.mxu1 %vm9413_vm2, %v9412_v23 }
0x2448   :  { %9205 = vmatprep.subr.mxu1 %v9412_v23 }
0x2449   :  { %9206 = vmatpush3.msra.mxu1 %v10593_v49 }
0x244a   :  { %9215 = vmatprep.subr.mxu1 %v9412_v23 }
0x24fe   :  { %v5633_v30 = vpop.f32.mrf.mxu0 }
0x2500   :  { %v9192_v37 = vpop.f32.mrf.mxu0 }
0x2502   :  { %v5560_v13 = vpop.f32.mrf.mxu1 }
0x2503   :  { %v5634_v0 = vadd.f32 %v5633_v30, %v5560_v13 }
0x2504   :  { %v9185_v7 = vpop.f32.mrf.mxu1 }
0x2505   :  { %v6290_v7 = vld [vmem:[%s11318_s19 + $0x398] sm:$0xff] }
0x2506   :  { %v5711_v15 = vpop.f32.mrf.mxu1 }
0x2507   :  { %v5715_v8 = vmul.f32 0.25, %v5711_v15  ;;  %v6289_v15 = vld [vmem:[%s11318_s19 + $0x390] sm:$0xff] }
0x2508   :  { %v9197_v18 = vpop.f32.mrf.mxu1 }
0x2509   :  { %v5716_v32 = vsel %vm419_vm4, %v5715_v8, -inf  ;;  %v6274_v18 = vld [vmem:[%s11318_s19 + $0x318] sm:$0xff] }
0x250a   :  { %5717 = vmax.xlane.f32.xlu1 %v5716_v32  ;;  %v6271_v32 = vld [vmem:[%s11318_s19 + $0x300] sm:$0xff] }
0x251b   :  { %5879 = vrot.lane.b32.xlu1 %v10604_v27, %s9420_s27 }
0x251f   :  { %5877 = vrot.lane.b32.xlu1 %v10604_v27, %s9419_s21 }
0x2593   :  { %v5718_v45 = vpop.xlane.xlu1 %5717 }
0x2594   :  { %v5719_v49 = vsub.f32 %v5715_v8, %v5718_v45  ;;  %v6272_v8 = vld [vmem:[%s11318_s19 + $0x308] sm:$0xff]  ;;  %v6273_v45 = vld [vmem:[%s11318_s19 + $0x310] sm:$0xff] }
0x2596   :  { %v5720_v19 = vmul.f32 1.442695, %v5719_v49  ;;  %v6256_v49 = vld [vmem:[%s11318_s19 + $0x288] sm:$0xff] }
0x2597   :  { %v5880_v42 = vpop.permute.xlu1 %5879 }
0x2598   :  { %9341 = vpow2.f32 %v5720_v19  ;;  %v6258_v19 = vld [vmem:[%s11318_s19 + $0x298] sm:$0xff] }
0x259b   :  { %v5878_v22 = vpop.permute.xlu1 %5877 }
0x25a5   :  { %v9342_v38 = vpop.eup %9341 }
0x25a6   :  { %v5722_v56 = vsel %vm419_vm4, %v9342_v38, 0.0 }
0x25a7   :  { %5723 = vadd.xlane.f32.xlu0 %v5722_v56  ;;  %v6257_v56 = vld [vmem:[%s11318_s19 + $0x290] sm:$0xff] }
0x25bd   :  { %5727 = vrot.lane.b32.xlu0 %v10647_v12, %s9417_s13 }
0x2630   :  { %v5724_v26 = vpop.xlane.xlu0 %5723 }
0x2631   :  { %9343 = vrcp.f32 %v5724_v26  ;;  %v6240_v26 = vld [vmem:[%s11318_s19 + $0x208] sm:$0xff] }
0x2634   :  { %v5728_v58 = vpop.permute.xlu0 %5727 }
0x2635   :  { %9199 = vmatpush3.msra.mxu0 %v5728_v58  ;;  %v6242_v58 = vld [vmem:[%s11318_s19 + $0x218] sm:$0xff] }
0x2636   :  { %9210 = vmatprep.subr.mxu0 %v9412_v23 }
0x263e   :  { %v9344_v40 = vpop.eup %9343 }
0x263f   :  { %v5726_v27 = vmul.f32 %v9344_v40, %v9342_v38  ;;  %v6255_v38 = vld [vmem:[%s11318_s19 + $0x280] sm:$0xff] }
0x2640   :  { %v6239_v40 = vld [vmem:[%s11318_s19 + $0x200] sm:$0xff] }
0x2641   :  { %9201 = vmatmul.mubr.msk.f32.vlgmr.msra.gmra.mxu0 %vm419_vm4, %v5726_v27  ;;  %v6224_v27 = vld [vmem:[%s11318_s19 + $0x188] sm:$0xff] }
0x2642   :  { %9211 = vmatpush3.xpose.msk.msra.mxu0 %vm343_vm3, %v5880_v42  ;;  %9212 = vmatprep.mubr.msk.f32.mxu0 %vm9413_vm2, %v9412_v23  ;;  %v6241_v42 = vld [vmem:[%s11318_s19 + $0x210] sm:$0xff] }
0x2643   :  { %9220 = vmatprep.subr.mxu0 %v9412_v23 }
0x2645   :  { %9213 = vmatmul.mubr.msk.f32.vlgmr.msra.gmra.mxu0 %vm343_vm3, %v5878_v22  ;;  %v6226_v22 = vld [vmem:[%s11318_s19 + $0x198] sm:$0xff] }
0x2646   :  { %9221 = vmatpush3.msra.mxu0 %v10618_v9  ;;  %9224 = vmatprep.mubr.msk.f32.mxu0 %vm9413_vm2, %v9412_v23 }
0x2647   :  { %9222 = vmatprep.subr.mxu0 %v9412_v23 }
0x2648   :  { %9223 = vmatpush3.msra.mxu0 %v10621_v4 }
0x2649   :  { %6486 = vmatprep.subr.mxu0 %v6290_v7  ;;  %v6259_v7 = vld [vmem:[%s11318_s19 + $0x2a0] sm:$0xff] }
0x2701   :  { %v5799_v25 = vpop.f32.mrf.mxu0 }
0x2702   :  { %9208 = vmatmul.mubr.msk.f32.vlgmr.msra.gmra.mxu1 %vm343_vm3, %v5799_v25  ;;  %v6223_v25 = vld [vmem:[%s11318_s19 + $0x180] sm:$0xff] }
0x2703   :  { %v9202_v20 = vpop.f32.mrf.mxu0  ;;  %9217 = vmatprep.mubr.msk.f32.mxu1 %vm9413_vm2, %v9412_v23 }
0x2704   :  { %v6225_v20 = vld [vmem:[%s11318_s19 + $0x190] sm:$0xff] }
0x2705   :  { %v5951_v59 = vpop.f32.mrf.mxu0 }
0x2706   :  { %v5955_v24 = vmul.f32 0.25, %v5951_v59  ;;  %v6208_v59 = vld [vmem:[%s11318_s19 + $0x108] sm:$0xff] }
0x2707   :  { %v9214_v21 = vpop.f32.mrf.mxu0 }
0x2708   :  { %v5956_v9 = vsel %vm419_vm4, %v5955_v24, -inf  ;;  %v6207_v21 = vld [vmem:[%s11318_s19 + $0x100] sm:$0xff] }
0x2709   :  { %5957 = vmax.xlane.f32.xlu0 %v5956_v9  ;;  %v6209_v9 = vld [vmem:[%s11318_s19 + $0x110] sm:$0xff] }
0x271f   :  { %5967 = vrot.lane.b32.xlu0 %v10647_v12, %s9419_s21 }
0x2792   :  { %v5958_v63 = vpop.xlane.xlu0 %5957 }
0x2793   :  { %v5959_v29 = vsub.f32 %v5955_v24, %v5958_v63  ;;  %v6210_v24 = vld [vmem:[%s11318_s19 + $0x118] sm:$0xff]  ;;  %v6192_v63 = vld [vmem:[%s11318_s19 + $0x88] sm:$0xff] }
0x2795   :  { %v5960_v4 = vmul.f32 1.442695, %v5959_v29  ;;  %v6194_v29 = vld [vmem:[%s11318_s19 + $0x98] sm:$0xff] }
0x2796   :  { %v5968_v34 = vpop.permute.xlu0 %5967 }
0x2797   :  { %9345 = vpow2.f32 %v5960_v4  ;;  %9216 = vmatpush3.msra.mxu1 %v5968_v34  ;;  %v6191_v4 = vld [vmem:[%s11318_s19 + $0x80] sm:$0xff]  ;;  %v6193_v34 = vld [vmem:[%s11318_s19 + $0x90] sm:$0xff] }
0x27a4   :  { %v9346_v44 = vpop.eup %9345 }
0x27a5   :  { %v5962_v35 = vsel %vm419_vm4, %v9346_v44, 0.0 }
0x27a6   :  { %5963 = vadd.xlane.f32.xlu1 %v5962_v35 }
0x27aa   :  { %6134 = vadd.xlane.f32.xlu1 %v6133_v48 }
0x27c2   :  { %v5872_v33 = vpop.f32.mrf.mxu1 }
0x27c3   :  { %v5876_v12 = vadd.f32 %v5872_v33, %v5634_v0  ;;  %v6288_v0 = vld [vmem:[%s11318_s19 + $0x388] sm:$0xff] }
0x27c4   :  { %v9209_v16 = vpop.f32.mrf.mxu1  ;;  %6409 = vmatprep.subr.mxu1 %v6288_v0  ;;  %v6262_v0 = vld [vmem:[%s11318_s19 + $0x2b8] sm:$0xff] }
0x282f   :  { %v5964_v51 = vpop.xlane.xlu1 %5963 }
0x2830   :  { %9347 = vrcp.f32 %v5964_v51 }
0x2833   :  { %v6135_v55 = vpop.xlane.xlu1 %6134 }
0x2834   :  { %v6139_v57 = vmul.f32 0.015625, %v6135_v55  ;;  %v6292_v55 = vld [vmem:[%s11318_s19 + $0x3a8] sm:$0xff] }
0x2836   :  { %v10727_v53 = vsub.f32 %v6129_v47, %v6139_v57  ;;  %v6294_v57 = vld [vmem:[%s11318_s19 + $0x3b8] sm:$0xff] }
0x2838   :  { %v6143_v37 = vmul.f32 %v10727_v53, %v10727_v53 }
0x283a   :  { %v6145_v13 = vsel %vm248_vm1, %v6143_v37, 0.0  ;;  %v6277_v37 = vld [vmem:[%s11318_s19 + $0x330] sm:$0xff] }
0x283d   :  { %v9348_v52 = vpop.eup %9347 }
0x283e   :  { %v5966_v10 = vmul.f32 %v9348_v52, %v9346_v44  ;;  %v6177_v44 = vld [vmem:[%s11318_s19 + $0x10] sm:$0xff] }
0x2840   :  { %9218 = vmatmul.mubr.msk.f32.vlgmr.msra.gmra.mxu1 %vm419_vm4, %v5966_v10 }
0x2841   :  { %6457 = vmatprep.mubr.f32.mxu1 %v9412_v23 }
0x2900   :  { %v6039_v11 = vpop.f32.mrf.mxu1 }
0x2901   :  { %9225 = vmatmul.mubr.msk.f32.vlgmr.msra.gmra.mxu0 %vm343_vm3, %v6039_v11  ;;  %v10776_v11 = vld [vmem:[%s11319_s24] ss:$0 sm:$0xff] }
0x2902   :  { %v9219_v28 = vpop.f32.mrf.mxu1  ;;  %6534 = vmatprep.mubr.f32.mxu0 %v9412_v23  ;;  %6487 = vmatpush1.msra.mxu0 %v6289_v15  ;;  %v6244_v15 = vld [vmem:[%s11318_s19 + $0x228] sm:$0xff] }
0x2903   :  { %6488 = vmatprep.subr.mxu0 %v6274_v18  ;;  %v6243_v18 = vld [vmem:[%s11318_s19 + $0x220] sm:$0xff] }
0x2904   :  { %6489 = vmatpush1.msra.mxu0 %v6273_v45  ;;  %v6228_v45 = vld [vmem:[%s11318_s19 + $0x1a8] sm:$0xff] }
0x2905   :  { %6490 = vmatprep.subr.mxu0 %v6258_v19  ;;  %v6227_v19 = vld [vmem:[%s11318_s19 + $0x1a0] sm:$0xff] }
0x2906   :  { %6491 = vmatpush1.msra.mxu0 %v6257_v56  ;;  %v6212_v56 = vld [vmem:[%s11318_s19 + $0x128] sm:$0xff] }
0x2907   :  { %6492 = vmatprep.subr.mxu0 %v6242_v58  ;;  %v6211_v58 = vld [vmem:[%s11318_s19 + $0x120] sm:$0xff] }
0x2908   :  { %6493 = vmatpush1.msra.mxu0 %v6241_v42  ;;  %v6196_v42 = vld [vmem:[%s11318_s19 + $0xa8] sm:$0xff] }
0x2909   :  { %6494 = vmatprep.subr.mxu0 %v6226_v22  ;;  %v6195_v22 = vld [vmem:[%s11318_s19 + $0xa0] sm:$0xff] }
0x290a   :  { %6495 = vmatpush1.msra.mxu0 %v6225_v20  ;;  %v6180_v20 = vld [vmem:[%s11318_s19 + $0x28] sm:$0xff] }
0x290b   :  { %6496 = vmatprep.subr.mxu0 %v6210_v24  ;;  %v6179_v24 = vld [vmem:[%s11318_s19 + $0x20] sm:$0xff] }
0x290c   :  { %6497 = vmatpush1.msra.mxu0 %v6209_v9  ;;  %v6296_v9 = vld [vmem:[%s11318_s19 + $0x3c8] sm:$0xff] }
0x290d   :  { %6498 = vmatprep.subr.mxu0 %v6194_v29 }
0x290e   :  { %6499 = vmatpush1.msra.mxu0 %v6193_v34 }
0x29c1   :  { %v6112_v62 = vpop.f32.mrf.mxu0 }
0x29c2   :  { %v6116_v5 = vadd.f32 %v6112_v62, %v5876_v12  ;;  %v10780_v62 = vld [vmem:[%s11320_s30] ss:$0 sm:$0xff] }
0x29c3   :  { %v9226_v54 = vpop.f32.mrf.mxu0 }
0x29c4   :  { %6117 = vst.msk [vmem:[#allocation2 + $0x8] sm:$0xff] %vm248_vm1, %v6116_v5 }
0x29cb   :  { %v6119_v60 = vld [vmem:[#allocation2 + $0x8] sm:$0xff] }
0x29cc   :  { %v6128_v46 = vadd.f32 %v8189_v41, %v6119_v60  ;;  %v6178_v41 = vld [vmem:[%s11318_s19 + $0x18] sm:$0xff]  ;;  %v6291_v60 = vld [vmem:[%s11318_s19 + $0x3a0] sm:$0xff] }
0x29cd   :  { %6500 = vmatprep.subr.mxu0 %v6178_v41 }
0x29ce   :  { %v10730_v61 = vadd.f32 %v6128_v46, %v10552_v17  ;;  %v6287_v17 = vld [vmem:[%s11318_s19 + $0x380] sm:$0xff]  ;;  %6501 = vmatpush1.msra.mxu0 %v6177_v44  ;;  %v6276_v46 = vld [vmem:[%s11318_s19 + $0x328] sm:$0xff] }
0x29cf   :  { %6410 = vmatpush1.msra.mxu1 %v6287_v17  ;;  %6640 = vmatprep.subr.mxu0 %v6294_v57  ;;  %v6261_v17 = vld [vmem:[%s11318_s19 + $0x2b0] sm:$0xff]  ;;  %v6232_v57 = vld [vmem:[%s11318_s19 + $0x1c8] sm:$0xff] }
0x29d0   :  { %v6136_v30 = vsel %vm248_vm1, %v10730_v61, 0.0  ;;  %6411 = vmatprep.subr.mxu1 %v6272_v8  ;;  %v6246_v8 = vld [vmem:[%s11318_s19 + $0x238] sm:$0xff] }
0x29d1   :  { %6137 = vadd.xlane.f32.xlu1 %v6136_v30  ;;  %6412 = vmatpush1.msra.mxu1 %v6271_v32  ;;  %v6275_v30 = vld [vmem:[%s11318_s19 + $0x320] sm:$0xff]  ;;  %v6245_v32 = vld [vmem:[%s11318_s19 + $0x230] sm:$0xff] }
0x29d2   :  { %6413 = vmatprep.subr.mxu1 %v6256_v49  ;;  %v6230_v49 = vld [vmem:[%s11318_s19 + $0x1b8] sm:$0xff] }
0x29d3   :  { %6414 = vmatpush1.msra.mxu1 %v6255_v38  ;;  %v6229_v38 = vld [vmem:[%s11318_s19 + $0x1b0] sm:$0xff] }
0x29d4   :  { %6415 = vmatprep.subr.mxu1 %v6240_v26  ;;  %v6214_v26 = vld [vmem:[%s11318_s19 + $0x138] sm:$0xff] }
0x29d5   :  { %6146 = vadd.xlane.f32.xlu1 %v6145_v13  ;;  %6416 = vmatpush1.msra.mxu1 %v6239_v40  ;;  %v6260_v13 = vld [vmem:[%s11318_s19 + $0x2a8] sm:$0xff]  ;;  %v6213_v40 = vld [vmem:[%s11318_s19 + $0x130] sm:$0xff] }
0x29d6   :  { %6417 = vmatprep.subr.mxu1 %v6224_v27  ;;  %v6198_v27 = vld [vmem:[%s11318_s19 + $0xb8] sm:$0xff] }
0x29d7   :  { %6418 = vmatpush1.msra.mxu1 %v6223_v25  ;;  %v6197_v25 = vld [vmem:[%s11318_s19 + $0xb0] sm:$0xff] }
0x29d8   :  { %6419 = vmatprep.subr.mxu1 %v6208_v59  ;;  %v6182_v59 = vld [vmem:[%s11318_s19 + $0x38] sm:$0xff] }
0x29d9   :  { %6420 = vmatpush1.msra.mxu1 %v6207_v21  ;;  %v6181_v21 = vld [vmem:[%s11318_s19 + $0x30] sm:$0xff] }
0x29da   :  { %6421 = vmatprep.subr.mxu1 %v6192_v63  ;;  %v6298_v63 = vld [vmem:[%s11318_s19 + $0x3d8] sm:$0xff] }
0x29db   :  { %6422 = vmatpush1.msra.mxu1 %v6191_v4 }
0x29dc   :  { %6423 = vmatprep.subr.mxu1 %v6176_v36 }
0x29dd   :  { %6424 = vmatpush1.msra.mxu1 %v6175_v43 }
0x29de   :  { %6563 = vmatprep.subr.mxu1 %v6292_v55  ;;  %v6249_v55 = vld [vmem:[%s11318_s19 + $0x250] sm:$0xff] }
0x2a5a   :  { %v6138_v35 = vpop.xlane.xlu1 %6137 }
0x2a5b   :  { %v6140_v47 = vmul.f32 0.015625, %v6138_v35  ;;  %v6295_v35 = vld [vmem:[%s11318_s19 + $0x3c0] sm:$0xff] }
0x2a5d   :  { %v10770_v48 = vsub.f32 %v10730_v61, %v6140_v47  ;;  %v6278_v61 = vld [vmem:[%s11318_s19 + $0x338] sm:$0xff]  ;;  %v6297_v47 = vld [vmem:[%s11318_s19 + $0x3d0] sm:$0xff] }
0x2a5e   :  { %v6147_v33 = vpop.xlane.xlu1 %6146 }
0x2a5f   :  { %v6151_v12 = vmul.f32 0.015625, %v6147_v33  ;;  %v6144_v16 = vmul.f32 %v10770_v48, %v10770_v48  ;;  %v6282_v33 = vld [vmem:[%s11318_s19 + $0x358] sm:$0xff] }
0x2a61   :  { %v6153_v51 = vadd.f32 1e-05, %v6151_v12  ;;  %v6148_v52 = vsel %vm248_vm1, %v6144_v16, 0.0  ;;  %v6279_v12 = vld [vmem:[%s11318_s19 + $0x340] sm:$0xff]  ;;  %v6281_v16 = vld [vmem:[%s11318_s19 + $0x350] sm:$0xff] }
0x2a62   :  { %6149 = vadd.xlane.f32.xlu1 %v6148_v52  ;;  %v6266_v52 = vld [vmem:[%s11318_s19 + $0x2d8] sm:$0xff] }
0x2a63   :  { %9349 = vrsqrt.f32 %v6153_v51  ;;  %v6264_v51 = vld [vmem:[%s11318_s19 + $0x2c8] sm:$0xff] }
0x2a70   :  { %v9350_v10 = vpop.eup %9349 }
0x2a71   :  { %v6157_v28 = vmul.f32 %v9350_v10, %v10727_v53  ;;  %v6293_v53 = vld [vmem:[%s11318_s19 + $0x3b0] sm:$0xff]  ;;  %v6263_v10 = vld [vmem:[%s11318_s19 + $0x2c0] sm:$0xff] }
0x2a73   :  { %v6165_v5 = vmul.f32 %v10776_v11, %v6157_v28  ;;  %v6248_v28 = vld [vmem:[%s11318_s19 + $0x248] sm:$0xff] }
0x2a75   :  { %v10784_v54 = vadd.f32 %v10780_v62, %v6165_v5  ;;  %v6247_v5 = vld [vmem:[%s11318_s19 + $0x240] sm:$0xff] }
0x2a77   :  { %8192 = vmatmul.mubr.msk.f32.vlgmr.msra.gmra.mxu1 %vm248_vm1, %v10784_v54  ;;  %8194 = vmatmul.mubr.msk.f32.vlgmr.msra.gmra.mxu0 %vm248_vm1, %v10784_v54 }
0x2a78   :  { %6463 = vmatprep.mubr.f32.mxu1 %v9412_v23  ;;  %6540 = vmatprep.mubr.f32.mxu0 %v9412_v23 }
0x2a79   :  { %6564 = vmatpush1.msra.mxu1 %v6291_v60  ;;  %6641 = vmatpush1.msra.mxu0 %v6293_v53  ;;  %v6234_v60 = vld [vmem:[%s11318_s19 + $0x1d8] sm:$0xff]  ;;  %v6231_v53 = vld [vmem:[%s11318_s19 + $0x1c0] sm:$0xff] }
0x2a7a   :  { %6565 = vmatprep.subr.mxu1 %v6276_v46  ;;  %6642 = vmatprep.subr.mxu0 %v6278_v61  ;;  %v6233_v46 = vld [vmem:[%s11318_s19 + $0x1d0] sm:$0xff]  ;;  %v6216_v61 = vld [vmem:[%s11318_s19 + $0x148] sm:$0xff] }
0x2a7b   :  { %6566 = vmatpush1.msra.mxu1 %v6275_v30  ;;  %6643 = vmatpush1.msra.mxu0 %v6277_v37  ;;  %v6218_v30 = vld [vmem:[%s11318_s19 + $0x158] sm:$0xff]  ;;  %v6215_v37 = vld [vmem:[%s11318_s19 + $0x140] sm:$0xff] }
0x2a7c   :  { %6567 = vmatprep.subr.mxu1 %v6260_v13  ;;  %6644 = vmatprep.subr.mxu0 %v6262_v0  ;;  %v6217_v13 = vld [vmem:[%s11318_s19 + $0x150] sm:$0xff]  ;;  %v6200_v0 = vld [vmem:[%s11318_s19 + $0xc8] sm:$0xff] }
0x2a7d   :  { %6568 = vmatpush1.msra.mxu1 %v6259_v7  ;;  %6645 = vmatpush1.msra.mxu0 %v6261_v17  ;;  %v6202_v7 = vld [vmem:[%s11318_s19 + $0xd8] sm:$0xff]  ;;  %v6199_v17 = vld [vmem:[%s11318_s19 + $0xc0] sm:$0xff] }
0x2a7e   :  { %6569 = vmatprep.subr.mxu1 %v6244_v15  ;;  %6646 = vmatprep.subr.mxu0 %v6246_v8  ;;  %v6201_v15 = vld [vmem:[%s11318_s19 + $0xd0] sm:$0xff]  ;;  %v6184_v8 = vld [vmem:[%s11318_s19 + $0x48] sm:$0xff] }
0x2a7f   :  { %6570 = vmatpush1.msra.mxu1 %v6243_v18  ;;  %6647 = vmatpush1.msra.mxu0 %v6245_v32  ;;  %v6186_v18 = vld [vmem:[%s11318_s19 + $0x58] sm:$0xff]  ;;  %v6183_v32 = vld [vmem:[%s11318_s19 + $0x40] sm:$0xff] }
0x2a80   :  { %6571 = vmatprep.subr.mxu1 %v6228_v45  ;;  %6648 = vmatprep.subr.mxu0 %v6230_v49  ;;  %v6185_v45 = vld [vmem:[%s11318_s19 + $0x50] sm:$0xff]  ;;  %v6300_v49 = vld [vmem:[%s11318_s19 + $0x3e8] sm:$0xff] }
0x2a81   :  { %6572 = vmatpush1.msra.mxu1 %v6227_v19  ;;  %6649 = vmatpush1.msra.mxu0 %v6229_v38  ;;  %v6302_v19 = vld [vmem:[%s11318_s19 + $0x3f8] sm:$0xff]  ;;  %v6299_v38 = vld [vmem:[%s11318_s19 + $0x3e0] sm:$0xff] }
0x2a82   :  { %6573 = vmatprep.subr.mxu1 %v6212_v56  ;;  %6650 = vmatprep.subr.mxu0 %v6214_v26  ;;  %v6301_v56 = vld [vmem:[%s11318_s19 + $0x3f0] sm:$0xff]  ;;  %v6284_v26 = vld [vmem:[%s11318_s19 + $0x368] sm:$0xff] }
0x2a83   :  { %6574 = vmatpush1.msra.mxu1 %v6211_v58  ;;  %6651 = vmatpush1.msra.mxu0 %v6213_v40  ;;  %v6286_v58 = vld [vmem:[%s11318_s19 + $0x378] sm:$0xff]  ;;  %v6283_v40 = vld [vmem:[%s11318_s19 + $0x360] sm:$0xff] }
0x2a84   :  { %6575 = vmatprep.subr.mxu1 %v6196_v42  ;;  %6652 = vmatprep.subr.mxu0 %v6198_v27  ;;  %v6285_v42 = vld [vmem:[%s11318_s19 + $0x370] sm:$0xff]  ;;  %v6268_v27 = vld [vmem:[%s11318_s19 + $0x2e8] sm:$0xff] }
0x2a85   :  { %6576 = vmatpush1.msra.mxu1 %v6195_v22  ;;  %6653 = vmatpush1.msra.mxu0 %v6197_v25  ;;  %v6270_v22 = vld [vmem:[%s11318_s19 + $0x2f8] sm:$0xff]  ;;  %v6267_v25 = vld [vmem:[%s11318_s19 + $0x2e0] sm:$0xff] }
0x2a86   :  { %6577 = vmatprep.subr.mxu1 %v6180_v20  ;;  %6654 = vmatprep.subr.mxu0 %v6182_v59  ;;  %v6269_v20 = vld [vmem:[%s11318_s19 + $0x2f0] sm:$0xff]  ;;  %v6252_v59 = vld [vmem:[%s11318_s19 + $0x268] sm:$0xff] }
0x2a87   :  { %6578 = vmatpush1.msra.mxu1 %v6179_v24  ;;  %6655 = vmatpush1.msra.mxu0 %v6181_v21  ;;  %v6254_v24 = vld [vmem:[%s11318_s19 + $0x278] sm:$0xff]  ;;  %v6251_v21 = vld [vmem:[%s11318_s19 + $0x260] sm:$0xff] }
0x2a88   :  { %6717 = vmatprep.subr.mxu1 %v6296_v9  ;;  %6794 = vmatprep.subr.mxu0 %v6298_v63  ;;  %v6253_v9 = vld [vmem:[%s11318_s19 + $0x270] sm:$0xff]  ;;  %v6236_v63 = vld [vmem:[%s11318_s19 + $0x1e8] sm:$0xff] }
0x2aeb   :  { %v6150_v29 = vpop.xlane.xlu1 %6149 }
0x2aec   :  { %v6152_v4 = vmul.f32 0.015625, %v6150_v29  ;;  %v6238_v29 = vld [vmem:[%s11318_s19 + $0x1f8] sm:$0xff] }
0x2aee   :  { %v6154_v34 = vadd.f32 1e-05, %v6152_v4  ;;  %v6235_v4 = vld [vmem:[%s11318_s19 + $0x1e0] sm:$0xff] }
0x2af0   :  { %9351 = vrsqrt.f32 %v6154_v34  ;;  %v6237_v34 = vld [vmem:[%s11318_s19 + $0x1f0] sm:$0xff] }
0x2afd   :  { %v9352_v36 = vpop.eup %9351 }
0x2afe   :  { %v6158_v41 = vmul.f32 %v9352_v36, %v10770_v48  ;;  %v6280_v48 = vld [vmem:[%s11318_s19 + $0x348] sm:$0xff] }
0x2aff   :  { %v6220_v36 = vld [vmem:[%s11318_s19 + $0x168] sm:$0xff] }
0x2b00   :  { %v6166_v43 = vmul.f32 %v10776_v11, %v6158_v41  ;;  %v6265_v11 = vld [vmem:[%s11318_s19 + $0x2d0] sm:$0xff]  ;;  %v6222_v41 = vld [vmem:[%s11318_s19 + $0x178] sm:$0xff] }
0x2b02   :  { %v10829_v44 = vadd.f32 %v10780_v62, %v6166_v43  ;;  %v6250_v62 = vld [vmem:[%s11318_s19 + $0x258] sm:$0xff]  ;;  %v6219_v43 = vld [vmem:[%s11318_s19 + $0x160] sm:$0xff] }
0x2b04   :  { %8193 = vmatmul.mubr.msk.f32.gmra.mxu1 %vm248_vm1, %v10829_v44  ;;  %8195 = vmatmul.mubr.msk.f32.gmra.mxu0 %vm248_vm1, %v10829_v44 }
0x2b05   :  { %6611 = vmatprep.mubr.f32.mxu1 %v9412_v23  ;;  %6688 = vmatprep.mubr.f32.mxu0 %v9412_v23 }
0x2b08   :  { %8196 = vmatmul.mubr.msk.f32.vlgmr.msra.gmra.mxu1 %vm248_vm1, %v10784_v54  ;;  %8198 = vmatmul.mubr.msk.f32.vlgmr.msra.gmra.mxu0 %vm248_vm1, %v10784_v54 }
0x2b09   :  { %6718 = vmatpush1.msra.mxu1 %v6295_v35  ;;  %6795 = vmatpush1.msra.mxu0 %v6297_v47  ;;  %v6221_v35 = vld [vmem:[%s11318_s19 + $0x170] sm:$0xff]  ;;  %v6204_v47 = vld [vmem:[%s11318_s19 + $0xe8] sm:$0xff] }
0x2b0a   :  { %6719 = vmatprep.subr.mxu1 %v6280_v48  ;;  %6796 = vmatprep.subr.mxu0 %v6282_v33  ;;  %v6206_v48 = vld [vmem:[%s11318_s19 + $0xf8] sm:$0xff]  ;;  %v6203_v33 = vld [vmem:[%s11318_s19 + $0xe0] sm:$0xff] }
0x2b0b   :  { %6720 = vmatpush1.msra.mxu1 %v6279_v12  ;;  %6797 = vmatpush1.msra.mxu0 %v6281_v16  ;;  %v6205_v12 = vld [vmem:[%s11318_s19 + $0xf0] sm:$0xff]  ;;  %v6188_v16 = vld [vmem:[%s11318_s19 + $0x68] sm:$0xff] }
0x2b0c   :  { %6617 = vmatprep.mubr.f32.mxu1 %v9412_v23  ;;  %6694 = vmatprep.mubr.f32.mxu0 %v9412_v23 }
0x2b0d   :  { %6721 = vmatprep.subr.mxu1 %v6264_v51  ;;  %6798 = vmatprep.subr.mxu0 %v6266_v52  ;;  %v6190_v51 = vld [vmem:[%s11318_s19 + $0x78] sm:$0xff]  ;;  %v6187_v52 = vld [vmem:[%s11318_s19 + $0x60] sm:$0xff] }
0x2b0e   :  { %8197 = vmatmul.mubr.msk.f32.gmra.mxu1 %vm248_vm1, %v10829_v44  ;;  %8199 = vmatmul.mubr.msk.f32.gmra.mxu0 %vm248_vm1, %v10829_v44 }
0x2b0f   :  { %6722 = vmatpush1.msra.mxu1 %v6263_v10  ;;  %6799 = vmatpush1.msra.mxu0 %v6265_v11  ;;  %v6189_v10 = vld [vmem:[%s11318_s19 + $0x70] sm:$0xff]  ;;  %v7072_v11 = vld [vmem:[%s11321_s20 + $0xf8] sm:$0xff] }
0x2b10   :  { %6723 = vmatprep.subr.mxu1 %v6248_v28  ;;  %6800 = vmatprep.subr.mxu0 %v6250_v62  ;;  %v7104_v28 = vld [vmem:[%s11321_s20 + $0x1f8] sm:$0xff] }
0x2b11   :  { %6724 = vmatpush1.msra.mxu1 %v6247_v5  ;;  %6801 = vmatpush1.msra.mxu0 %v6249_v55  ;;  %v7056_v62 = vld [vmem:[%s11321_s20 + $0x78] sm:$0xff]  ;;  %v7071_v55 = vld [vmem:[%s11321_s20 + $0xf0] sm:$0xff] }
0x2b12   :  { %6725 = vmatprep.subr.mxu1 %v6232_v57  ;;  %6802 = vmatprep.subr.mxu0 %v6234_v60  ;;  %v7088_v5 = vld [vmem:[%s11321_s20 + $0x178] sm:$0xff]  ;;  %v7103_v57 = vld [vmem:[%s11321_s20 + $0x1f0] sm:$0xff] }
0x2b13   :  { %6726 = vmatpush1.msra.mxu1 %v6231_v53  ;;  %6803 = vmatpush1.msra.mxu0 %v6233_v46  ;;  %v7055_v60 = vld [vmem:[%s11321_s20 + $0x70] sm:$0xff]  ;;  %v7070_v46 = vld [vmem:[%s11321_s20 + $0xe8] sm:$0xff] }
0x2b14   :  { %6727 = vmatprep.subr.mxu1 %v6216_v61  ;;  %6804 = vmatprep.subr.mxu0 %v6218_v30  ;;  %v7087_v53 = vld [vmem:[%s11321_s20 + $0x170] sm:$0xff]  ;;  %v7102_v61 = vld [vmem:[%s11321_s20 + $0x1e8] sm:$0xff] }
0x2b15   :  { %6728 = vmatpush1.msra.mxu1 %v6215_v37  ;;  %6805 = vmatpush1.msra.mxu0 %v6217_v13  ;;  %v7054_v30 = vld [vmem:[%s11321_s20 + $0x68] sm:$0xff]  ;;  %v7069_v13 = vld [vmem:[%s11321_s20 + $0xe0] sm:$0xff] }
0x2b16   :  { %6729 = vmatprep.subr.mxu1 %v6200_v0  ;;  %6806 = vmatprep.subr.mxu0 %v6202_v7  ;;  %v7086_v37 = vld [vmem:[%s11321_s20 + $0x168] sm:$0xff]  ;;  %v7101_v0 = vld [vmem:[%s11321_s20 + $0x1e0] sm:$0xff] }
0x2b17   :  { %6730 = vmatpush1.msra.mxu1 %v6199_v17  ;;  %6807 = vmatpush1.msra.mxu0 %v6201_v15  ;;  %v7053_v7 = vld [vmem:[%s11321_s20 + $0x60] sm:$0xff]  ;;  %v7068_v15 = vld [vmem:[%s11321_s20 + $0xd8] sm:$0xff] }
0x2b18   :  { %6731 = vmatprep.subr.mxu1 %v6184_v8  ;;  %6808 = vmatprep.subr.mxu0 %v6186_v18  ;;  %v7085_v17 = vld [vmem:[%s11321_s20 + $0x160] sm:$0xff]  ;;  %v7100_v8 = vld [vmem:[%s11321_s20 + $0x1d8] sm:$0xff] }
0x2b19   :  { %6732 = vmatpush1.msra.mxu1 %v6183_v32  ;;  %6765 = vmatprep.mubr.f32.mxu1 %v9412_v23  ;;  %v7052_v18 = vld [vmem:[%s11321_s20 + $0x58] sm:$0xff] }
0x2b1a   :  { %6809 = vmatpush1.msra.mxu0 %v6185_v45  ;;  %6842 = vmatprep.mubr.f32.mxu0 %v9412_v23  ;;  %v7084_v32 = vld [vmem:[%s11321_s20 + $0x158] sm:$0xff]  ;;  %v7067_v45 = vld [vmem:[%s11321_s20 + $0xd0] sm:$0xff] }
0x2b1b   :  { %8200 = vmatmul.mubr.msk.f32.vlgmr.msra.gmra.mxu1 %vm248_vm1, %v10784_v54  ;;  %8202 = vmatmul.mubr.msk.f32.vlgmr.msra.gmra.mxu0 %vm248_vm1, %v10784_v54 }
0x2b1c   :  { %6871 = vmatprep.subr.mxu1 %v6300_v49  ;;  %6948 = vmatprep.subr.mxu0 %v6302_v19  ;;  %v7099_v49 = vld [vmem:[%s11321_s20 + $0x1d0] sm:$0xff] }
0x2b1d   :  { %6872 = vmatpush1.msra.mxu1 %v6299_v38  ;;  %6949 = vmatpush1.msra.mxu0 %v6301_v56  ;;  %v7051_v19 = vld [vmem:[%s11321_s20 + $0x50] sm:$0xff] }
0x2b1e   :  { %6873 = vmatprep.subr.mxu1 %v6284_v26  ;;  %6950 = vmatprep.subr.mxu0 %v6286_v58  ;;  %v7083_v38 = vld [vmem:[%s11321_s20 + $0x150] sm:$0xff]  ;;  %v7066_v26 = vld [vmem:[%s11321_s20 + $0xc8] sm:$0xff] }
0x2b1f   :  { %6771 = vmatprep.mubr.f32.mxu1 %v9412_v23  ;;  %6848 = vmatprep.mubr.f32.mxu0 %v9412_v23  ;;  %v7098_v58 = vld [vmem:[%s11321_s20 + $0x1c8] sm:$0xff] }
0x2b20   :  { %6874 = vmatpush1.msra.mxu1 %v6283_v40  ;;  %6951 = vmatpush1.msra.mxu0 %v6285_v42  ;;  %v7050_v42 = vld [vmem:[%s11321_s20 + $0x48] sm:$0xff] }
0x2b21   :  { %8201 = vmatmul.mubr.msk.f32.gmra.mxu1 %vm248_vm1, %v10829_v44  ;;  %8203 = vmatmul.mubr.msk.f32.gmra.mxu0 %vm248_vm1, %v10829_v44 }
0x2b22   :  { %6875 = vmatprep.subr.mxu1 %v6268_v27  ;;  %6952 = vmatprep.subr.mxu0 %v6270_v22  ;;  %v7082_v27 = vld [vmem:[%s11321_s20 + $0x148] sm:$0xff]  ;;  %v10966_v22 = vld [vmem:[%s11322_s7] sm:$0xff] }
0x2b23   :  { %6876 = vmatpush1.msra.mxu1 %v6267_v25  ;;  %6953 = vmatpush1.msra.mxu0 %v6269_v20  ;;  %v7065_v25 = vld [vmem:[%s11321_s20 + $0xc0] sm:$0xff] }
0x2b24   :  { %6877 = vmatprep.subr.mxu1 %v6252_v59  ;;  %6954 = vmatprep.subr.mxu0 %v6254_v24  ;;  %v7097_v20 = vld [vmem:[%s11321_s20 + $0x1c0] sm:$0xff]  ;;  %v10972_v59 = vrot.slane %v10966_v22, %v9634_v39 }
0x2b25   :  { %6878 = vmatpush1.msra.mxu1 %v6251_v21  ;;  %6955 = vmatpush1.msra.mxu0 %v6253_v9  ;;  %v7049_v24 = vld [vmem:[%s11321_s20 + $0x40] sm:$0xff] }
0x2b26   :  { %6879 = vmatprep.subr.mxu1 %v6236_v63  ;;  %6956 = vmatprep.subr.mxu0 %v6238_v29  ;;  %v7081_v21 = vld [vmem:[%s11321_s20 + $0x140] sm:$0xff]  ;;  %v10978_v63 = vrot.slane %v10966_v22, %v10099_v50  ;;  %v7064_v29 = vld [vmem:[%s11321_s20 + $0xb8] sm:$0xff] }
0x2b27   :  { %6880 = vmatpush1.msra.mxu1 %v6235_v4  ;;  %6957 = vmatpush1.msra.mxu0 %v6237_v34  ;;  %v7096_v4 = vld [vmem:[%s11321_s20 + $0x1b8] sm:$0xff] }
0x2b28   :  { %6881 = vmatprep.subr.mxu1 %v6220_v36  ;;  %6958 = vmatprep.subr.mxu0 %v6222_v41  ;;  %v7048_v36 = vld [vmem:[%s11321_s20 + $0x38] sm:$0xff] }
0x2b29   :  { %6882 = vmatpush1.msra.mxu1 %v6219_v43  ;;  %6959 = vmatpush1.msra.mxu0 %v6221_v35  ;;  %v7080_v41 = vld [vmem:[%s11321_s20 + $0x138] sm:$0xff]  ;;  %v7063_v35 = vld [vmem:[%s11321_s20 + $0xb0] sm:$0xff] }
0x2b2a   :  { %6883 = vmatprep.subr.mxu1 %v6204_v47  ;;  %6960 = vmatprep.subr.mxu0 %v6206_v48  ;;  %v7095_v47 = vld [vmem:[%s11321_s20 + $0x1b0] sm:$0xff] }
0x2b2b   :  { %6884 = vmatpush1.msra.mxu1 %v6203_v33  ;;  %6961 = vmatpush1.msra.mxu0 %v6205_v12  ;;  %v7047_v33 = vld [vmem:[%s11321_s20 + $0x30] sm:$0xff] }
0x2b2c   :  { %6885 = vmatprep.subr.mxu1 %v6188_v16  ;;  %6962 = vmatprep.subr.mxu0 %v6190_v51  ;;  %v7079_v12 = vld [vmem:[%s11321_s20 + $0x130] sm:$0xff]  ;;  %v7062_v16 = vld [vmem:[%s11321_s20 + $0xa8] sm:$0xff] }
0x2b2d   :  { %6886 = vmatpush1.msra.mxu1 %v6187_v52  ;;  %6919 = vmatprep.mubr.f32.mxu1 %v9412_v23  ;;  %v7094_v51 = vld [vmem:[%s11321_s20 + $0x1a8] sm:$0xff] }
0x2b2e   :  { %6963 = vmatpush1.msra.mxu0 %v6189_v10  ;;  %6996 = vmatprep.mubr.f32.mxu0 %v9412_v23  ;;  %v7046_v52 = vld [vmem:[%s11321_s20 + $0x28] sm:$0xff] }
0x2b2f   :  { %8204 = vmatmul.mubr.msk.f32.vlgmr.msra.gmra.mxu1 %vm248_vm1, %v10784_v54  ;;  %8206 = vmatmul.mubr.msk.f32.vlgmr.msra.gmra.mxu0 %vm248_vm1, %v10784_v54  ;;  %v7078_v10 = vld [vmem:[%s11321_s20 + $0x128] sm:$0xff] }
0x2b30   :  { %8637 = vmatprep.subr.mxu1 %v7072_v11  ;;  %8675 = vmatprep.subr.mxu0 %v7104_v28  ;;  %v7061_v28 = vld [vmem:[%s11321_s20 + $0xa0] sm:$0xff] }
0x2b31   :  { %8638 = vmatpush3.msra.mxu1 %v7056_v62  ;;  %8676 = vmatpush3.msra.mxu0 %v7088_v5  ;;  %v7093_v62 = vld [vmem:[%s11321_s20 + $0x1a0] sm:$0xff] }
0x2b32   :  { %8639 = vmatprep.subr.mxu1 %v7071_v55  ;;  %8677 = vmatprep.subr.mxu0 %v7103_v57  ;;  %v7045_v55 = vld [vmem:[%s11321_s20 + $0x20] sm:$0xff] }
0x2b33   :  { %6925 = vmatprep.mubr.f32.mxu1 %v9412_v23  ;;  %7002 = vmatprep.mubr.f32.mxu0 %v9412_v23  ;;  %v7077_v57 = vld [vmem:[%s11321_s20 + $0x120] sm:$0xff] }
0x2b34   :  { %8640 = vmatpush3.msra.mxu1 %v7055_v60  ;;  %8678 = vmatpush3.msra.mxu0 %v7087_v53  ;;  %v7060_v60 = vld [vmem:[%s11321_s20 + $0x98] sm:$0xff] }
0x2b35   :  { %8205 = vmatmul.mubr.msk.f32.gmra.mxu1 %vm248_vm1, %v10829_v44  ;;  %8207 = vmatmul.mubr.msk.f32.gmra.mxu0 %vm248_vm1, %v10829_v44  ;;  %v7092_v53 = vld [vmem:[%s11321_s20 + $0x198] sm:$0xff] }
0x2b36   :  { %8641 = vmatprep.subr.mxu1 %v7070_v46  ;;  %8679 = vmatprep.subr.mxu0 %v7102_v61  ;;  %v11002_v46 = vrot.slane %v10966_v22, %v9621_v31  ;;  %v11006_v61 = vrot.slane %v10966_v22, %v10137_v14 }
0x2b37   :  { %8642 = vmatpush3.msra.mxu1 %v7054_v30  ;;  %8680 = vmatpush3.msra.mxu0 %v7086_v37  ;;  %v10957_v56 = vpop.f32.mrf.mxu1  ;;  %v10961_v40 = vpop.f32.mrf.mxu0  ;;  %v7044_v30 = vld [vmem:[%s11321_s20 + $0x18] sm:$0xff] }
0x2b38   :  { %8643 = vmatprep.subr.mxu1 %v7069_v13  ;;  %8681 = vmatprep.subr.mxu0 %v7101_v0  ;;  %v7076_v37 = vld [vmem:[%s11321_s20 + $0x118] sm:$0xff]  ;;  %v7059_v13 = vld [vmem:[%s11321_s20 + $0x90] sm:$0xff] }
0x2b39   :  { %8644 = vmatpush3.msra.mxu1 %v7053_v7  ;;  %8682 = vmatpush3.msra.mxu0 %v7085_v17  ;;  %v6461_v9 = vpop.f32.mrf.mxu1  ;;  %v6538_v34 = vpop.f32.mrf.mxu0  ;;  %v7091_v0 = vld [vmem:[%s11321_s20 + $0x190] sm:$0xff] }
0x2b3a   :  { %8645 = vmatprep.subr.mxu1 %v7068_v15  ;;  %8683 = vmatprep.subr.mxu0 %v7100_v8  ;;  %v6462_v43 = vadd.f32 %v6461_v9, %v10972_v59  ;;  %v6539_v48 = vadd.f32 %v6538_v34, %v10978_v63  ;;  %v7043_v7 = vld [vmem:[%s11321_s20 + $0x10] sm:$0xff]  ;;  %v7058_v15 = vld [vmem:[%s11321_s20 + $0x88] sm:$0xff] }
0x2b3b   :  { %8646 = vmatpush3.msra.mxu1 %v7052_v18  ;;  %8684 = vmatpush3.msra.mxu0 %v7084_v32  ;;  %v7075_v17 = vld [vmem:[%s11321_s20 + $0x110] sm:$0xff]  ;;  %v7090_v8 = vld [vmem:[%s11321_s20 + $0x188] sm:$0xff]  ;;  %v6460_v18 = vadd.f32 %v10957_v56, %v11002_v46  ;;  %v6537_v32 = vadd.f32 %v10961_v40, %v11006_v61  ;;  %v7073_v56 = vld [vmem:[%s11321_s20 + $0x100] sm:$0xff] }
0x2b3c   :  { %8647 = vmatprep.subr.mxu1 %v7067_v45  ;;  %8685 = vmatprep.subr.mxu0 %v7099_v49  ;;  %v7010_v11 = vmax.f32 %v6462_v43, 0.0  ;;  %v7012_v5 = vmax.f32 %v6539_v48, 0.0  ;;  %v7042_v45 = vld [vmem:[%s11321_s20 + $0x8] sm:$0xff]  ;;  %v7119_v9 = vld [vmem:[%s11321_s20 + $0x270] sm:$0xff]  ;;  %v7133_v43 = vld [vmem:[%s11321_s20 + $0x2e0] sm:$0xff] }
0x2b3d   :  { %8648 = vmatpush3.msra.mxu1 %v7051_v19  ;;  %8686 = vmatpush3.msra.mxu0 %v7083_v38  ;;  %v7074_v49 = vld [vmem:[%s11321_s20 + $0x108] sm:$0xff]  ;;  %v7057_v19 = vld [vmem:[%s11321_s20 + $0x80] sm:$0xff]  ;;  %v7011_v40 = vmax.f32 %v6537_v32, 0.0  ;;  %v7143_v32 = vld [vmem:[%s11321_s20 + $0x330] sm:$0xff] }
0x2b3e   :  { %8649 = vmatprep.subr.mxu1 %v7066_v26  ;;  %8687 = vmatprep.subr.mxu0 %v7098_v58  ;;  %v7089_v38 = vld [vmem:[%s11321_s20 + $0x180] sm:$0xff]  ;;  %v7009_v58 = vmax.f32 %v6460_v18, 0.0  ;;  %v7166_v34 = vld [vmem:[%s11321_s20 + $0x3e8] sm:$0xff]  ;;  %v7111_v18 = vld [vmem:[%s11321_s20 + $0x230] sm:$0xff] }
0x2b3f   :  { %8650 = vmatpush3.msra.mxu1 %v7050_v42  ;;  %8688 = vmatpush3.msra.mxu0 %v7082_v27  ;;  %v7041_v26 = vld [vmem:[%s11321_s20] sm:$0xff]  ;;  %v7136_v42 = vld [vmem:[%s11321_s20 + $0x2f8] sm:$0xff] }
0x2b40   :  { %8651 = vmatprep.subr.mxu1 %v7065_v25  ;;  %8689 = vmatprep.subr.mxu0 %v7097_v20  ;;  %v7168_v27 = vld [vmem:[%s11321_s20 + $0x3f8] sm:$0xff]  ;;  %v7149_v48 = vld [vmem:[%s11321_s20 + $0x360] sm:$0xff] }
0x2b41   :  { %8652 = vmatpush3.msra.mxu1 %v7049_v24  ;;  %8690 = vmatpush3.msra.mxu0 %v7081_v21  ;;  %v7120_v25 = vld [vmem:[%s11321_s20 + $0x278] sm:$0xff]  ;;  %v7135_v24 = vld [vmem:[%s11321_s20 + $0x2f0] sm:$0xff] }
0x2b42   :  { %8653 = vmatprep.subr.mxu1 %v7064_v29  ;;  %8691 = vmatprep.subr.mxu0 %v7096_v4  ;;  %v7152_v20 = vld [vmem:[%s11321_s20 + $0x378] sm:$0xff]  ;;  %v7167_v21 = vld [vmem:[%s11321_s20 + $0x3f0] sm:$0xff]  ;;  %v7134_v4 = vld [vmem:[%s11321_s20 + $0x2e8] sm:$0xff] }
0x2b43   :  { %8654 = vmatpush3.msra.mxu1 %v7048_v36  ;;  %8692 = vmatpush3.msra.mxu0 %v7080_v41  ;;  %v7151_v29 = vld [vmem:[%s11321_s20 + $0x370] sm:$0xff]  ;;  %v7118_v36 = vld [vmem:[%s11321_s20 + $0x268] sm:$0xff] }
0x2b44   :  { %8655 = vmatprep.subr.mxu1 %v7063_v35  ;;  %8693 = vmatprep.subr.mxu0 %v7095_v47  ;;  %v7150_v41 = vld [vmem:[%s11321_s20 + $0x368] sm:$0xff]  ;;  %v7165_v35 = vld [vmem:[%s11321_s20 + $0x3e0] sm:$0xff] }
0x2b45   :  { %8656 = vmatpush3.msra.mxu1 %v7047_v33  ;;  %8694 = vmatpush3.msra.mxu0 %v7079_v12  ;;  %v7117_v47 = vld [vmem:[%s11321_s20 + $0x260] sm:$0xff]  ;;  %v7132_v33 = vld [vmem:[%s11321_s20 + $0x2d8] sm:$0xff] }
0x2b46   :  { %8657 = vmatprep.subr.mxu1 %v7062_v16  ;;  %8695 = vmatprep.subr.mxu0 %v7094_v51  ;;  %v7164_v12 = vld [vmem:[%s11321_s20 + $0x3d8] sm:$0xff] }
0x2b47   :  { %8658 = vmatpush3.msra.mxu1 %v7046_v52  ;;  %8696 = vmatpush3.msra.mxu0 %v7078_v10  ;;  %v7116_v16 = vld [vmem:[%s11321_s20 + $0x258] sm:$0xff]  ;;  %v7131_v52 = vld [vmem:[%s11321_s20 + $0x2d0] sm:$0xff] }
0x2b48   :  { %8659 = vmatprep.subr.mxu1 %v7061_v28  ;;  %8697 = vmatprep.subr.mxu0 %v7093_v62  ;;  %v7148_v51 = vld [vmem:[%s11321_s20 + $0x358] sm:$0xff]  ;;  %v7163_v10 = vld [vmem:[%s11321_s20 + $0x3d0] sm:$0xff]  ;;  %v7130_v62 = vld [vmem:[%s11321_s20 + $0x2c8] sm:$0xff] }
0x2b49   :  { %8660 = vmatpush3.msra.mxu1 %v7045_v55  ;;  %7368 = vmatprep.mubr.f32.mxu1 %v7010_v11  ;;  %v7115_v11 = vld [vmem:[%s11321_s20 + $0x250] sm:$0xff]  ;;  %v7114_v55 = vld [vmem:[%s11321_s20 + $0x248] sm:$0xff] }
0x2b4a   :  { %8698 = vmatpush3.msra.mxu0 %v7077_v57  ;;  %7443 = vmatprep.mubr.f32.mxu0 %v7012_v5  ;;  %v7147_v28 = vld [vmem:[%s11321_s20 + $0x350] sm:$0xff]  ;;  %v7162_v5 = vld [vmem:[%s11321_s20 + $0x3c8] sm:$0xff] }
0x2b4b   :  { %8661 = vmatprep.subr.mxu1 %v7060_v60  ;;  %8699 = vmatprep.subr.mxu0 %v7092_v53  ;;  %v7146_v57 = vld [vmem:[%s11321_s20 + $0x348] sm:$0xff]  ;;  %v7129_v60 = vld [vmem:[%s11321_s20 + $0x2c0] sm:$0xff] }
0x2b4c   :  { %8662 = vmatpush3.msra.mxu1 %v7044_v30  ;;  %8700 = vmatpush3.msra.mxu0 %v7076_v37  ;;  %v7161_v53 = vld [vmem:[%s11321_s20 + $0x3c0] sm:$0xff] }
0x2b4d   :  { %8663 = vmatprep.subr.mxu1 %v7059_v13  ;;  %8701 = vmatprep.subr.mxu0 %v7091_v0  ;;  %v7113_v30 = vld [vmem:[%s11321_s20 + $0x240] sm:$0xff]  ;;  %v7128_v13 = vld [vmem:[%s11321_s20 + $0x2b8] sm:$0xff] }
0x2b4e   :  { %8664 = vmatpush3.msra.mxu1 %v7043_v7  ;;  %8702 = vmatpush3.msra.mxu0 %v7075_v17  ;;  %v7145_v37 = vld [vmem:[%s11321_s20 + $0x340] sm:$0xff]  ;;  %v7160_v0 = vld [vmem:[%s11321_s20 + $0x3b8] sm:$0xff] }
0x2b4f   :  { %8665 = vmatprep.subr.mxu1 %v7058_v15  ;;  %8703 = vmatprep.subr.mxu0 %v7090_v8  ;;  %v7112_v7 = vld [vmem:[%s11321_s20 + $0x238] sm:$0xff]  ;;  %v7127_v15 = vld [vmem:[%s11321_s20 + $0x2b0] sm:$0xff] }
0x2b50   :  { %8666 = vmatpush3.msra.mxu1 %v7042_v45  ;;  %8704 = vmatpush3.msra.mxu0 %v7074_v49  ;;  %v7144_v17 = vld [vmem:[%s11321_s20 + $0x338] sm:$0xff]  ;;  %v7159_v8 = vld [vmem:[%s11321_s20 + $0x3b0] sm:$0xff]  ;;  %v7126_v45 = vld [vmem:[%s11321_s20 + $0x2a8] sm:$0xff] }
0x2b51   :  { %8667 = vmatprep.subr.mxu1 %v7057_v19  ;;  %8705 = vmatprep.subr.mxu0 %v7089_v38  ;;  %v7158_v49 = vld [vmem:[%s11321_s20 + $0x3a8] sm:$0xff] }
0x2b52   :  { %8668 = vmatpush3.msra.mxu1 %v7041_v26  ;;  %8706 = vmatpush3.msra.mxu0 %v7073_v56  ;;  %v7110_v19 = vld [vmem:[%s11321_s20 + $0x228] sm:$0xff]  ;;  %v7125_v26 = vld [vmem:[%s11321_s20 + $0x2a0] sm:$0xff] }
0x2b53   :  { %7369 = vmatmul.mubr.f32.vlgmr.msra.gmra.mxu1 %v7009_v58  ;;  %7444 = vmatmul.mubr.f32.vlgmr.msra.gmra.mxu0 %v7011_v40  ;;  %v7142_v38 = vld [vmem:[%s11321_s20 + $0x328] sm:$0xff]  ;;  %v7157_v56 = vld [vmem:[%s11321_s20 + $0x3a0] sm:$0xff] }
0x2b54   :  { %8713 = vmatprep.subr.mxu1 %v7136_v42  ;;  %8751 = vmatprep.subr.mxu0 %v7168_v27  ;;  %v7109_v58 = vld [vmem:[%s11321_s20 + $0x220] sm:$0xff]  ;;  %v7124_v42 = vld [vmem:[%s11321_s20 + $0x298] sm:$0xff] }
0x2b55   :  { %8714 = vmatpush3.msra.mxu1 %v7120_v25  ;;  %8752 = vmatpush3.msra.mxu0 %v7152_v20  ;;  %v7141_v40 = vld [vmem:[%s11321_s20 + $0x320] sm:$0xff]  ;;  %v7156_v27 = vld [vmem:[%s11321_s20 + $0x398] sm:$0xff] }
0x2b56   :  { %8715 = vmatprep.subr.mxu1 %v7135_v24  ;;  %8753 = vmatprep.subr.mxu0 %v7167_v21  ;;  %v7108_v25 = vld [vmem:[%s11321_s20 + $0x218] sm:$0xff]  ;;  %v7123_v24 = vld [vmem:[%s11321_s20 + $0x290] sm:$0xff] }
0x2b57   :  { %8716 = vmatpush3.msra.mxu1 %v7119_v9  ;;  %8754 = vmatpush3.msra.mxu0 %v7151_v29  ;;  %v7140_v20 = vld [vmem:[%s11321_s20 + $0x318] sm:$0xff]  ;;  %v7155_v21 = vld [vmem:[%s11321_s20 + $0x390] sm:$0xff] }
0x2b58   :  { %8717 = vmatprep.subr.mxu1 %v7134_v4  ;;  %8755 = vmatprep.subr.mxu0 %v7166_v34  ;;  %v7107_v9 = vld [vmem:[%s11321_s20 + $0x210] sm:$0xff]  ;;  %v7122_v4 = vld [vmem:[%s11321_s20 + $0x288] sm:$0xff] }
0x2b59   :  { %8718 = vmatpush3.msra.mxu1 %v7118_v36  ;;  %8756 = vmatpush3.msra.mxu0 %v7150_v41  ;;  %v7139_v29 = vld [vmem:[%s11321_s20 + $0x310] sm:$0xff]  ;;  %v7154_v34 = vld [vmem:[%s11321_s20 + $0x388] sm:$0xff] }
0x2b5a   :  { %8719 = vmatprep.subr.mxu1 %v7133_v43  ;;  %8757 = vmatprep.subr.mxu0 %v7165_v35  ;;  %v7106_v36 = vld [vmem:[%s11321_s20 + $0x208] sm:$0xff]  ;;  %v7121_v43 = vld [vmem:[%s11321_s20 + $0x280] sm:$0xff] }
0x2b5b   :  { %8720 = vmatpush3.msra.mxu1 %v7117_v47  ;;  %8758 = vmatpush3.msra.mxu0 %v7149_v48  ;;  %v7138_v41 = vld [vmem:[%s11321_s20 + $0x308] sm:$0xff]  ;;  %v7153_v35 = vld [vmem:[%s11321_s20 + $0x380] sm:$0xff] }
0x2b5c   :  { %8721 = vmatprep.subr.mxu1 %v7132_v33  ;;  %8759 = vmatprep.subr.mxu0 %v7164_v12  ;;  %v7105_v47 = vld [vmem:[%s11321_s20 + $0x200] sm:$0xff]  ;;  %v7200_v33 = vld [vmem:[%s11321_s20 + $0x4f8] sm:$0xff] }
0x2b5d   :  { %8722 = vmatpush3.msra.mxu1 %v7116_v16  ;;  %8760 = vmatpush3.msra.mxu0 %v7148_v51  ;;  %v7137_v48 = vld [vmem:[%s11321_s20 + $0x300] sm:$0xff]  ;;  %v7232_v12 = vld [vmem:[%s11321_s20 + $0x5f8] sm:$0xff] }
0x2b5e   :  { %8723 = vmatprep.subr.mxu1 %v7131_v52  ;;  %8761 = vmatprep.subr.mxu0 %v7163_v10 }
0x2b5f   :  { %8724 = vmatpush3.msra.mxu1 %v7115_v11  ;;  %8762 = vmatpush3.msra.mxu0 %v7147_v28 }
0x2b60   :  { %8725 = vmatprep.subr.mxu1 %v7130_v62  ;;  %8763 = vmatprep.subr.mxu0 %v7162_v5  ;;  %v6326_v62 = vrot.slane %v10966_v22, %v10238_v1  ;;  %v6334_v5 = vrot.slane %v10966_v22, %v10241_v2 }
0x2b61   :  { %8726 = vmatpush3.msra.mxu1 %v7114_v55  ;;  %8764 = vmatpush3.msra.mxu0 %v7146_v57 }
0x2b62   :  { %8727 = vmatprep.subr.mxu1 %v7129_v60  ;;  %8765 = vmatprep.subr.mxu0 %v7161_v53  ;;  %v6330_v60 = vrot.slane %v10966_v22, %v10244_v3 }
0x2b63   :  { %8728 = vmatpush3.msra.mxu1 %v7113_v30  ;;  %8766 = vmatpush3.msra.mxu0 %v7145_v37 }
0x2b64   :  { %8729 = vmatprep.subr.mxu1 %v7128_v13  ;;  %8767 = vmatprep.subr.mxu0 %v7160_v0 }
0x2b65   :  { %8730 = vmatpush3.msra.mxu1 %v7112_v7  ;;  %8768 = vmatpush3.msra.mxu0 %v7144_v17 }
0x2b66   :  { %8731 = vmatprep.subr.mxu1 %v7127_v15  ;;  %8769 = vmatprep.subr.mxu0 %v7159_v8 }
0x2b67   :  { %8732 = vmatpush3.msra.mxu1 %v7111_v18  ;;  %8770 = vmatpush3.msra.mxu0 %v7143_v32 }
0x2b68   :  { %8733 = vmatprep.subr.mxu1 %v7126_v45  ;;  %8771 = vmatprep.subr.mxu0 %v7158_v49 }
0x2b69   :  { %8734 = vmatpush3.msra.mxu1 %v7110_v19  ;;  %8772 = vmatpush3.msra.mxu0 %v7142_v38  ;;  %v7184_v38 = vld [vmem:[%s11321_s20 + $0x478] sm:$0xff] }
0x2b6a   :  { %8735 = vmatprep.subr.mxu1 %v7125_v26  ;;  %8773 = vmatprep.subr.mxu0 %v7157_v56  ;;  %v7216_v26 = vld [vmem:[%s11321_s20 + $0x578] sm:$0xff]  ;;  %v7199_v56 = vld [vmem:[%s11321_s20 + $0x4f0] sm:$0xff] }
0x2b6b   :  { %8736 = vmatpush3.msra.mxu1 %v7109_v58  ;;  %8774 = vmatpush3.msra.mxu0 %v7141_v40  ;;  %v7231_v58 = vld [vmem:[%s11321_s20 + $0x5f0] sm:$0xff] }
0x2b6c   :  { %8737 = vmatprep.subr.mxu1 %v7124_v42  ;;  %8775 = vmatprep.subr.mxu0 %v7156_v27 }
0x2b6d   :  { %8738 = vmatpush3.msra.mxu1 %v7108_v25  ;;  %8776 = vmatpush3.msra.mxu0 %v7140_v20  ;;  %v7183_v20 = vld [vmem:[%s11321_s20 + $0x470] sm:$0xff] }
0x2b6e   :  { %8739 = vmatprep.subr.mxu1 %v7123_v24  ;;  %8777 = vmatprep.subr.mxu0 %v7155_v21  ;;  %v7215_v24 = vld [vmem:[%s11321_s20 + $0x570] sm:$0xff] }
0x2b6f   :  { %8740 = vmatpush3.msra.mxu1 %v7107_v9  ;;  %8778 = vmatpush3.msra.mxu0 %v7139_v29  ;;  %v7198_v29 = vld [vmem:[%s11321_s20 + $0x4e8] sm:$0xff] }
0x2b70   :  { %8741 = vmatprep.subr.mxu1 %v7122_v4  ;;  %8779 = vmatprep.subr.mxu0 %v7154_v34  ;;  %v7230_v4 = vld [vmem:[%s11321_s20 + $0x5e8] sm:$0xff] }
0x2b71   :  { %8742 = vmatpush3.msra.mxu1 %v7106_v36  ;;  %8780 = vmatpush3.msra.mxu0 %v7138_v41 }
0x2b72   :  { %8743 = vmatprep.subr.mxu1 %v7121_v43  ;;  %8781 = vmatprep.subr.mxu0 %v7153_v35  ;;  %v7182_v35 = vld [vmem:[%s11321_s20 + $0x468] sm:$0xff] }
0x2b73   :  { %8744 = vmatpush3.msra.mxu1 %v7105_v47  ;;  %8782 = vmatpush3.msra.mxu0 %v7137_v48  ;;  %v7214_v47 = vld [vmem:[%s11321_s20 + $0x568] sm:$0xff]  ;;  %v7197_v48 = vld [vmem:[%s11321_s20 + $0x4e0] sm:$0xff] }
0x2b74   :  { %8789 = vmatprep.subr.mxu1 %v7200_v33  ;;  %8827 = vmatprep.subr.mxu0 %v7232_v12  ;;  %v7229_v33 = vld [vmem:[%s11321_s20 + $0x5e0] sm:$0xff] }
0x2b75   :  { %v7181_v12 = vld [vmem:[%s11321_s20 + $0x460] sm:$0xff] }
0x2bc4   :  { %v6465_v16 = vpop.f32.mrf.mxu1  ;;  %v6542_v51 = vpop.f32.mrf.mxu0 }
0x2bc5   :  { %v6466_v52 = vadd.f32 %v6465_v16, %v11002_v46  ;;  %v6543_v10 = vadd.f32 %v6542_v51, %v11006_v61  ;;  %v6338_v46 = vrot.slane %v10966_v22, %v10247_v6  ;;  %v7213_v16 = vld [vmem:[%s11321_s20 + $0x560] sm:$0xff]  ;;  %v7196_v51 = vld [vmem:[%s11321_s20 + $0x4d8] sm:$0xff] }
0x2bc6   :  { %v6467_v11 = vpop.f32.mrf.mxu1  ;;  %v6544_v28 = vpop.f32.mrf.mxu0 }
0x2bc7   :  { %v6468_v55 = vadd.f32 %v6467_v11, %v10972_v59  ;;  %v6545_v57 = vadd.f32 %v6544_v28, %v10978_v63  ;;  %v7025_v13 = vmax.f32 %v6466_v52, 0.0  ;;  %v7027_v0 = vmax.f32 %v6543_v10, 0.0  ;;  %v7228_v52 = vld [vmem:[%s11321_s20 + $0x5d8] sm:$0xff]  ;;  %v11123_v28 = vld [vmem:[%s11322_s7 + $0x8] sm:$0xff] }
0x2bc8   :  { %v6613_v53 = vpop.f32.mrf.mxu1  ;;  %v6690_v61 = vpop.f32.mrf.mxu0  ;;  %v7180_v10 = vld [vmem:[%s11321_s20 + $0x458] sm:$0xff] }
0x2bc9   :  { %v7026_v30 = vmax.f32 %v6468_v55, 0.0  ;;  %v7028_v37 = vmax.f32 %v6545_v57, 0.0  ;;  %v6614_v7 = vadd.f32 %v6613_v53, %v6326_v62  ;;  %v6691_v17 = vadd.f32 %v6690_v61, %v6334_v5  ;;  %v7212_v11 = vld [vmem:[%s11321_s20 + $0x558] sm:$0xff] }
0x2bca   :  { %v6615_v15 = vpop.f32.mrf.mxu1  ;;  %v6692_v59 = vpop.f32.mrf.mxu0  ;;  %v11129_v55 = vrot.slane %v11123_v28, %v9634_v39  ;;  %v11133_v57 = vrot.slane %v11123_v28, %v10099_v50  ;;  %v7178_v39 = vld [vmem:[%s11321_s20 + $0x448] sm:$0xff] }
0x2bcb   :  { %v6616_v8 = vadd.f32 %v6615_v15, %v6330_v60  ;;  %v6693_v63 = vadd.f32 %v6692_v59, %v6338_v46  ;;  %7373 = vmatprep.mubr.f32.mxu1 %v7026_v30  ;;  %7448 = vmatprep.mubr.f32.mxu0 %v7028_v37  ;;  %v7013_v32 = vmax.f32 %v6614_v7, 0.0  ;;  %v7015_v45 = vmax.f32 %v6691_v17, 0.0  ;;  %v7194_v30 = vld [vmem:[%s11321_s20 + $0x4c8] sm:$0xff]  ;;  %v7193_v7 = vld [vmem:[%s11321_s20 + $0x4c0] sm:$0xff] }
0x2bcc   :  { %7374 = vmatmul.mubr.f32.gmra.mxu1 %v7025_v13  ;;  %7449 = vmatmul.mubr.f32.gmra.mxu0 %v7027_v0  ;;  %v7226_v37 = vld [vmem:[%s11321_s20 + $0x5c8] sm:$0xff]  ;;  %v7225_v17 = vld [vmem:[%s11321_s20 + $0x5c0] sm:$0xff] }
0x2bcd   :  { %v7014_v22 = vmax.f32 %v6616_v8, 0.0  ;;  %v7016_v18 = vmax.f32 %v6693_v63, 0.0  ;;  %v7210_v13 = vld [vmem:[%s11321_s20 + $0x548] sm:$0xff]  ;;  %v7177_v8 = vld [vmem:[%s11321_s20 + $0x440] sm:$0xff] }
0x2bce   :  { %v6619_v49 = vpop.f32.mrf.mxu1  ;;  %v6696_v19 = vpop.f32.mrf.mxu0  ;;  %v7209_v63 = vld [vmem:[%s11321_s20 + $0x540] sm:$0xff] }
0x2bcf   :  { %7518 = vmatprep.mubr.f32.mxu1 %v7014_v22  ;;  %7593 = vmatprep.mubr.f32.mxu0 %v7016_v18  ;;  %v6620_v40 = vadd.f32 %v6619_v49, %v6326_v62  ;;  %v6697_v42 = vadd.f32 %v6696_v19, %v6334_v5  ;;  %v7195_v62 = vld [vmem:[%s11321_s20 + $0x4d0] sm:$0xff]  ;;  %v7176_v49 = vld [vmem:[%s11321_s20 + $0x438] sm:$0xff] }
0x2bd0   :  { %v6621_v27 = vpop.f32.mrf.mxu1  ;;  %v6698_v25 = vpop.f32.mrf.mxu0  ;;  %7519 = vmatmul.mubr.f32.vlgmr.msra.gmra.mxu1 %v7013_v32  ;;  %7594 = vmatmul.mubr.f32.vlgmr.msra.gmra.mxu0 %v7015_v45  ;;  %v7227_v5 = vld [vmem:[%s11321_s20 + $0x5d0] sm:$0xff]  ;;  %v7192_v32 = vld [vmem:[%s11321_s20 + $0x4b8] sm:$0xff] }
0x2bd1   :  { %v6622_v21 = vadd.f32 %v6621_v27, %v6330_v60  ;;  %v6699_v9 = vadd.f32 %v6698_v25, %v6338_v46  ;;  %8790 = vmatpush3.msra.mxu1 %v7184_v38  ;;  %8828 = vmatpush3.msra.mxu0 %v7216_v26  ;;  %v7029_v41 = vmax.f32 %v6620_v40, 0.0  ;;  %v7031_v43 = vmax.f32 %v6697_v42, 0.0  ;;  %v7179_v60 = vld [vmem:[%s11321_s20 + $0x450] sm:$0xff]  ;;  %v7224_v45 = vld [vmem:[%s11321_s20 + $0x5b8] sm:$0xff]  ;;  %v7190_v40 = vld [vmem:[%s11321_s20 + $0x4a8] sm:$0xff] }
0x2bd2   :  { %8791 = vmatprep.subr.mxu1 %v7199_v56  ;;  %8829 = vmatprep.subr.mxu0 %v7231_v58  ;;  %v7211_v46 = vld [vmem:[%s11321_s20 + $0x550] sm:$0xff]  ;;  %v7208_v19 = vld [vmem:[%s11321_s20 + $0x538] sm:$0xff]  ;;  %v7222_v42 = vld [vmem:[%s11321_s20 + $0x5a8] sm:$0xff] }
0x2bd3   :  { %v7030_v34 = vmax.f32 %v6622_v21, 0.0  ;;  %v7032_v36 = vmax.f32 %v6699_v9, 0.0  ;;  %8792 = vmatpush3.msra.mxu1 %v7183_v20  ;;  %8830 = vmatpush3.msra.mxu0 %v7215_v24  ;;  %v7191_v38 = vld [vmem:[%s11321_s20 + $0x4b0] sm:$0xff]  ;;  %v7174_v27 = vld [vmem:[%s11321_s20 + $0x428] sm:$0xff]  ;;  %v7189_v20 = vld [vmem:[%s11321_s20 + $0x4a0] sm:$0xff] }
0x2bd4   :  { %8793 = vmatprep.subr.mxu1 %v7198_v29  ;;  %8831 = vmatprep.subr.mxu0 %v7230_v4  ;;  %v7223_v26 = vld [vmem:[%s11321_s20 + $0x5b0] sm:$0xff]  ;;  %v7206_v25 = vld [vmem:[%s11321_s20 + $0x528] sm:$0xff]  ;;  %v7221_v24 = vld [vmem:[%s11321_s20 + $0x5a0] sm:$0xff] }
0x2bd5   :  { %7523 = vmatprep.mubr.f32.mxu1 %v7030_v34  ;;  %7598 = vmatprep.mubr.f32.mxu0 %v7032_v36  ;;  %v7175_v56 = vld [vmem:[%s11321_s20 + $0x430] sm:$0xff]  ;;  %v7173_v21 = vld [vmem:[%s11321_s20 + $0x420] sm:$0xff]  ;;  %v7188_v34 = vld [vmem:[%s11321_s20 + $0x498] sm:$0xff] }
0x2bd6   :  { %7524 = vmatmul.mubr.f32.gmra.mxu1 %v7029_v41  ;;  %7599 = vmatmul.mubr.f32.gmra.mxu0 %v7031_v43  ;;  %v7207_v58 = vld [vmem:[%s11321_s20 + $0x530] sm:$0xff]  ;;  %v7205_v9 = vld [vmem:[%s11321_s20 + $0x520] sm:$0xff]  ;;  %v7220_v36 = vld [vmem:[%s11321_s20 + $0x598] sm:$0xff]  ;;  %v6342_v41 = vrot.slane %v11123_v28, %v9621_v31  ;;  %v6350_v43 = vrot.slane %v11123_v28, %v10137_v14 }
0x2bd7   :  { %8794 = vmatpush3.msra.mxu1 %v7182_v35  ;;  %8832 = vmatpush3.msra.mxu0 %v7214_v47  ;;  %v7172_v35 = vld [vmem:[%s11321_s20 + $0x418] sm:$0xff] }
0x2bd8   :  { %8795 = vmatprep.subr.mxu1 %v7197_v48  ;;  %8833 = vmatprep.subr.mxu0 %v7229_v33  ;;  %v7204_v47 = vld [vmem:[%s11321_s20 + $0x518] sm:$0xff]  ;;  %v7187_v48 = vld [vmem:[%s11321_s20 + $0x490] sm:$0xff] }
0x2bd9   :  { %8796 = vmatpush3.msra.mxu1 %v7181_v12  ;;  %8834 = vmatpush3.msra.mxu0 %v7213_v16  ;;  %v7219_v33 = vld [vmem:[%s11321_s20 + $0x590] sm:$0xff] }
0x2bda   :  { %8797 = vmatprep.subr.mxu1 %v7196_v51  ;;  %8835 = vmatprep.subr.mxu0 %v7228_v52  ;;  %v7171_v12 = vld [vmem:[%s11321_s20 + $0x410] sm:$0xff]  ;;  %v7186_v52 = vld [vmem:[%s11321_s20 + $0x488] sm:$0xff] }
0x2bdb   :  { %v11137_v53 = vpop.f32.mrf.mxu1  ;;  %v11139_v61 = vpop.f32.mrf.mxu0  ;;  %8798 = vmatpush3.msra.mxu1 %v7180_v10  ;;  %8836 = vmatpush3.msra.mxu0 %v7212_v11  ;;  %v7203_v16 = vld [vmem:[%s11321_s20 + $0x510] sm:$0xff]  ;;  %v7218_v10 = vld [vmem:[%s11321_s20 + $0x588] sm:$0xff] }
0x2bdc   :  { %8799 = vmatprep.subr.mxu1 %v7195_v62  ;;  %8837 = vmatprep.subr.mxu0 %v7227_v5  ;;  %v6768_v11 = vadd.f32 %v11137_v53, %v6342_v41  ;;  %v6845_v62 = vadd.f32 %v11139_v61, %v6350_v43  ;;  %v7170_v5 = vld [vmem:[%s11321_s20 + $0x408] sm:$0xff]  ;;  %v7169_v61 = vld [vmem:[%s11321_s20 + $0x400] sm:$0xff] }
0x2bdd   :  { %v6769_v50 = vpop.f32.mrf.mxu1  ;;  %v6846_v0 = vpop.f32.mrf.mxu0  ;;  %8800 = vmatpush3.msra.mxu1 %v7179_v60  ;;  %8838 = vmatpush3.msra.mxu0 %v7211_v46  ;;  %v7202_v60 = vld [vmem:[%s11321_s20 + $0x508] sm:$0xff]  ;;  %v7185_v46 = vld [vmem:[%s11321_s20 + $0x480] sm:$0xff] }
0x2bde   :  { %v6770_v15 = vadd.f32 %v6769_v50, %v11129_v55  ;;  %v6847_v59 = vadd.f32 %v6846_v0, %v11133_v57  ;;  %8801 = vmatprep.subr.mxu1 %v7194_v30  ;;  %8839 = vmatprep.subr.mxu0 %v7226_v37  ;;  %v7217_v30 = vld [vmem:[%s11321_s20 + $0x580] sm:$0xff]  ;;  %v7017_v0 = vmax.f32 %v6768_v11, 0.0 }
0x2bdf   :  { %8802 = vmatpush3.msra.mxu1 %v7178_v39  ;;  %8840 = vmatpush3.msra.mxu0 %v7210_v13  ;;  %v7201_v50 = vld [vmem:[%s11321_s20 + $0x500] sm:$0xff] }
0x2be0   :  { %v7018_v22 = vmax.f32 %v6770_v15, 0.0  ;;  %v7020_v18 = vmax.f32 %v6847_v59, 0.0  ;;  %8803 = vmatprep.subr.mxu1 %v7193_v7  ;;  %8841 = vmatprep.subr.mxu0 %v7225_v17  ;;  %v7019_v7 = vmax.f32 %v6845_v62, 0.0  ;;  %v11197_v17 = vrot.slane %v11123_v28, %v10244_v3  ;;  %v7289_v11 = vld [vmem:[%s11321_s20 + $0x7c0] sm:$0xff] }
0x2be1   :  { %8804 = vmatpush3.msra.mxu1 %v7177_v8  ;;  %8842 = vmatpush3.msra.mxu0 %v7209_v63  ;;  %v6773_v29 = vpop.f32.mrf.mxu1  ;;  %v6850_v4 = vpop.f32.mrf.mxu0  ;;  %v11203_v59 = vrot.slane %v11123_v28, %v10247_v6  ;;  %v7295_v6 = vld [vmem:[%s11321_s20 + $0x7f0] sm:$0xff]  ;;  %v7241_v62 = vld [vmem:[%s11321_s20 + $0x640] sm:$0xff] }
0x2be2   :  { %7668 = vmatprep.mubr.f32.mxu1 %v7018_v22  ;;  %7743 = vmatprep.mubr.f32.mxu0 %v7020_v18  ;;  %v6774_v8 = vadd.f32 %v6773_v29, %v6342_v41  ;;  %v6851_v63 = vadd.f32 %v6850_v4, %v6350_v43  ;;  %v7293_v29 = vld [vmem:[%s11321_s20 + $0x7e0] sm:$0xff]  ;;  %v7292_v41 = vld [vmem:[%s11321_s20 + $0x7d8] sm:$0xff] }
0x2be3   :  { %8805 = vmatprep.subr.mxu1 %v7192_v32  ;;  %8843 = vmatprep.subr.mxu0 %v7224_v45  ;;  %v6775_v51 = vpop.f32.mrf.mxu1  ;;  %v6852_v14 = vpop.f32.mrf.mxu0  ;;  %v7248_v32 = vld [vmem:[%s11321_s20 + $0x678] sm:$0xff]  ;;  %v7245_v4 = vld [vmem:[%s11321_s20 + $0x660] sm:$0xff] }
0x2be4   :  { %8806 = vmatpush3.msra.mxu1 %v7176_v49  ;;  %8844 = vmatpush3.msra.mxu0 %v7208_v19  ;;  %v6776_v37 = vadd.f32 %v6775_v51, %v11129_v55  ;;  %v6853_v39 = vadd.f32 %v6852_v14, %v11133_v57  ;;  %v7264_v55 = vld [vmem:[%s11321_s20 + $0x6f8] sm:$0xff]  ;;  %v7263_v49 = vld [vmem:[%s11321_s20 + $0x6f0] sm:$0xff]  ;;  %v7290_v51 = vld [vmem:[%s11321_s20 + $0x7c8] sm:$0xff] }
0x2be5   :  { %8807 = vmatprep.subr.mxu1 %v7191_v38  ;;  %8845 = vmatprep.subr.mxu0 %v7223_v26  ;;  %v7296_v57 = vld [vmem:[%s11321_s20 + $0x7f8] sm:$0xff]  ;;  %v7247_v38 = vld [vmem:[%s11321_s20 + $0x670] sm:$0xff]  ;;  %v7242_v14 = vld [vmem:[%s11321_s20 + $0x648] sm:$0xff] }
0x2be6   :  { %8808 = vmatpush3.msra.mxu1 %v7175_v56  ;;  %8846 = vmatpush3.msra.mxu0 %v7207_v58  ;;  %v7034_v3 = vmax.f32 %v6776_v37, 0.0  ;;  %v7036_v22 = vmax.f32 %v6853_v39, 0.0  ;;  %v7280_v45 = vld [vmem:[%s11321_s20 + $0x778] sm:$0xff]  ;;  %v7279_v26 = vld [vmem:[%s11321_s20 + $0x770] sm:$0xff]  ;;  %v7033_v58 = vmax.f32 %v6774_v8, 0.0  ;;  %v7253_v8 = vld [vmem:[%s11321_s20 + $0x6a0] sm:$0xff] }
0x2be7   :  { %8809 = vmatprep.subr.mxu1 %v7190_v40  ;;  %8847 = vmatprep.subr.mxu0 %v7222_v42  ;;  %v7035_v40 = vmax.f32 %v6851_v63, 0.0  ;;  %v7262_v42 = vld [vmem:[%s11321_s20 + $0x6e8] sm:$0xff]  ;;  %v7244_v43 = vld [vmem:[%s11321_s20 + $0x658] sm:$0xff]  ;;  %v7255_v39 = vld [vmem:[%s11321_s20 + $0x6b0] sm:$0xff] }
0x2be8   :  { %8810 = vmatpush3.msra.mxu1 %v7174_v27  ;;  %8848 = vmatpush3.msra.mxu0 %v7206_v25  ;;  %v7294_v27 = vld [vmem:[%s11321_s20 + $0x7e8] sm:$0xff]  ;;  %v7272_v37 = vld [vmem:[%s11321_s20 + $0x738] sm:$0xff]  ;;  %v7285_v63 = vld [vmem:[%s11321_s20 + $0x7a0] sm:$0xff] }
0x2be9   :  { %8811 = vmatprep.subr.mxu1 %v7189_v20  ;;  %8849 = vmatprep.subr.mxu0 %v7221_v24  ;;  %v7246_v25 = vld [vmem:[%s11321_s20 + $0x668] sm:$0xff] }
0x2bea   :  { %8812 = vmatpush3.msra.mxu1 %v7173_v21  ;;  %8850 = vmatpush3.msra.mxu0 %v7205_v9  ;;  %v7278_v24 = vld [vmem:[%s11321_s20 + $0x768] sm:$0xff]  ;;  %v7261_v9 = vld [vmem:[%s11321_s20 + $0x6e0] sm:$0xff] }
0x2beb   :  { %8813 = vmatprep.subr.mxu1 %v7188_v34  ;;  %8851 = vmatprep.subr.mxu0 %v7220_v36  ;;  %v7277_v34 = vld [vmem:[%s11321_s20 + $0x760] sm:$0xff]  ;;  %v7260_v36 = vld [vmem:[%s11321_s20 + $0x6d8] sm:$0xff] }
0x2bec   :  { %8814 = vmatpush3.msra.mxu1 %v7172_v35  ;;  %8852 = vmatpush3.msra.mxu0 %v7204_v47  ;;  %v7276_v35 = vld [vmem:[%s11321_s20 + $0x758] sm:$0xff]  ;;  %v7259_v47 = vld [vmem:[%s11321_s20 + $0x6d0] sm:$0xff] }
0x2bed   :  { %8815 = vmatprep.subr.mxu1 %v7187_v48  ;;  %8853 = vmatprep.subr.mxu0 %v7219_v33  ;;  %v7291_v48 = vld [vmem:[%s11321_s20 + $0x7d0] sm:$0xff] }
0x2bee   :  { %8816 = vmatpush3.msra.mxu1 %v7171_v12  ;;  %8854 = vmatpush3.msra.mxu0 %v7203_v16  ;;  %v7243_v33 = vld [vmem:[%s11321_s20 + $0x650] sm:$0xff]  ;;  %v7258_v16 = vld [vmem:[%s11321_s20 + $0x6c8] sm:$0xff] }
0x2bef   :  { %v11189_v13 = vpop.f32.mrf.mxu1  ;;  %v11191_v53 = vpop.f32.mrf.mxu0  ;;  %8817 = vmatprep.subr.mxu1 %v7186_v52  ;;  %8855 = vmatprep.subr.mxu0 %v7218_v10  ;;  %v7275_v12 = vld [vmem:[%s11321_s20 + $0x750] sm:$0xff]  ;;  %v7274_v52 = vld [vmem:[%s11321_s20 + $0x748] sm:$0xff]  ;;  %v7257_v10 = vld [vmem:[%s11321_s20 + $0x6c0] sm:$0xff] }
0x2bf0   :  { %8818 = vmatpush3.msra.mxu1 %v7170_v5  ;;  %8856 = vmatpush3.msra.mxu0 %v7202_v60  ;;  %v7273_v5 = vld [vmem:[%s11321_s20 + $0x740] sm:$0xff]  ;;  %v7256_v60 = vld [vmem:[%s11321_s20 + $0x6b8] sm:$0xff] }
0x2bf1   :  { %8819 = vmatprep.subr.mxu1 %v7185_v46  ;;  %8857 = vmatprep.subr.mxu0 %v7217_v30  ;;  %v6923_v15 = vpop.f32.mrf.mxu1  ;;  %v7000_v18 = vpop.f32.mrf.mxu0  ;;  %v7288_v46 = vld [vmem:[%s11321_s20 + $0x7b8] sm:$0xff] }
0x2bf2   :  { %8820 = vmatpush3.msra.mxu1 %v7169_v61  ;;  %8858 = vmatpush3.msra.mxu0 %v7201_v50  ;;  %v6924_v19 = vadd.f32 %v6923_v15, %v11197_v17  ;;  %v7001_v56 = vadd.f32 %v7000_v18, %v11203_v59  ;;  %v7240_v30 = vld [vmem:[%s11321_s20 + $0x638] sm:$0xff]  ;;  %v7287_v61 = vld [vmem:[%s11321_s20 + $0x7b0] sm:$0xff]  ;;  %v7270_v15 = vld [vmem:[%s11321_s20 + $0x728] sm:$0xff] }
0x2bf3   :  { %7669 = vmatmul.mubr.f32.vlgmr.msra.gmra.mxu1 %v7017_v0  ;;  %7744 = vmatmul.mubr.f32.vlgmr.msra.gmra.mxu0 %v7019_v7  ;;  %v7239_v50 = vld [vmem:[%s11321_s20 + $0x630] sm:$0xff]  ;;  %v7254_v7 = vld [vmem:[%s11321_s20 + $0x6a8] sm:$0xff]  ;;  %v7237_v18 = vld [vmem:[%s11321_s20 + $0x620] sm:$0xff] }
0x2bf4   :  { %8865 = vmatprep.subr.mxu1 %v7264_v55  ;;  %8903 = vmatprep.subr.mxu0 %v7296_v57  ;;  %v7022_v20 = vmax.f32 %v6924_v19, 0.0  ;;  %v7024_v21 = vmax.f32 %v7001_v56, 0.0  ;;  %v7271_v0 = vld [vmem:[%s11321_s20 + $0x730] sm:$0xff]  ;;  %v7286_v55 = vld [vmem:[%s11321_s20 + $0x7a8] sm:$0xff]  ;;  %v6366_v19 = vrot.slane %v11123_v28, %v10241_v2 }
0x2bf5   :  { %7673 = vmatprep.mubr.f32.mxu1 %v7034_v3  ;;  %7748 = vmatprep.mubr.f32.mxu0 %v7036_v22  ;;  %v7238_v57 = vld [vmem:[%s11321_s20 + $0x628] sm:$0xff]  ;;  %v6927_v3 = vpop.f32.mrf.mxu1  ;;  %v7004_v22 = vpop.f32.mrf.mxu0  ;;  %v7251_v56 = vld [vmem:[%s11321_s20 + $0x690] sm:$0xff] }
0x2bf6   :  { %8866 = vmatpush3.msra.mxu1 %v7248_v32  ;;  %8904 = vmatpush3.msra.mxu0 %v7280_v45  ;;  %v7269_v32 = vld [vmem:[%s11321_s20 + $0x720] sm:$0xff]  ;;  %v7252_v45 = vld [vmem:[%s11321_s20 + $0x698] sm:$0xff]  ;;  %v7250_v2 = vld [vmem:[%s11321_s20 + $0x688] sm:$0xff] }
0x2bf7   :  { %8867 = vmatprep.subr.mxu1 %v7263_v49  ;;  %8905 = vmatprep.subr.mxu0 %v7295_v6  ;;  %v7284_v49 = vld [vmem:[%s11321_s20 + $0x798] sm:$0xff]  ;;  %v6358_v6 = vrot.slane %v11123_v28, %v10238_v1  ;;  %v7235_v1 = vld [vmem:[%s11321_s20 + $0x610] sm:$0xff]  ;;  %v7282_v28 = vld [vmem:[%s11321_s20 + $0x788] sm:$0xff] }
0x2bf8   :  { %8868 = vmatpush3.msra.mxu1 %v7247_v38  ;;  %8906 = vmatpush3.msra.mxu0 %v7279_v26  ;;  %v7236_v38 = vld [vmem:[%s11321_s20 + $0x618] sm:$0xff] }
0x2bf9   :  { %7674 = vmatmul.mubr.f32.gmra.mxu1 %v7033_v58  ;;  %7749 = vmatmul.mubr.f32.gmra.mxu0 %v7035_v40  ;;  %v7268_v26 = vld [vmem:[%s11321_s20 + $0x718] sm:$0xff]  ;;  %v7283_v58 = vld [vmem:[%s11321_s20 + $0x790] sm:$0xff]  ;;  %v6929_v40 = vpop.f32.mrf.mxu1 }
0x2bfa   :  { %8869 = vmatprep.subr.mxu1 %v7262_v42  ;;  %8907 = vmatprep.subr.mxu0 %v7294_v27  ;;  %v7006_v42 = vpop.f32.mrf.mxu0  ;;  %v7267_v27 = vld [vmem:[%s11321_s20 + $0x710] sm:$0xff] }
0x2bfb   :  { %8870 = vmatpush3.msra.mxu1 %v7246_v25  ;;  %7818 = vmatprep.mubr.f32.mxu1 %v7022_v20  ;;  %v6922_v25 = vadd.f32 %v11189_v13, %v6358_v6  ;;  %v6999_v20 = vadd.f32 %v11191_v53, %v6366_v19 }
0x2bfc   :  { %8908 = vmatpush3.msra.mxu0 %v7278_v24  ;;  %7893 = vmatprep.mubr.f32.mxu0 %v7024_v21  ;;  %v7234_v24 = vld [vmem:[%s11321_s20 + $0x608] sm:$0xff] }
0x2bfd   :  { %8871 = vmatprep.subr.mxu1 %v7261_v9  ;;  %8909 = vmatprep.subr.mxu0 %v7293_v29  ;;  %v7266_v21 = vld [vmem:[%s11321_s20 + $0x708] sm:$0xff]  ;;  %v6930_v9 = vadd.f32 %v6929_v40, %v11197_v17  ;;  %v7007_v29 = vadd.f32 %v7006_v42, %v11203_v59  ;;  %v7021_v13 = vmax.f32 %v6922_v25, 0.0  ;;  %v7023_v53 = vmax.f32 %v6999_v20, 0.0 }
0x2bfe   :  { %8872 = vmatpush3.msra.mxu1 %v7245_v4  ;;  %8910 = vmatpush3.msra.mxu0 %v7277_v34  ;;  %v7249_v4 = vld [vmem:[%s11321_s20 + $0x680] sm:$0xff] }
0x2bff   :  { %8873 = vmatprep.subr.mxu1 %v7260_v36  ;;  %8911 = vmatprep.subr.mxu0 %v7292_v41  ;;  %v7281_v34 = vld [vmem:[%s11321_s20 + $0x780] sm:$0xff]  ;;  %v7040_v17 = vmax.f32 %v7007_v29, 0.0 }
0x2c00   :  { %8874 = vmatpush3.msra.mxu1 %v7244_v43  ;;  %8912 = vmatpush3.msra.mxu0 %v7276_v35  ;;  %v7233_v36 = vld [vmem:[%s11321_s20 + $0x600] sm:$0xff]  ;;  %v6928_v43 = vadd.f32 %v6927_v3, %v6358_v6  ;;  %v7005_v35 = vadd.f32 %v7004_v22, %v6366_v19 }
0x2c01   :  { %8875 = vmatprep.subr.mxu1 %v7259_v47  ;;  %8913 = vmatprep.subr.mxu0 %v7291_v48  ;;  %v7265_v41 = vld [vmem:[%s11321_s20 + $0x700] sm:$0xff]  ;;  %v7038_v47 = vmax.f32 %v6930_v9, 0.0 }
0x2c02   :  { %8876 = vmatpush3.msra.mxu1 %v7243_v33  ;;  %8914 = vmatpush3.msra.mxu0 %v7275_v12  ;;  %v7037_v59 = vmax.f32 %v6928_v43, 0.0  ;;  %v7039_v48 = vmax.f32 %v7005_v35, 0.0 }
0x2c03   :  { %8877 = vmatprep.subr.mxu1 %v7258_v16  ;;  %8915 = vmatprep.subr.mxu0 %v7290_v51 }
0x2c04   :  { %8878 = vmatpush3.msra.mxu1 %v7242_v14  ;;  %8916 = vmatpush3.msra.mxu0 %v7274_v52 }
0x2c05   :  { %8879 = vmatprep.subr.mxu1 %v7257_v10  ;;  %8917 = vmatprep.subr.mxu0 %v7289_v11 }
0x2c06   :  { %8880 = vmatpush3.msra.mxu1 %v7241_v62  ;;  %8918 = vmatpush3.msra.mxu0 %v7273_v5 }
0x2c07   :  { %8881 = vmatprep.subr.mxu1 %v7256_v60  ;;  %8919 = vmatprep.subr.mxu0 %v7288_v46 }
0x2c08   :  { %8882 = vmatpush3.msra.mxu1 %v7240_v30  ;;  %8920 = vmatpush3.msra.mxu0 %v7272_v37 }
0x2c09   :  { %8883 = vmatprep.subr.mxu1 %v7255_v39  ;;  %8921 = vmatprep.subr.mxu0 %v7287_v61 }
0x2c0a   :  { %8884 = vmatpush3.msra.mxu1 %v7239_v50  ;;  %8922 = vmatpush3.msra.mxu0 %v7271_v0  ;;  %v8208_v50 = vld [vmem:[%s11323_s10] ss:$0 sm:$0xff] }
0x2c0b   :  { %8885 = vmatprep.subr.mxu1 %v7254_v7  ;;  %8923 = vmatprep.subr.mxu0 %v7286_v55 }
0x2c0c   :  { %8886 = vmatpush3.msra.mxu1 %v7238_v57  ;;  %8924 = vmatpush3.msra.mxu0 %v7270_v15 }
0x2c0d   :  { %8887 = vmatprep.subr.mxu1 %v7253_v8  ;;  %8925 = vmatprep.subr.mxu0 %v7285_v63 }
0x2c0e   :  { %8888 = vmatpush3.msra.mxu1 %v7237_v18  ;;  %8926 = vmatpush3.msra.mxu0 %v7269_v32 }
0x2c0f   :  { %8889 = vmatprep.subr.mxu1 %v7252_v45  ;;  %8927 = vmatprep.subr.mxu0 %v7284_v49 }
0x2c10   :  { %8890 = vmatpush3.msra.mxu1 %v7236_v38  ;;  %8928 = vmatpush3.msra.mxu0 %v7268_v26 }
0x2c11   :  { %8891 = vmatprep.subr.mxu1 %v7251_v56  ;;  %8929 = vmatprep.subr.mxu0 %v7283_v58 }
0x2c12   :  { %8892 = vmatpush3.msra.mxu1 %v7235_v1  ;;  %8930 = vmatpush3.msra.mxu0 %v7267_v27 }
0x2c13   :  { %8893 = vmatprep.subr.mxu1 %v7250_v2  ;;  %8931 = vmatprep.subr.mxu0 %v7282_v28  ;;  %v8669_v33 = vpop.f32.mrf.mxu1  ;;  %v8707_v12 = vpop.f32.mrf.mxu0 }
0x2c14   :  { %8894 = vmatpush3.msra.mxu1 %v7234_v24  ;;  %8932 = vmatpush3.msra.mxu0 %v7266_v21 }
0x2c15   :  { %8895 = vmatprep.subr.mxu1 %v7249_v4  ;;  %8933 = vmatprep.subr.mxu0 %v7281_v34  ;;  %v8670_v16 = vpop.f32.mrf.mxu1  ;;  %v8708_v51 = vpop.f32.mrf.mxu0 }
0x2c16   :  { %8896 = vmatpush3.msra.mxu1 %v7233_v36  ;;  %8934 = vmatpush3.msra.mxu0 %v7265_v41  ;;  %v8671_v61 = vadd.f32 %v8670_v16, %v8669_v33  ;;  %v8709_v63 = vadd.f32 %v8708_v51, %v8707_v12 }
0x2c17   :  { %7819 = vmatmul.mubr.f32.vlgmr.msra.gmra.mxu1 %v7021_v13  ;;  %7894 = vmatmul.mubr.f32.vlgmr.msra.gmra.mxu0 %v7023_v53 }
0x2c18   :  { %7823 = vmatprep.mubr.f32.mxu1 %v7038_v47  ;;  %7898 = vmatprep.mubr.f32.mxu0 %v7040_v17  ;;  %v7371_v57 = vadd.f32 %v8671_v61, %v8208_v50 }
0x2c19   :  { %9227 = vmatprep.subr.mxu1 %v9412_v23 }
0x2c1a   :  { %v7446_v18 = vadd.f32 %v8709_v63, %v7371_v57 }
0x2c1b   :  { %7824 = vmatmul.mubr.f32.gmra.mxu1 %v7037_v59  ;;  %7899 = vmatmul.mubr.f32.gmra.mxu0 %v7039_v48 }
0x2c1c   :  { %9231 = vmatprep.mubr.msk.f32.mxu1 %vm9413_vm2, %v9412_v23 }
0x2c8c   :  { %v8672_v14 = vpop.f32.mrf.mxu1  ;;  %v8710_v52 = vpop.f32.mrf.mxu0 }
0x2c8e   :  { %v8673_v10 = vpop.f32.mrf.mxu1  ;;  %v8711_v11 = vpop.f32.mrf.mxu0 }
0x2c8f   :  { %v8674_v15 = vadd.f32 %v8673_v10, %v8672_v14  ;;  %v8712_v49 = vadd.f32 %v8711_v11, %v8710_v52 }
0x2c90   :  { %v8745_v62 = vpop.f32.mrf.mxu1  ;;  %v8783_v5 = vpop.f32.mrf.mxu0 }
0x2c91   :  { %v7376_v32 = vadd.f32 %v8674_v15, %v8208_v50 }
0x2c92   :  { %v8746_v60 = vpop.f32.mrf.mxu1  ;;  %v8784_v46 = vpop.f32.mrf.mxu0 }
0x2c93   :  { %v8747_v3 = vadd.f32 %v8746_v60, %v8745_v62  ;;  %v7451_v26 = vadd.f32 %v8712_v49, %v7376_v32  ;;  %v8785_v56 = vadd.f32 %v8784_v46, %v8783_v5 }
0x2c95   :  { %v7521_v6 = vadd.f32 %v8747_v3, %v7446_v18  ;;  %v8209_v18 = vld [vmem:[%s11324_s11] ss:$0 sm:$0xff] }
0x2c96   :  { %v8748_v30 = vpop.f32.mrf.mxu1  ;;  %v8786_v37 = vpop.f32.mrf.mxu0 }
0x2c97   :  { %v7596_v42 = vadd.f32 %v8785_v56, %v7521_v6 }
0x2c98   :  { %v8749_v39 = vpop.f32.mrf.mxu1  ;;  %v8787_v0 = vpop.f32.mrf.mxu0 }
0x2c99   :  { %v8750_v19 = vadd.f32 %v8749_v39, %v8748_v30  ;;  %v8788_v2 = vadd.f32 %v8787_v0, %v8786_v37 }
0x2c9b   :  { %v7526_v1 = vadd.f32 %v8750_v19, %v7451_v26 }
0x2c9d   :  { %v7601_v21 = vadd.f32 %v8788_v2, %v7526_v1 }
0x2cb3   :  { %v8821_v7 = vpop.f32.mrf.mxu1  ;;  %v8859_v55 = vpop.f32.mrf.mxu0 }
0x2cb5   :  { %v8822_v8 = vpop.f32.mrf.mxu1  ;;  %v8860_v22 = vpop.f32.mrf.mxu0 }
0x2cb6   :  { %v8823_v58 = vadd.f32 %v8822_v8, %v8821_v7  ;;  %v8861_v9 = vadd.f32 %v8860_v22, %v8859_v55  ;;  %v7951_v7 = vld [vmem:[#allocation3] sm:$0x1] }
0x2cb8   :  { %v7671_v28 = vadd.f32 %v8823_v58, %v7596_v42  ;;  %v7950_v58 = vld [vmem:[%s9567_s6] sm:$0x1]  ;;  %s8059_s6 = sshll.u32 %s9423_s15, 4  ;;  %s8060_s6 = int_to_ptr.vmem [resolvable:$true] %s8059_s6 }
0x2cb9   :  { %v8824_v45 = vpop.f32.mrf.mxu1  ;;  %v8862_v38 = vpop.f32.mrf.mxu0  ;;  %s9361_s16 = scalar_lea.vmem %s8060_s6, 32  ;;  %p9366_p1 = scmp.lt.s32.totalorder %s8060_s6, %s8060_s6 }
0x2cba   :  { %v7746_v34 = vadd.f32 %v8861_v9, %v7671_v28  ;;  %p9362_p0 = scmp.ne.s32.totalorder %s8060_s6, %s9361_s16  ;;  %p9367_p2 = scmp.lt.s32.totalorder %s9361_s16, %s9361_s16 }
0x2cbb   :  { %v8825_v40 = vpop.f32.mrf.mxu1  ;;  %v8863_v27 = vpop.f32.mrf.mxu0 }
0x2cbc   :  { %v8826_v25 = vadd.f32 %v8825_v40, %v8824_v45  ;;  %v8864_v43 = vadd.f32 %v8863_v27, %v8862_v38  ;;  %v8210_v45 = vld [vmem:[%s9562_s12] ss:$0 sm:$0xff]  ;;  %s9422_s12 = smov 120   ;;  %p9368_p3 = por %p9367_p2, %p9366_p1 }
0x2cbe   :  { %v7676_v36 = vadd.f32 %v8826_v25, %v7601_v21  ;;  %p9369_p4 = pnand %p9368_p3, %p9362_p0 }
0x2cc0   :  { %v7751_v48 = vadd.f32 %v8864_v43, %v7676_v36 }
0x2cd7   :  { %v8897_v20 = vpop.f32.mrf.mxu1  ;;  %v8935_v24 = vpop.f32.mrf.mxu0 }
0x2cd9   :  { %v8898_v29 = vpop.f32.mrf.mxu1  ;;  %v8936_v4 = vpop.f32.mrf.mxu0 }
0x2cda   :  { %v8899_v41 = vadd.f32 %v8898_v29, %v8897_v20  ;;  %v8937_v47 = vadd.f32 %v8936_v4, %v8935_v24 }
0x2cdb   :  { %v8900_v13 = vpop.f32.mrf.mxu1  ;;  %v8938_v53 = vpop.f32.mrf.mxu0 }
0x2cdc   :  { %v7821_v35 = vadd.f32 %v8899_v41, %v7746_v34 }
0x2cdd   :  { %v8901_v17 = vpop.f32.mrf.mxu1  ;;  %v8939_v59 = vpop.f32.mrf.mxu0 }
0x2cde   :  { %v7896_v33 = vadd.f32 %v8937_v47, %v7821_v35  ;;  %v8902_v12 = vadd.f32 %v8901_v17, %v8900_v13  ;;  %v8940_v51 = vadd.f32 %v8939_v59, %v8938_v53 }
0x2ce0   :  { %v7826_v16 = vadd.f32 %v8902_v12, %v7751_v48  ;;  %v7904_v14 = vadd.f32 %v7896_v33, %v10784_v54 }
0x2ce2   :  { %v7901_v52 = vadd.f32 %v8940_v51, %v7826_v16  ;;  %v7908_v10 = vsel %vm248_vm1, %v7904_v14, 0.0 }
0x2ce3   :  { %7909 = vadd.xlane.f32.xlu1 %v7908_v10 }
0x2ce4   :  { %v7905_v11 = vadd.f32 %v7901_v52, %v10829_v44  ;;  %v9421_v44 = vmov 0  }
0x2ce5   :  { %9275 = vset.pattern.permute.xlu1 %v9421_v44  ;;  %9276 = vset.pattern.permute.xlu0 %v9421_v44 }
0x2ce6   :  { %v7911_v62 = vsel %vm248_vm1, %v7905_v11, 0.0 }
0x2ce7   :  { %7912 = vadd.xlane.f32.xlu0 %v7911_v62 }
0x2d6c   :  { %v7910_v5 = vpop.xlane.xlu1 %7909 }
0x2d6d   :  { %v7914_v60 = vmul.f32 0.015625, %v7910_v5 }
0x2d6f   :  { %v7916_v37 = vsub.f32 %v7904_v14, %v7914_v60 }
0x2d70   :  { %v7913_v46 = vpop.xlane.xlu0 %7912 }
0x2d71   :  { %v7915_v30 = vmul.f32 0.015625, %v7913_v46  ;;  %v7918_v0 = vmul.f32 %v7916_v37, %v7916_v37 }
0x2d73   :  { %v7917_v39 = vsub.f32 %v7905_v11, %v7915_v30  ;;  %v7920_v54 = vsel %vm248_vm1, %v7918_v0, 0.0 }
0x2d75   :  { %v7919_v61 = vmul.f32 %v7917_v39, %v7917_v39 }
0x2d77   :  { %v7923_v50 = vsel %vm248_vm1, %v7919_v61, 0.0 }
0x2d78   :  { %7924 = vadd.xlane.f32.xlu1 %v7923_v50 }
0x2d7c   :  { %7921 = vadd.xlane.f32.xlu1 %v7920_v54 }
0x2d8d   :  { %7954 = vperm.xlu1 %9275, %v7951_v7  }
0x2e01   :  { %v7925_v55 = vpop.xlane.xlu1 %7924 }
0x2e02   :  { %v7927_v57 = vmul.f32 0.015625, %v7925_v55 }
0x2e04   :  { %v7929_v15 = vadd.f32 1e-05, %v7927_v57 }
0x2e05   :  { %v7922_v8 = vpop.xlane.xlu1 %7921 }
0x2e06   :  { %9353 = vrsqrt.f32 %v7929_v15  ;;  %v7926_v63 = vmul.f32 0.015625, %v7922_v8 }
0x2e08   :  { %v7928_v3 = vadd.f32 1e-05, %v7926_v63 }
0x2e09   :  { %v7955_v40 = vpop.permute.xlu1 %7954 }
0x2e0a   :  { %9355 = vrsqrt.f32 %v7928_v3  ;;  %v7960_v42 = vrot.slane %v7955_v40, %v9621_v31 }
0x2e13   :  { %v9354_v22 = vpop.eup %9353 }
0x2e14   :  { %v7933_v32 = vmul.f32 %v9354_v22, %v7917_v39 }
0x2e16   :  { %v7941_v49 = vmul.f32 %v8209_v18, %v7933_v32 }
0x2e17   :  { %v9356_v6 = vpop.eup %9355 }
0x2e18   :  { %v7932_v19 = vmul.f32 %v9356_v6, %v7916_v37  ;;  %v7949_v38 = vadd.f32 %v8210_v45, %v7941_v49 }
0x2e1a   :  { %9228 = vmatpush3.xpose.msk.msra.mxu1 %vm248_vm1, %v7949_v38  ;;  %v7940_v26 = vmul.f32 %v8209_v18, %v7932_v19 }
0x2e1b   :  { %9229 = vmatprep.subr.mxu1 %v9412_v23 }
0x2e1c   :  { %v7948_v56 = vadd.f32 %v8210_v45, %v7940_v26 }
0x2e1e   :  { %9230 = vmatpush3.xpose.msk.msra.mxu1 %vm248_vm1, %v7948_v56 }
0x2e21   :  { %9232 = vmatmul.mubr.msk.f32.vlgmr.msra.gmra.mxu1 %vm248_vm1, %v7950_v58 }
0x2ee1   :  { %v8036_v1 = vpop.f32.mrf.mxu1 }
0x2ee2   :  { %v8037_v27 = vadd.f32 %v8036_v1, %v7960_v42 }
0x2ee3   :  { %v9233_v2 = vpop.f32.mrf.mxu1 }
0x2ee4   :  { %v8214_v28 = vmul.f32 -1.442695, %v8037_v27 }
0x2ee6   :  { %9357 = vpow2.f32 %v8214_v28 }
0x2ef3   :  { %v9358_v25 = vpop.eup %9357 }
0x2ef4   :  { %v8043_v20 = vadd.f32 1.0, %v9358_v25 }
0x2ef6   :  { %9359 = vrcp.f32 %v8043_v20 }
0x2f03   :  { %v9360_v24 = vpop.eup %9359 }
0x2f04   :  { %8049 = vrot.lane.b32.xlu1 %v9360_v24, %s9422_s12  ;;  %8047 = vst.msk [vmem:[#allocation4] sm:$0x1] %vm8046_vm5, %v9360_v24 }
0x2f76   :  { %v8050_v23 = vpop.permute.xlu1 %8049 }
0x2f77   :  { %8052 = vst.msk [vmem:[#allocation4 + $0x1] sm:$0x1] %vm8046_vm5, %v8050_v23 }
0x2f78   :  { %9372 = shalt.err (!%p9369_p4)
}
0x2f79   :  { %8062 = dma.vmem_to_hbm [thread:$0]  %s8060_s6, 32, %s9575_s4, [#allocation5]  }
0x2f7a   :  { %9381 = dma.done.wait [#allocation5], 32  }
0x2f7b   :  { %9382 = vsyncadd [#allocation5], 4294967264 }
0x2f7c   :  { %8066 = vsyncpa [#allocation5], 1 }

</bundles_post_ra>
